<compile_context>
chip_gen: v6e
topology: v6e:2x2x1
jax: 0.10.0
libtpu: 0.0.40
codegen_flags: <defaults>
</compile_context>

<pallas_src>
import functools

import jax
import jax.numpy as jnp
from jax.experimental import pallas as pl
from jax.experimental.pallas import tpu as pltpu


def _round_up(n, m):
    return ((n + m - 1) // m) * m


def _choose_tiling(batch, tb_max=512):
    """Batch tiling.

    - batch <= 256: one tile (grid step overhead dominates, do not split).
    - otherwise: an even number of tiles (>= 2), each ~<= tb_max rows, so the
      "parallel" batch axis puts one tile on each v7x TensorCore and tiles are
      large enough to fill the 256-row MXU on v6e/v7x.
    """
    b8 = _round_up(max(batch, 1), 8)
    if b8 <= 256:
        return b8, b8, 1
    num_tiles = max(2, pl.cdiv(b8, tb_max))
    if num_tiles % 2:
        num_tiles += 1                      # even tile count for v7x megacore
    tb = _round_up(pl.cdiv(b8, num_tiles), 8)
    return tb, num_tiles * tb, num_tiles


def _vae_kernel(x_ref, eps_ref,
                w_enc1_ref, b_enc1_ref, w_enc2_ref, b_enc2_ref,
                wd1_ref, bd1_ref, wd2_ref, bd2_ref,
                loss_ref, *, eup_bf16):
    x = x_ref[...]                       # (TB, D) f32
    eps = eps_ref[...]                   # (TB, Z) f32
    z_dim = eps.shape[1]

    # ---- Fused encoder layer 1: x @ [W1m | W1s] + [b1m | b1s], ReLU.
    h = jnp.dot(x.astype(jnp.bfloat16), w_enc1_ref[...],
                preferred_element_type=jnp.float32) + b_enc1_ref[...]
    h = jnp.maximum(h, 0.0)              # (TB, 2H) = [relu(h_m) | relu(h_s)]

    # ---- Fused encoder layer 2: block-diagonal weight -> [mean | pre-ReLU std].
    enc2 = jnp.dot(h.astype(jnp.bfloat16), w_enc2_ref[...],
                   preferred_element_type=jnp.float32) + b_enc2_ref[...]
    mean_enc = enc2[:, :z_dim]                           # (TB, Z)
    # TODO(synk): std can be exactly 0 here (ReLU output), making
    # -log(std) = +inf exactly as in the PyTorch reference; a softplus
    # parameterization would be numerically safer.
    std_enc = jnp.maximum(enc2[:, z_dim:], 0.0)          # (TB, Z)

    # ---- Reparameterize: z = mean + eps * std.
    z = mean_enc + eps * std_enc

    # ---- Decoder: Linear -> ReLU -> Linear (logits; sigmoid folded into loss).
    h_d = jnp.maximum(
        jnp.dot(z.astype(jnp.bfloat16), wd1_ref[...],
                preferred_element_type=jnp.float32) + bd1_ref[...], 0.0)
    logits = jnp.dot(h_d.astype(jnp.bfloat16), wd2_ref[...],
                     preferred_element_type=jnp.float32) + bd2_ref[...]  # (TB, D)

    # Bernoulli log-likelihood in logit space:
    #   x*log(sigmoid(l)) + (1-x)*log(1-sigmoid(l)) = x*l - softplus(l)
    neg_abs = -jnp.abs(logits)
    if eup_bf16:
        # v6e/v7x: bf16 EUP roughly doubles transcendental throughput.
        exp_t = jnp.exp(neg_abs.astype(jnp.bfloat16)).astype(jnp.float32)
    else:
        # v5e has no bf16 EUP/VPU; keep f32.
        exp_t = jnp.exp(neg_abs)
    softplus = jnp.maximum(logits, 0.0) + jnp.log1p(exp_t)

    loss_reg = jnp.sum(x * logits - softplus, axis=1)                    # (TB,)
    loss_rec = 0.5 * (jnp.sum(-jnp.log(std_enc) + std_enc * std_enc
                              + mean_enc * mean_enc, axis=1) - 1.0)      # (TB,)

    # Lane-dense (1, 1, TB) store instead of a (TB, 1) masked-store column.
    loss_ref[...] = (loss_rec - loss_reg)[None, None, :].astype(loss_ref.dtype)


def fuse_params(params):
    """Fuse the encoder branches and cast matmul operands to bf16 once.

    Hoisted out of the per-step path so the concat/cast does not run every call.
    """
    hidden_dim = params["w1m"].shape[1]
    z_dim = params["w2m"].shape[1]
    zeros_hz = jnp.zeros((hidden_dim, z_dim), jnp.float32)
    return dict(
        w_enc1=jnp.concatenate([params["w1m"], params["w1s"]],
                               axis=1).astype(jnp.bfloat16),          # (D, 2H)
        b_enc1=jnp.concatenate([params["b1m"], params["b1s"]],
                               axis=1).astype(jnp.float32),           # (1, 2H)
        w_enc2=jnp.concatenate(
            [jnp.concatenate([params["w2m"], zeros_hz], axis=1),
             jnp.concatenate([zeros_hz, params["w2s"]], axis=1)],
            axis=0).astype(jnp.bfloat16),                             # (2H, 2Z)
        b_enc2=jnp.concatenate([params["b2m"], params["b2s"]],
                               axis=1).astype(jnp.float32),           # (1, 2Z)
        wd1=params["wd1"].astype(jnp.bfloat16),                       # (Z, H)
        bd1=params["bd1"].astype(jnp.float32),
        wd2=params["wd2"].astype(jnp.bfloat16),                       # (H, D)
        bd2=params["bd2"].astype(jnp.float32),
    )


def _vae_forward(x_nchw, eps, fused, *, tb_max=512):
    """Scalar negative average ELBO for the batch (jit-compiled wrapper)."""
    w_enc1, b_enc1 = fused["w_enc1"], fused["b_enc1"]
    w_enc2, b_enc2 = fused["w_enc2"], fused["b_enc2"]
    wd1, bd1, wd2, bd2 = fused["wd1"], fused["bd1"], fused["wd2"], fused["bd2"]

    image_dim = w_enc1.shape[0]
    hidden_dim = wd1.shape[1]
    z_dim = w_enc2.shape[1] // 2

    x = x_nchw.reshape(-1, image_dim).astype(jnp.float32)   # == .view(-1, image_dim)
    batch = x.shape[0]
    eps = eps.astype(jnp.float32)

    tb, b_pad, num_tiles = _choose_tiling(batch, tb_max)
    if b_pad != batch:
        x = jnp.pad(x, ((0, b_pad - batch), (0, 0)))
        eps = jnp.pad(eps, ((0, b_pad - batch), (0, 0)))

    # bf16 EUP only on v6e/v7x; v5e keeps f32 transcendentals.
    try:
        kind = jax.devices()[0].device_kind.lower()
    except Exception:  # pragma: no cover - defensive
        kind = ""
    eup_bf16 = ("v6" in kind) or ("v7" in kind)

    def resident(shape):
        # Weights/biases: constant index_map -> stay resident in VMEM.
        return pl.BlockSpec(shape, lambda i: (0, 0))

    matmul_macs = (image_dim * 2 * hidden_dim + 2 * hidden_dim * 2 * z_dim
                   + z_dim * hidden_dim + hidden_dim * image_dim)
    w_bytes = (2 * matmul_macs                         # bf16 fused weights
               + 4 * (2 * hidden_dim + 2 * z_dim + hidden_dim + image_dim))
    cost = pl.CostEstimate(
        flops=2 * b_pad * matmul_macs,
        transcendentals=2 * b_pad * image_dim + b_pad * z_dim,
        bytes_accessed=4 * b_pad * (image_dim + z_dim + 1) + w_bytes,
    )

    per_tile = pl.pallas_call(
        functools.partial(_vae_kernel, eup_bf16=eup_bf16),
        out_shape=jax.ShapeDtypeStruct((num_tiles, 1, tb), jnp.float32),
        grid=(num_tiles,),
        in_specs=[
            pl.BlockSpec((tb, image_dim), lambda i: (i, 0)),   # x tile
            pl.BlockSpec((tb, z_dim), lambda i: (i, 0)),       # eps tile
            resident(w_enc1.shape), resident(b_enc1.shape),
            resident(w_enc2.shape), resident(b_enc2.shape),
            resident(wd1.shape), resident(bd1.shape),
            resident(wd2.shape), resident(bd2.shape),
        ],
        out_specs=pl.BlockSpec((1, 1, tb), lambda i: (i, 0, 0)),
        compiler_params=pltpu.CompilerParams(
            dimension_semantics=("parallel",)),
        cost_estimate=cost,
    )(x, eps, w_enc1, b_enc1, w_enc2, b_enc2, wd1, bd1, wd2, bd2)

    # Mean over the real (un-padded) batch rows, outside the kernel.
    per_sample = per_tile.reshape(b_pad)[:batch]
    return jnp.mean(per_sample)


vae_forward = jax.jit(_vae_forward, static_argnames=("tb_max",))


def init_params(key, image_dim, hidden_dim, z_dim):
    """Deterministic synthetic parameters (shapes follow the nn.Module __init__)."""
    ks = jax.random.split(key, 6)

    def lin(k, fan_in, fan_out, scale):
        # stored as (in, out) — i.e. the transpose of torch.nn.Linear.weight
        return scale * jax.random.normal(k, (fan_in, fan_out), jnp.float32)

    return dict(
        # encoder mean branch
        w1m=lin(ks[0], image_dim, hidden_dim, 0.05),
        b1m=jnp.zeros((1, hidden_dim), jnp.float32),
        w2m=lin(ks[1], hidden_dim, z_dim, 0.05),
        b2m=jnp.zeros((1, z_dim), jnp.float32),
        # encoder std branch (positive bias keeps std > 0 so log(std) is finite)
        w1s=lin(ks[2], image_dim, hidden_dim, 0.05),
        b1s=jnp.zeros((1, hidden_dim), jnp.float32),
        w2s=lin(ks[3], hidden_dim, z_dim, 0.01),
        b2s=jnp.full((1, z_dim), 0.5, jnp.float32),
        # decoder
        wd1=lin(ks[4], z_dim, hidden_dim, 0.05),
        bd1=jnp.zeros((1, hidden_dim), jnp.float32),
        wd2=lin(ks[5], hidden_dim, image_dim, 0.05),
        bd2=jnp.zeros((1, image_dim), jnp.float32),
    )


if __name__ == "__main__":
    # 16x16 "images" -> image_dim=256; batch=512 exercises the two-tile path
    # (tb=256: fills the 256-row MXU on v6e/v7x, one tile per v7x TensorCore).
    batch, side = 512, 16
    image_dim = side * side      # 256
    hidden_dim = 128
    z_dim = 32

    root = jax.random.PRNGKey(0)
    k_params, k_x, k_eps = jax.random.split(root, 3)

    params = init_params(k_params, image_dim, hidden_dim, z_dim)
    fused = fuse_params(params)                                        # hoisted fusion
    x = jax.random.uniform(k_x, (batch, 1, side, side), jnp.float32)   # NCHW like PyTorch
    eps = jax.random.normal(k_eps, (batch, z_dim), jnp.float32)        # torch.randn equivalent

    neg_elbo = jax.block_until_ready(vae_forward(x, eps, fused))
    assert neg_elbo.shape == ()
    assert bool(jnp.isfinite(neg_elbo))
    print("KERNEL_OK")
</pallas_src>

<mosaic_0001>
module attributes {stable_mosaic.version = 11 : i64} {
  func.func @_vae_kernel(%arg0: i32, %arg1: memref<256x256xf32, #tpu.memory_space<vmem>>, %arg2: memref<256x32xf32, #tpu.memory_space<vmem>>, %arg3: memref<256x256xbf16, #tpu.memory_space<vmem>>, %arg4: memref<1x256xf32, #tpu.memory_space<vmem>>, %arg5: memref<256x64xbf16, #tpu.memory_space<vmem>>, %arg6: memref<1x64xf32, #tpu.memory_space<vmem>>, %arg7: memref<32x128xbf16, #tpu.memory_space<vmem>>, %arg8: memref<1x128xf32, #tpu.memory_space<vmem>>, %arg9: memref<128x256xbf16, #tpu.memory_space<vmem>>, %arg10: memref<1x256xf32, #tpu.memory_space<vmem>>, %arg11: memref<1x1x256xf32, #tpu.memory_space<vmem>>) attributes {dimension_semantics = [#tpu.dimension_semantics<parallel>], iteration_bounds = array<i64: 2>, scalar_prefetch = 0 : i64, scratch_operands = 0 : i64, tpu.core_type = #tpu.core_type<tc>, window_params = [{transform_indices = @transform_0, window_bounds = array<i64: 256, 256>}, {transform_indices = @transform_1, window_bounds = array<i64: 256, 32>}, {pipeline_mode = #tpu.pipeline_mode<synchronous>, transform_indices = @transform_2, window_bounds = array<i64: 256, 256>}, {pipeline_mode = #tpu.pipeline_mode<synchronous>, transform_indices = @transform_3, window_bounds = array<i64: 1, 256>}, {pipeline_mode = #tpu.pipeline_mode<synchronous>, transform_indices = @transform_4, window_bounds = array<i64: 256, 64>}, {pipeline_mode = #tpu.pipeline_mode<synchronous>, transform_indices = @transform_5, window_bounds = array<i64: 1, 64>}, {pipeline_mode = #tpu.pipeline_mode<synchronous>, transform_indices = @transform_6, window_bounds = array<i64: 32, 128>}, {pipeline_mode = #tpu.pipeline_mode<synchronous>, transform_indices = @transform_7, window_bounds = array<i64: 1, 128>}, {pipeline_mode = #tpu.pipeline_mode<synchronous>, transform_indices = @transform_8, window_bounds = array<i64: 128, 256>}, {pipeline_mode = #tpu.pipeline_mode<synchronous>, transform_indices = @transform_9, window_bounds = array<i64: 1, 256>}, {transform_indices = @transform_10, window_bounds = array<i64: 1, 1, 256>}]} {
    %c0 = arith.constant 0 : index
    %c0_0 = arith.constant 0 : index
    %0 = vector.load %arg1[%c0, %c0_0] : memref<256x256xf32, #tpu.memory_space<vmem>>, vector<256x256xf32>
    %c0_1 = arith.constant 0 : index
    %c0_2 = arith.constant 0 : index
    %1 = vector.load %arg2[%c0_1, %c0_2] : memref<256x32xf32, #tpu.memory_space<vmem>>, vector<256x32xf32>
    %2 = arith.truncf %0 : vector<256x256xf32> to vector<256x256xbf16>
    %c0_3 = arith.constant 0 : index
    %c0_4 = arith.constant 0 : index
    %3 = vector.load %arg3[%c0_3, %c0_4] : memref<256x256xbf16, #tpu.memory_space<vmem>>, vector<256x256xbf16>
    %cst = arith.constant dense<0.000000e+00> : vector<256x256xf32>
    %4 = tpu.matmul %2, %3, %cst {dimension_numbers = #tpu.dot_dimension_numbers<[1], [0], [0], [1], [0, 0, 1, 1], [], []>} : vector<256x256xbf16>, vector<256x256xbf16>, vector<256x256xf32> -> vector<256x256xf32>
    %c0_5 = arith.constant 0 : index
    %c0_6 = arith.constant 0 : index
    %5 = vector.load %arg4[%c0_5, %c0_6] : memref<1x256xf32, #tpu.memory_space<vmem>>, vector<1x256xf32>
    %6 = vector.broadcast %5 : vector<1x256xf32> to vector<256x256xf32>
    %7 = arith.addf %4, %6 : vector<256x256xf32>
    %cst_7 = arith.constant 0.000000e+00 : f32
    %8 = vector.broadcast %cst_7 : f32 to vector<256x256xf32>
    %9 = arith.maximumf %7, %8 : vector<256x256xf32>
    %10 = arith.truncf %9 : vector<256x256xf32> to vector<256x256xbf16>
    %c0_8 = arith.constant 0 : index
    %c0_9 = arith.constant 0 : index
    %11 = vector.load %arg5[%c0_8, %c0_9] : memref<256x64xbf16, #tpu.memory_space<vmem>>, vector<256x64xbf16>
    %cst_10 = arith.constant dense<0.000000e+00> : vector<256x64xf32>
    %12 = tpu.matmul %10, %11, %cst_10 {dimension_numbers = #tpu.dot_dimension_numbers<[1], [0], [0], [1], [0, 0, 1, 1], [], []>} : vector<256x256xbf16>, vector<256x64xbf16>, vector<256x64xf32> -> vector<256x64xf32>
    %c0_11 = arith.constant 0 : index
    %c0_12 = arith.constant 0 : index
    %13 = vector.load %arg6[%c0_11, %c0_12] : memref<1x64xf32, #tpu.memory_space<vmem>>, vector<1x64xf32>
    %14 = vector.broadcast %13 : vector<1x64xf32> to vector<256x64xf32>
    %15 = arith.addf %12, %14 : vector<256x64xf32>
    %16 = vector.extract_strided_slice %15 {offsets = [0, 0], sizes = [256, 32], strides = [1, 1]} : vector<256x64xf32> to vector<256x32xf32>
    %17 = vector.extract_strided_slice %15 {offsets = [0, 32], sizes = [256, 32], strides = [1, 1]} : vector<256x64xf32> to vector<256x32xf32>
    %cst_13 = arith.constant 0.000000e+00 : f32
    %18 = vector.broadcast %cst_13 : f32 to vector<256x32xf32>
    %19 = arith.maximumf %17, %18 : vector<256x32xf32>
    %20 = arith.mulf %1, %19 : vector<256x32xf32>
    %21 = arith.addf %16, %20 : vector<256x32xf32>
    %22 = arith.truncf %21 : vector<256x32xf32> to vector<256x32xbf16>
    %c0_14 = arith.constant 0 : index
    %c0_15 = arith.constant 0 : index
    %23 = vector.load %arg7[%c0_14, %c0_15] : memref<32x128xbf16, #tpu.memory_space<vmem>>, vector<32x128xbf16>
    %cst_16 = arith.constant dense<0.000000e+00> : vector<256x128xf32>
    %24 = tpu.matmul %22, %23, %cst_16 {dimension_numbers = #tpu.dot_dimension_numbers<[1], [0], [0], [1], [0, 0, 1, 1], [], []>} : vector<256x32xbf16>, vector<32x128xbf16>, vector<256x128xf32> -> vector<256x128xf32>
    %c0_17 = arith.constant 0 : index
    %c0_18 = arith.constant 0 : index
    %25 = vector.load %arg8[%c0_17, %c0_18] : memref<1x128xf32, #tpu.memory_space<vmem>>, vector<1x128xf32>
    %26 = vector.broadcast %25 : vector<1x128xf32> to vector<256x128xf32>
    %27 = arith.addf %24, %26 : vector<256x128xf32>
    %cst_19 = arith.constant 0.000000e+00 : f32
    %28 = vector.broadcast %cst_19 : f32 to vector<256x128xf32>
    %29 = arith.maximumf %27, %28 : vector<256x128xf32>
    %30 = arith.truncf %29 : vector<256x128xf32> to vector<256x128xbf16>
    %c0_20 = arith.constant 0 : index
    %c0_21 = arith.constant 0 : index
    %31 = vector.load %arg9[%c0_20, %c0_21] : memref<128x256xbf16, #tpu.memory_space<vmem>>, vector<128x256xbf16>
    %cst_22 = arith.constant dense<0.000000e+00> : vector<256x256xf32>
    %32 = tpu.matmul %30, %31, %cst_22 {dimension_numbers = #tpu.dot_dimension_numbers<[1], [0], [0], [1], [0, 0, 1, 1], [], []>} : vector<256x128xbf16>, vector<128x256xbf16>, vector<256x256xf32> -> vector<256x256xf32>
    %c0_23 = arith.constant 0 : index
    %c0_24 = arith.constant 0 : index
    %33 = vector.load %arg10[%c0_23, %c0_24] : memref<1x256xf32, #tpu.memory_space<vmem>>, vector<1x256xf32>
    %34 = vector.broadcast %33 : vector<1x256xf32> to vector<256x256xf32>
    %35 = arith.addf %32, %34 : vector<256x256xf32>
    %36 = math.absf %35 : vector<256x256xf32>
    %cst_25 = arith.constant 0.000000e+00 : f32
    %37 = vector.broadcast %cst_25 : f32 to vector<256x256xf32>
    %38 = arith.subf %37, %36 : vector<256x256xf32>
    %39 = math.exp %38 : vector<256x256xf32>
    %cst_26 = arith.constant 0.000000e+00 : f32
    %40 = vector.broadcast %cst_26 : f32 to vector<256x256xf32>
    %41 = arith.maximumf %35, %40 : vector<256x256xf32>
    %42 = math.log1p %39 : vector<256x256xf32>
    %43 = arith.addf %41, %42 : vector<256x256xf32>
    %44 = arith.mulf %0, %35 : vector<256x256xf32>
    %45 = arith.subf %44, %43 : vector<256x256xf32>
    %cst_27 = arith.constant dense<0.000000e+00> : vector<256xf32>
    %46 = vector.multi_reduction <add>, %45, %cst_27 [1] : vector<256x256xf32> to vector<256xf32>
    %47 = math.log %19 : vector<256x32xf32>
    %cst_28 = arith.constant 0.000000e+00 : f32
    %48 = vector.broadcast %cst_28 : f32 to vector<256x32xf32>
    %49 = arith.subf %48, %47 : vector<256x32xf32>
    %50 = arith.mulf %19, %19 : vector<256x32xf32>
    %51 = arith.addf %49, %50 : vector<256x32xf32>
    %52 = arith.mulf %16, %16 : vector<256x32xf32>
    %53 = arith.addf %51, %52 : vector<256x32xf32>
    %cst_29 = arith.constant dense<0.000000e+00> : vector<256xf32>
    %54 = vector.multi_reduction <add>, %53, %cst_29 [1] : vector<256x32xf32> to vector<256xf32>
    %cst_30 = arith.constant 1.000000e+00 : f32
    %55 = vector.broadcast %cst_30 : f32 to vector<256xf32>
    %56 = arith.subf %54, %55 : vector<256xf32>
    %cst_31 = arith.constant 5.000000e-01 : f32
    %57 = vector.broadcast %cst_31 : f32 to vector<256xf32>
    %58 = arith.mulf %57, %56 : vector<256xf32>
    %59 = arith.subf %58, %46 : vector<256xf32>
    %60 = vector.shape_cast %59 : vector<256xf32> to vector<1x1x256xf32>
    %c0_32 = arith.constant 0 : index
    %c0_33 = arith.constant 0 : index
    %c0_34 = arith.constant 0 : index
    %61 = vector.load %arg11[%c0_32, %c0_33, %c0_34] : memref<1x1x256xf32, #tpu.memory_space<vmem>>, vector<1x1x256xf32>
    tpu.vector_store %arg11[%c0_32, %c0_33, %c0_34], %60 {strides = array<i32>} : memref<1x1x256xf32, #tpu.memory_space<vmem>>, vector<1x1x256xf32>,
    return
  }
  func.func @transform_0(%arg0: i32) -> (i32, i32) {
    %c0_i32 = arith.constant 0 : i32
    %c0_i32_0 = arith.constant 0 : i32
    return %arg0, %c0_i32 : i32, i32
  }
  func.func @transform_1(%arg0: i32) -> (i32, i32) {
    %c0_i32 = arith.constant 0 : i32
    %c0_i32_0 = arith.constant 0 : i32
    return %arg0, %c0_i32 : i32, i32
  }
  func.func @transform_2(%arg0: i32) -> (i32, i32) {
    %c0_i32 = arith.constant 0 : i32
    %c0_i32_0 = arith.constant 0 : i32
    %c0_i32_1 = arith.constant 0 : i32
    return %c0_i32, %c0_i32_0 : i32, i32
  }
  func.func @transform_3(%arg0: i32) -> (i32, i32) {
    %c0_i32 = arith.constant 0 : i32
    %c0_i32_0 = arith.constant 0 : i32
    %c0_i32_1 = arith.constant 0 : i32
    return %c0_i32, %c0_i32_0 : i32, i32
  }
  func.func @transform_4(%arg0: i32) -> (i32, i32) {
    %c0_i32 = arith.constant 0 : i32
    %c0_i32_0 = arith.constant 0 : i32
    %c0_i32_1 = arith.constant 0 : i32
    return %c0_i32, %c0_i32_0 : i32, i32
  }
  func.func @transform_5(%arg0: i32) -> (i32, i32) {
    %c0_i32 = arith.constant 0 : i32
    %c0_i32_0 = arith.constant 0 : i32
    %c0_i32_1 = arith.constant 0 : i32
    return %c0_i32, %c0_i32_0 : i32, i32
  }
  func.func @transform_6(%arg0: i32) -> (i32, i32) {
    %c0_i32 = arith.constant 0 : i32
    %c0_i32_0 = arith.constant 0 : i32
    %c0_i32_1 = arith.constant 0 : i32
    return %c0_i32, %c0_i32_0 : i32, i32
  }
  func.func @transform_7(%arg0: i32) -> (i32, i32) {
    %c0_i32 = arith.constant 0 : i32
    %c0_i32_0 = arith.constant 0 : i32
    %c0_i32_1 = arith.constant 0 : i32
    return %c0_i32, %c0_i32_0 : i32, i32
  }
  func.func @transform_8(%arg0: i32) -> (i32, i32) {
    %c0_i32 = arith.constant 0 : i32
    %c0_i32_0 = arith.constant 0 : i32
    %c0_i32_1 = arith.constant 0 : i32
    return %c0_i32, %c0_i32_0 : i32, i32
  }
  func.func @transform_9(%arg0: i32) -> (i32, i32) {
    %c0_i32 = arith.constant 0 : i32
    %c0_i32_0 = arith.constant 0 : i32
    %c0_i32_1 = arith.constant 0 : i32
    return %c0_i32, %c0_i32_0 : i32, i32
  }
  func.func @transform_10(%arg0: i32) -> (i32, i32, i32) {
    %c0_i32 = arith.constant 0 : i32
    %c0_i32_0 = arith.constant 0 : i32
    %c0_i32_1 = arith.constant 0 : i32
    return %arg0, %c0_i32, %c0_i32_0 : i32, i32, i32
  }
}

</mosaic_0001>

<bundles_post_ra>
// kernel: _vae_forward.1
= control target key start
LH: loop header
LB: loop body
LE: loop exit
PB: predicated region body
PF: predicated region fallthrough
CT: control target
= control target key end

     0   :  { %s7844_s13 = smov 0   ;;  %s11713_s0 = inlined_call_operand.vmem [shape: f32[512,256], index: 0, kind: input, shape index: {}]   ;;  %s11714_s1 = inlined_call_operand.vmem [shape: f32[512,32], index: 1, kind: input, shape index: {}]   ;;  %s11715_s2 = inlined_call_operand.vmem [shape: bf16[256,256], index: 2, kind: input, shape index: {}]   ;;  %s11716_s3 = inlined_call_operand.vmem [shape: f32[1,256], index: 3, kind: input, shape index: {}]   ;;  %s11717_s4 = inlined_call_operand.vmem [shape: bf16[256,64], index: 4, kind: input, shape index: {}]   ;;  %s11718_s5 = inlined_call_operand.vmem [shape: f32[1,64], index: 5, kind: input, shape index: {}]   ;;  %s11719_s6 = inlined_call_operand.vmem [shape: bf16[32,128], index: 6, kind: input, shape index: {}]   ;;  %s11720_s7 = inlined_call_operand.vmem [shape: f32[1,128], index: 7, kind: input, shape index: {}]   ;;  %s11721_s8 = inlined_call_operand.vmem [shape: bf16[128,256], index: 8, kind: input, shape index: {}]   ;;  %s11722_s9 = inlined_call_operand.vmem [shape: f32[1,256], index: 9, kind: input, shape index: {}]   ;;  %s11723_s10 = inlined_call_operand.vmem [shape: f32[2,1,256], index: 10, kind: output, shape index: {}]  }
   0x1 LB: > { %s7850_s14 = sadd.s32 4294967295, %s7783_s13   ;;  %p6981_p0 = scmp.ge.s32.totalorder %s7783_s13, 1  ;;  %s7783_s13 = sphi %s7844_s13, %s20_s13  }
   0x2   : > { %p325_p1 = scmp.lt.s32.totalorder %s7783_s13, 3 }
   0x4   : > { %p326_p2 = pnand %p6981_p0, %p325_p1 }
   0x6   : > { %329 = sbr.rel (%p326_p2) target bundleno = 1654 (0x676), region = 60 }
   0xb   : > { %v7303_v0 = vld [vmem:[%s11715_s2 + $0x74] ss:$8 sps:$4 sm:$0xff]   ;;  %v7305_v1 = vld [vmem:[%s11715_s2 + $0x70] ss:$8 sps:$4 sm:$0xff]   ;;  %v7306_v2 = vld [vmem:[%s11715_s2 + $0x64] ss:$8 sps:$4 sm:$0xff]  }
   0xc   : > { %718 = vmatprep.subr.bf16.mxu0 %v7303_v0  ;;  %v7308_v3 = vld [vmem:[%s11715_s2 + $0x60] ss:$8 sps:$4 sm:$0xff]   ;;  %v7309_v4 = vld [vmem:[%s11715_s2 + $0x54] ss:$8 sps:$4 sm:$0xff]   ;;  %s6982_s25 = sshll.u32 %s7850_s14, 5  ;;  %s7785_s27 = smov 96  }
   0xd   : > { %719 = vmatpush1.bf16.msra.mxu0 %v7305_v1  ;;  %v7311_v5 = vld [vmem:[%s11715_s2 + $0x50] ss:$8 sps:$4 sm:$0xff]   ;;  %p369_p3 = scmp.lt.s32.totalorder %s6982_s25, 63  ;;  %v7312_v6 = vld [vmem:[%s11715_s2 + $0x44] ss:$8 sps:$4 sm:$0xff]   ;;  %vm1566_vm0 = vcmask 261120  }
   0xe   : > { %720 = vmatprep.subr.bf16.mxu0 %v7306_v2  ;;  %v7314_v7 = vld [vmem:[%s11715_s2 + $0x40] ss:$8 sps:$4 sm:$0xff]   ;;  %v7315_v8 = vld [vmem:[%s11715_s2 + $0x34] ss:$8 sps:$4 sm:$0xff]   ;;  %v7317_v9 = vld [vmem:[%s11715_s2 + $0x30] ss:$8 sps:$4 sm:$0xff]  }
   0xf   : > { %s12126_s25 = smov (!%p369_p3, %s6982_s25), 63  ;;  %v7318_v10 = vld [vmem:[%s11715_s2 + $0x24] ss:$8 sps:$4 sm:$0xff]   ;;  %v7320_v11 = vld [vmem:[%s11715_s2 + $0x20] ss:$8 sps:$4 sm:$0xff]   ;;  %v7351_v34 = vld [vmem:[%s11717_s4 + $0x78] sm:$0xff]  }
  0x10   : > { %s7106_s18 = sshll.u32 %s12126_s25, 4  ;;  %v7321_v12 = vld [vmem:[%s11715_s2 + $0x14] ss:$8 sps:$4 sm:$0xff]   ;;  %v7323_v16 = vld [vmem:[%s11715_s2 + $0x10] ss:$8 sps:$4 sm:$0xff]   ;;  %7107 = vmatprep.subr.bf16.mxu1 %v7351_v34  ;;  %v7355_v43 = vld [vmem:[%s11717_s4 + $0x68] sm:$0xff]  }
  0x11   : > { %721 = vmatpush1.bf16.msra.mxu0 %v7308_v3  ;;  %s7894_s23 = scalar_lea.vmem %s11713_s0, %s7106_s18  ;;  %v7324_v17 = vld [vmem:[%s11715_s2 + $0x4] ss:$8 sps:$4 sm:$0xff]   ;;  %v7326_v18 = vld [vmem:[%s11715_s2] ss:$8 sps:$4 sm:$0xff]   ;;  %v7327_v19 = vld [vmem:[%s11715_s2 + $0xf4] ss:$8 sps:$4 sm:$0xff]  }
  0x12   : > { %722 = vmatprep.subr.bf16.mxu0 %v7309_v4  ;;  %v387_v13 = vld [vmem:[%s7894_s23 + $0x8] sm:$0xff]  ;;  %v389_v14 = vld [vmem:[%s7894_s23 + $0x18] sm:$0xff]  ;;  %v7353_v36 = vld [vmem:[%s11717_s4 + $0x70] sm:$0xff]   ;;  %s6986_s12 = sshll.u32 %s12126_s25, 3  ;;  %s7786_s21 = smov 32  }
  0x13   : > { %v483_v15 = vpack.c.bf16 %v389_v14, %v387_v13  ;;  %v7329_v20 = vld [vmem:[%s11715_s2 + $0xf0] ss:$8 sps:$4 sm:$0xff]   ;;  %v7330_v21 = vld [vmem:[%s11715_s2 + $0xe4] ss:$8 sps:$4 sm:$0xff]   ;;  %v7332_v22 = vld [vmem:[%s11715_s2 + $0xe0] ss:$8 sps:$4 sm:$0xff]   ;;  %s8407_s17 = scalar_lea.vmem %s11714_s1, %s6986_s12 }
  0x14   : > { %v7333_v23 = vld [vmem:[%s11715_s2 + $0xd4] ss:$8 sps:$4 sm:$0xff]   ;;  %v7335_v24 = vld [vmem:[%s11715_s2 + $0xd0] ss:$8 sps:$4 sm:$0xff]   ;;  %v7336_v25 = vld [vmem:[%s11715_s2 + $0xc4] ss:$8 sps:$4 sm:$0xff]  }
  0x15   : > { %723 = vmatpush1.bf16.msra.mxu0 %v7311_v5  ;;  %750 = vmatprep.mubr.bf16.mxu0 %v483_v15  ;;  %v7338_v26 = vld [vmem:[%s11715_s2 + $0xc0] ss:$8 sps:$4 sm:$0xff]   ;;  %v7339_v27 = vld [vmem:[%s11715_s2 + $0xb4] ss:$8 sps:$4 sm:$0xff]   ;;  %v7341_v28 = vld [vmem:[%s11715_s2 + $0xb0] ss:$8 sps:$4 sm:$0xff]  }
  0x16   : > { %724 = vmatprep.subr.bf16.mxu0 %v7312_v6  ;;  %v7342_v29 = vld [vmem:[%s11715_s2 + $0xa4] ss:$8 sps:$4 sm:$0xff]   ;;  %v7344_v30 = vld [vmem:[%s11715_s2 + $0xa0] ss:$8 sps:$4 sm:$0xff]   ;;  %v7345_v31 = vld [vmem:[%s11715_s2 + $0x94] ss:$8 sps:$4 sm:$0xff]  }
  0x17   : > { %v7347_v32 = vld [vmem:[%s11715_s2 + $0x90] ss:$8 sps:$4 sm:$0xff]   ;;  %v7348_v33 = vld [vmem:[%s11715_s2 + $0x84] ss:$8 sps:$4 sm:$0xff]   ;;  %v7350_v37 = vld [vmem:[%s11715_s2 + $0x80] ss:$8 sps:$4 sm:$0xff]  }
  0x18   : > { %v7352_v35 = vld [vmem:[%s11717_s4 + $0x38] sm:$0xff]   ;;  %v386_v38 = vld [vmem:[%s7894_s23] sm:$0xff]  ;;  %v388_v39 = vld [vmem:[%s7894_s23 + $0x10] sm:$0xff]  ;;  %p381_p4 = scmp.lt.s32.totalorder %s7850_s14, 1 }
  0x19   : > { %725 = vmatpush1.bf16.msra.mxu0 %v7314_v7  ;;  %v391_v40 = vld [vmem:[%s7894_s23 + $0x28] sm:$0xff]  ;;  %v393_v41 = vld [vmem:[%s7894_s23 + $0x38] sm:$0xff]  ;;  %7108 = vmatpush3.bf16.msra.mxu1 %v7352_v35  ;;  %v7354_v42 = vld [vmem:[%s11717_s4 + $0x30] sm:$0xff]   ;;  %v482_v44 = vpack.c.bf16 %v388_v39, %v386_v38 }
  0x1a   : > { %726 = vmatprep.subr.bf16.mxu0 %v7315_v8  ;;  %7109 = vmatprep.subr.bf16.mxu1 %v7353_v36  ;;  %v485_v45 = vpack.c.bf16 %v393_v41, %v391_v40  ;;  %v7356_v46 = vld [vmem:[%s11717_s4 + $0x28] sm:$0xff]   ;;  %v7357_v47 = vld [vmem:[%s11717_s4 + $0x60] sm:$0xff]   ;;  %v392_v49 = vld [vmem:[%s7894_s23 + $0x30] sm:$0xff]  ;;  %s12128_s14 = smov (!%p381_p4, %s7850_s14), 1 }
  0x1b   : > { %v390_v48 = vld [vmem:[%s7894_s23 + $0x20] sm:$0xff]  ;;  %v395_v50 = vld [vmem:[%s7894_s23 + $0x48] sm:$0xff]  ;;  %v397_v51 = vld [vmem:[%s7894_s23 + $0x58] sm:$0xff] }
  0x1c   : > { %v7358_v52 = vld [vmem:[%s11717_s4 + $0x20] sm:$0xff]   ;;  %v484_v53 = vpack.c.bf16 %v392_v49, %v390_v48  ;;  %v7359_v54 = vld [vmem:[%s11717_s4 + $0x58] sm:$0xff]   ;;  %v487_v55 = vpack.c.bf16 %v397_v51, %v395_v50  ;;  %v396_v58 = vld [vmem:[%s7894_s23 + $0x50] sm:$0xff] }
  0x1d   : > { %727 = vmatpush1.bf16.msra.mxu0 %v7317_v9  ;;  %7110 = vmatpush3.bf16.msra.mxu1 %v7354_v42  ;;  %v7360_v56 = vld [vmem:[%s11717_s4 + $0x18] sm:$0xff]   ;;  %v394_v57 = vld [vmem:[%s7894_s23 + $0x40] sm:$0xff]  ;;  %v399_v59 = vld [vmem:[%s7894_s23 + $0x68] sm:$0xff] }
  0x1e   : > { %728 = vmatprep.subr.bf16.mxu0 %v7318_v10  ;;  %7111 = vmatprep.subr.bf16.mxu1 %v7355_v43  ;;  %v401_v60 = vld [vmem:[%s7894_s23 + $0x78] sm:$0xff]  ;;  %v486_v61 = vpack.c.bf16 %v396_v58, %v394_v57  ;;  %v398_v63 = vld [vmem:[%s7894_s23 + $0x60] sm:$0xff]  ;;  %v400_v0 = vld [vmem:[%s7894_s23 + $0x70] sm:$0xff] }
  0x1f   : > { %v489_v62 = vpack.c.bf16 %v401_v60, %v399_v59  ;;  %v403_v1 = vld [vmem:[%s7894_s23 + $0x88] sm:$0xff]  ;;  %v405_v2 = vld [vmem:[%s7894_s23 + $0x98] sm:$0xff]  ;;  %v488_v3 = vpack.c.bf16 %v400_v0, %v398_v63  ;;  %v402_v5 = vld [vmem:[%s7894_s23 + $0x80] sm:$0xff] }
  0x20   : > { %v491_v4 = vpack.c.bf16 %v405_v2, %v403_v1  ;;  %v404_v6 = vld [vmem:[%s7894_s23 + $0x90] sm:$0xff]  ;;  %v407_v7 = vld [vmem:[%s7894_s23 + $0xa8] sm:$0xff]  ;;  %v409_v8 = vld [vmem:[%s7894_s23 + $0xb8] sm:$0xff] }
  0x21   : > { %729 = vmatpush1.bf16.msra.mxu0 %v7320_v11  ;;  %7112 = vmatpush3.bf16.msra.mxu1 %v7356_v46  ;;  %v490_v9 = vpack.c.bf16 %v404_v6, %v402_v5  ;;  %v493_v10 = vpack.c.bf16 %v409_v8, %v407_v7  ;;  %v406_v11 = vld [vmem:[%s7894_s23 + $0xa0] sm:$0xff]  ;;  %v411_v13 = vld [vmem:[%s7894_s23 + $0xc8] sm:$0xff]  ;;  %v413_v14 = vld [vmem:[%s7894_s23 + $0xd8] sm:$0xff] }
  0x22   : > { %730 = vmatprep.subr.bf16.mxu0 %v7321_v12  ;;  %7113 = vmatprep.subr.bf16.mxu1 %v7357_v47  ;;  %v408_v12 = vld [vmem:[%s7894_s23 + $0xb0] sm:$0xff]  ;;  %v422_v36 = vld [vmem:[%s7894_s23 + $0x120] sm:$0xff]  ;;  %v427_v39 = vld [vmem:[%s7894_s23 + $0x148] sm:$0xff] }
  0x23   : > { %v492_v15 = vpack.c.bf16 %v408_v12, %v406_v11  ;;  %v7361_v35 = vld [vmem:[%s11717_s4 + $0x50] sm:$0xff]   ;;  %v429_v40 = vld [vmem:[%s7894_s23 + $0x158] sm:$0xff]  ;;  %v7363_v42 = vld [vmem:[%s11717_s4 + $0x48] sm:$0xff]  }
  0x24   : > { %v7362_v38 = vld [vmem:[%s11717_s4 + $0x10] sm:$0xff]   ;;  %v503_v43 = vpack.c.bf16 %v429_v40, %v427_v39  ;;  %v426_v46 = vld [vmem:[%s7894_s23 + $0x140] sm:$0xff]  ;;  %v431_v49 = vld [vmem:[%s7894_s23 + $0x168] sm:$0xff] }
  0x25   : > { %731 = vmatpush1.bf16.msra.mxu0 %v7323_v16  ;;  %7114 = vmatpush3.bf16.msra.mxu1 %v7358_v52  ;;  %v495_v16 = vpack.c.bf16 %v413_v14, %v411_v13  ;;  %v428_v47 = vld [vmem:[%s7894_s23 + $0x150] sm:$0xff]  ;;  %v7366_v48 = vld [vmem:[%s11717_s4] sm:$0xff]   ;;  %v433_v50 = vld [vmem:[%s7894_s23 + $0x178] sm:$0xff] }
  0x26   : > { %732 = vmatprep.subr.bf16.mxu0 %v7324_v17  ;;  %7115 = vmatprep.subr.bf16.mxu1 %v7359_v54  ;;  %v410_v17 = vld [vmem:[%s7894_s23 + $0xc0] sm:$0xff]  ;;  %v502_v51 = vpack.c.bf16 %v428_v47, %v426_v46  ;;  %v505_v52 = vpack.c.bf16 %v433_v50, %v431_v49  ;;  %v432_v54 = vld [vmem:[%s7894_s23 + $0x170] sm:$0xff] }
  0x27   : > { %v434_v59 = vld [vmem:[%s7894_s23 + $0x180] sm:$0xff]  ;;  %v436_v60 = vld [vmem:[%s7894_s23 + $0x190] sm:$0xff] }
  0x28   : > { %v506_v63 = vpack.c.bf16 %v436_v60, %v434_v59  ;;  %v438_v1 = vld [vmem:[%s7894_s23 + $0x1a0] sm:$0xff]  ;;  %v440_v2 = vld [vmem:[%s7894_s23 + $0x1b0] sm:$0xff] }
  0x29   : > { %733 = vmatpush1.bf16.msra.mxu0 %v7326_v18  ;;  %7116 = vmatpush3.bf16.msra.mxu1 %v7360_v56  ;;  %v412_v18 = vld [vmem:[%s7894_s23 + $0xd0] sm:$0xff]  ;;  %v437_v56 = vld [vmem:[%s7894_s23 + $0x198] sm:$0xff]  ;;  %v508_v5 = vpack.c.bf16 %v440_v2, %v438_v1  ;;  %v442_v7 = vld [vmem:[%s7894_s23 + $0x1c0] sm:$0xff] }
  0x2a   : > { %734 = vmatprep.subr.bf16.mxu0 %v7327_v19  ;;  %v415_v19 = vld [vmem:[%s7894_s23 + $0xe8] sm:$0xff]  ;;  %7117 = vmatprep.subr.bf16.mxu1 %v7361_v35  ;;  %v444_v8 = vld [vmem:[%s7894_s23 + $0x1d0] sm:$0xff]  ;;  %v446_v13 = vld [vmem:[%s7894_s23 + $0x1e0] sm:$0xff] }
  0x2b   : > { %v510_v11 = vpack.c.bf16 %v444_v8, %v442_v7  ;;  %v448_v14 = vld [vmem:[%s7894_s23 + $0x1f0] sm:$0xff] }
  0x2d   : > { %735 = vmatpush2.bf16.msra.mxu0 %v7329_v20  ;;  %v417_v20 = vld [vmem:[%s7894_s23 + $0xf8] sm:$0xff]  ;;  %7118 = vmatpush3.bf16.msra.mxu1 %v7362_v38 }
  0x2e   : > { %736 = vmatprep.subr.bf16.mxu0 %v7330_v21  ;;  %v494_v21 = vpack.c.bf16 %v412_v18, %v410_v17  ;;  %7119 = vmatprep.subr.bf16.mxu1 %v7363_v42 }
  0x31   : > { %737 = vmatpush2.bf16.msra.mxu0 %v7332_v22  ;;  %v497_v22 = vpack.c.bf16 %v417_v20, %v415_v19  ;;  %v546_v20 = vld [vmem:[%s11716_s3] sm:$0x3] }
  0x32   : > { %738 = vmatprep.subr.bf16.mxu0 %v7333_v23  ;;  %v414_v23 = vld [vmem:[%s7894_s23 + $0xe0] sm:$0xff] }
  0x35   : > { %739 = vmatpush2.bf16.msra.mxu0 %v7335_v24  ;;  %v416_v24 = vld [vmem:[%s7894_s23 + $0xf0] sm:$0xff] }
  0x36   : > { %740 = vmatprep.subr.bf16.mxu0 %v7336_v25  ;;  %v419_v25 = vld [vmem:[%s7894_s23 + $0x108] sm:$0xff] }
  0x39   : > { %741 = vmatpush2.bf16.msra.mxu0 %v7338_v26  ;;  %v421_v26 = vld [vmem:[%s7894_s23 + $0x118] sm:$0xff] }
  0x3a   : > { %742 = vmatprep.subr.bf16.mxu0 %v7339_v27  ;;  %v496_v27 = vpack.c.bf16 %v416_v24, %v414_v23 }
  0x3d   : > { %743 = vmatpush2.bf16.msra.mxu0 %v7341_v28  ;;  %v499_v28 = vpack.c.bf16 %v421_v26, %v419_v25 }
  0x3e   : > { %744 = vmatprep.subr.bf16.mxu0 %v7342_v29  ;;  %v418_v29 = vld [vmem:[%s7894_s23 + $0x100] sm:$0xff] }
  0x41   : > { %745 = vmatpush2.bf16.msra.mxu0 %v7344_v30  ;;  %v420_v30 = vld [vmem:[%s7894_s23 + $0x110] sm:$0xff] }
  0x42   : > { %746 = vmatprep.subr.bf16.mxu0 %v7345_v31  ;;  %v423_v31 = vld [vmem:[%s7894_s23 + $0x128] sm:$0xff] }
  0x45   : > { %747 = vmatpush2.bf16.msra.mxu0 %v7347_v32  ;;  %v425_v32 = vld [vmem:[%s7894_s23 + $0x138] sm:$0xff] }
  0x46   : > { %748 = vmatprep.subr.bf16.mxu0 %v7348_v33  ;;  %v498_v33 = vpack.c.bf16 %v420_v30, %v418_v29  ;;  %v501_v34 = vpack.c.bf16 %v425_v32, %v423_v31 }
  0x49   : > { %749 = vmatpush2.bf16.msra.mxu0 %v7350_v37  ;;  %v424_v37 = vld [vmem:[%s7894_s23 + $0x130] sm:$0xff] }
  0x4a   : > { %v500_v41 = vpack.c.bf16 %v424_v37, %v422_v36 }
  0x4c   : > { %751 = vmatmul.mubr.bf16.vlgmr.msra.gmra.mxu0 %v482_v44  ;;  %v7364_v44 = vld [vmem:[%s11717_s4 + $0x8] sm:$0xff]  }
  0x4d   : > { %760 = vmatprep.mubr.bf16.mxu0 %v485_v45  ;;  %7120 = vmatpush3.bf16.msra.mxu1 %v7364_v44  ;;  %v7365_v45 = vld [vmem:[%s11717_s4 + $0x40] sm:$0xff]  }
  0x4e   : > { %7121 = vmatprep.subr.bf16.mxu1 %v7365_v45 }
  0x51   : > { %7122 = vmatpush3.bf16.msra.mxu1 %v7366_v48 }
  0x54   : > { %761 = vmatmul.mubr.bf16.gmra.mxu0 %v484_v53  ;;  %v430_v53 = vld [vmem:[%s7894_s23 + $0x160] sm:$0xff] }
  0x55   : > { %770 = vmatprep.mubr.bf16.mxu0 %v487_v55  ;;  %v435_v55 = vld [vmem:[%s7894_s23 + $0x188] sm:$0xff]  ;;  %v504_v57 = vpack.c.bf16 %v432_v54, %v430_v53 }
  0x56   : > { %v507_v58 = vpack.c.bf16 %v437_v56, %v435_v55 }
  0x5c   : > { %771 = vmatmul.mubr.bf16.gmra.mxu0 %v486_v61  ;;  %v439_v61 = vld [vmem:[%s7894_s23 + $0x1a8] sm:$0xff] }
  0x5d   : > { %780 = vmatprep.mubr.bf16.mxu0 %v489_v62  ;;  %v441_v62 = vld [vmem:[%s7894_s23 + $0x1b8] sm:$0xff] }
  0x5e   : > { %v509_v0 = vpack.c.bf16 %v441_v62, %v439_v61 }
  0x64   : > { %781 = vmatmul.mubr.bf16.gmra.mxu0 %v488_v3  ;;  %v443_v3 = vld [vmem:[%s7894_s23 + $0x1c8] sm:$0xff] }
  0x65   : > { %790 = vmatprep.mubr.bf16.mxu0 %v491_v4  ;;  %v445_v4 = vld [vmem:[%s7894_s23 + $0x1d8] sm:$0xff] }
  0x66   : > { %v511_v6 = vpack.c.bf16 %v445_v4, %v443_v3 }
  0x6c   : > { %791 = vmatmul.mubr.bf16.gmra.mxu0 %v490_v9  ;;  %v447_v9 = vld [vmem:[%s7894_s23 + $0x1e8] sm:$0xff] }
  0x6d   : > { %800 = vmatprep.mubr.bf16.mxu0 %v493_v10  ;;  %v449_v10 = vld [vmem:[%s7894_s23 + $0x1f8] sm:$0xff] }
  0x6e   : > { %v513_v12 = vpack.c.bf16 %v449_v10, %v447_v9 }
  0x74   : > { %801 = vmatmul.mubr.bf16.gmra.mxu0 %v492_v15  ;;  %v512_v15 = vpack.c.bf16 %v448_v14, %v446_v13 }
  0x75   : > { %810 = vmatprep.mubr.bf16.mxu0 %v495_v16  ;;  %v11724_v16 = vlaneseq }
  0x77   : > { %v8072_v17 = vshrl.u32 %v11724_v16, 7 }
  0x79   : > { %11760 = vst [vmem:[#allocation2_spill] sm:$0xff] %v8072_v17  ;;  %v8075_v18 = vsub.s32 1, %v8072_v17  ;;  %v8078_v19 = vsub.s32 0, %v8072_v17 }
  0x7b   : > { %11761 = vst [vmem:[#allocation3_spill] sm:$0xff] %v8075_v18  ;;  %11762 = vst [vmem:[#allocation4_spill] sm:$0xff] %v8078_v19  ;;  %v8087_v23 = vrot.slane %v546_v20, %v8078_v19 }
  0x7c   : > { %811 = vmatmul.mubr.bf16.gmra.mxu0 %v494_v21 }
  0x7d   : > { %820 = vmatprep.mubr.bf16.mxu0 %v497_v22  ;;  %v8084_v22 = vrot.slane %v546_v20, %v8075_v18 }
  0x84   : > { %821 = vmatmul.mubr.bf16.gmra.mxu0 %v496_v27 }
  0x85   : > { %830 = vmatprep.mubr.bf16.mxu0 %v499_v28 }
  0x8c   : > { %831 = vmatmul.mubr.bf16.gmra.mxu0 %v498_v33 }
  0x8d   : > { %840 = vmatprep.mubr.bf16.mxu0 %v501_v34 }
  0x94   : > { %841 = vmatmul.mubr.bf16.gmra.mxu0 %v500_v41 }
  0x95   : > { %850 = vmatprep.mubr.bf16.mxu0 %v503_v43 }
  0x9c   : > { %851 = vmatmul.mubr.bf16.gmra.mxu0 %v502_v51 }
  0x9d   : > { %860 = vmatprep.mubr.bf16.mxu0 %v505_v52 }
  0xa4   : > { %861 = vmatmul.mubr.bf16.gmra.mxu0 %v504_v57 }
  0xa5   : > { %870 = vmatprep.mubr.bf16.mxu0 %v507_v58 }
  0xac   : > { %871 = vmatmul.mubr.bf16.gmra.mxu0 %v506_v63 }
  0xad   : > { %880 = vmatprep.mubr.bf16.mxu0 %v509_v0 }
  0xb4   : > { %881 = vmatmul.mubr.bf16.gmra.mxu0 %v508_v5 }
  0xb5   : > { %890 = vmatprep.mubr.bf16.mxu0 %v511_v6 }
  0xbc   : > { %891 = vmatmul.mubr.bf16.gmra.mxu0 %v510_v11 }
  0xbd   : > { %900 = vmatprep.mubr.bf16.mxu0 %v513_v12 }
  0xc4   : > { %901 = vmatmul.mubr.bf16.gmra.mxu0 %v512_v15 }
 0x10c   : > { %v752_v21 = vpop.f32.mrf.mxu0 }
 0x10d   : > { %v753_v28 = vadd.f32 %v752_v21, %v8087_v23 }
 0x10e   : > { %v754_v24 = vpop.f32.mrf.mxu0 }
 0x10f   : > { %v755_v26 = vadd.f32 %v754_v24, %v8084_v22  ;;  %v911_v35 = vmax.f32 %v753_v28, 0.0 }
 0x110   : > { %v756_v25 = vpop.f32.mrf.mxu0 }
 0x111   : > { %v757_v27 = vadd.f32 %v756_v25, %v8087_v23  ;;  %v912_v33 = vmax.f32 %v755_v26, 0.0 }
 0x112   : > { %v758_v29 = vpop.f32.mrf.mxu0 }
 0x113   : > { %v759_v30 = vadd.f32 %v758_v29, %v8084_v22  ;;  %v913_v31 = vmax.f32 %v757_v27, 0.0 }
 0x114   : > { %v762_v32 = vpop.f32.mrf.mxu0 }
 0x115   : > { %v914_v34 = vmax.f32 %v759_v30, 0.0  ;;  %v975_v38 = vpack.c.bf16 %v913_v31, %v911_v35  ;;  %v763_v42 = vadd.f32 %v762_v32, %v8087_v23 }
 0x116   : > { %v764_v36 = vpop.f32.mrf.mxu0 }
 0x117   : > { %v976_v37 = vpack.c.bf16 %v914_v34, %v912_v33  ;;  %v765_v40 = vadd.f32 %v764_v36, %v8084_v22  ;;  %v915_v49 = vmax.f32 %v763_v42, 0.0 }
 0x118   : > { %v766_v39 = vpop.f32.mrf.mxu0 }
 0x119   : > { %v767_v41 = vadd.f32 %v766_v39, %v8087_v23  ;;  %1174 = vmatprep.mubr.bf16.mxu1 %v976_v37  ;;  %v916_v47 = vmax.f32 %v765_v40, 0.0 }
 0x11a   : > { %v768_v43 = vpop.f32.mrf.mxu0  ;;  %1175 = vmatmul.mubr.bf16.vlgmr.msra.gmra.mxu1 %v975_v38 }
 0x11b   : > { %v769_v44 = vadd.f32 %v768_v43, %v8084_v22  ;;  %v917_v45 = vmax.f32 %v767_v41, 0.0 }
 0x11c   : > { %v772_v46 = vpop.f32.mrf.mxu0 }
 0x11d   : > { %v918_v48 = vmax.f32 %v769_v44, 0.0  ;;  %v977_v52 = vpack.c.bf16 %v917_v45, %v915_v49  ;;  %v773_v56 = vadd.f32 %v772_v46, %v8087_v23 }
 0x11e   : > { %v774_v50 = vpop.f32.mrf.mxu0 }
 0x11f   : > { %v978_v51 = vpack.c.bf16 %v918_v48, %v916_v47  ;;  %v775_v54 = vadd.f32 %v774_v50, %v8084_v22  ;;  %v919_v63 = vmax.f32 %v773_v56, 0.0 }
 0x120   : > { %v776_v53 = vpop.f32.mrf.mxu0 }
 0x121   : > { %v777_v55 = vadd.f32 %v776_v53, %v8087_v23  ;;  %1182 = vmatprep.mubr.bf16.mxu1 %v978_v51  ;;  %v920_v61 = vmax.f32 %v775_v54, 0.0 }
 0x122   : > { %v778_v57 = vpop.f32.mrf.mxu0  ;;  %1183 = vmatmul.mubr.bf16.gmra.mxu1 %v977_v52 }
 0x123   : > { %v779_v58 = vadd.f32 %v778_v57, %v8084_v22  ;;  %v921_v59 = vmax.f32 %v777_v55, 0.0 }
 0x124   : > { %v782_v60 = vpop.f32.mrf.mxu0 }
 0x125   : > { %v922_v62 = vmax.f32 %v779_v58, 0.0  ;;  %v979_v2 = vpack.c.bf16 %v921_v59, %v919_v63  ;;  %v783_v6 = vadd.f32 %v782_v60, %v8087_v23 }
 0x126   : > { %v784_v0 = vpop.f32.mrf.mxu0 }
 0x127   : > { %v980_v1 = vpack.c.bf16 %v922_v62, %v920_v61  ;;  %v785_v4 = vadd.f32 %v784_v0, %v8084_v22  ;;  %v923_v13 = vmax.f32 %v783_v6, 0.0 }
 0x128   : > { %v786_v3 = vpop.f32.mrf.mxu0 }
 0x129   : > { %v787_v5 = vadd.f32 %v786_v3, %v8087_v23  ;;  %1190 = vmatprep.mubr.bf16.mxu1 %v980_v1  ;;  %v924_v11 = vmax.f32 %v785_v4, 0.0 }
 0x12a   : > { %v788_v7 = vpop.f32.mrf.mxu0  ;;  %1191 = vmatmul.mubr.bf16.gmra.mxu1 %v979_v2 }
 0x12b   : > { %v789_v8 = vadd.f32 %v788_v7, %v8084_v22  ;;  %v925_v9 = vmax.f32 %v787_v5, 0.0 }
 0x12c   : > { %v792_v10 = vpop.f32.mrf.mxu0 }
 0x12d   : > { %v926_v12 = vmax.f32 %v789_v8, 0.0  ;;  %v981_v20 = vpack.c.bf16 %v925_v9, %v923_v13  ;;  %v793_v26 = vadd.f32 %v792_v10, %v8087_v23 }
 0x12e   : > { %v794_v14 = vpop.f32.mrf.mxu0 }
 0x12f   : > { %v982_v15 = vpack.c.bf16 %v926_v12, %v924_v11  ;;  %v795_v24 = vadd.f32 %v794_v14, %v8084_v22  ;;  %v927_v33 = vmax.f32 %v793_v26, 0.0 }
 0x130   : > { %v796_v21 = vpop.f32.mrf.mxu0 }
 0x131   : > { %v797_v25 = vadd.f32 %v796_v21, %v8087_v23  ;;  %1198 = vmatprep.mubr.bf16.mxu1 %v982_v15  ;;  %v928_v31 = vmax.f32 %v795_v24, 0.0 }
 0x132   : > { %v798_v27 = vpop.f32.mrf.mxu0  ;;  %1199 = vmatmul.mubr.bf16.gmra.mxu1 %v981_v20 }
 0x133   : > { %v799_v28 = vadd.f32 %v798_v27, %v8084_v22  ;;  %v929_v29 = vmax.f32 %v797_v25, 0.0 }
 0x134   : > { %v802_v30 = vpop.f32.mrf.mxu0 }
 0x135   : > { %v930_v32 = vmax.f32 %v799_v28, 0.0  ;;  %v983_v36 = vpack.c.bf16 %v929_v29, %v927_v33  ;;  %v803_v40 = vadd.f32 %v802_v30, %v8087_v23 }
 0x136   : > { %v804_v34 = vpop.f32.mrf.mxu0 }
 0x137   : > { %v984_v35 = vpack.c.bf16 %v930_v32, %v928_v31  ;;  %v805_v38 = vadd.f32 %v804_v34, %v8084_v22  ;;  %v931_v47 = vmax.f32 %v803_v40, 0.0 }
 0x138   : > { %v806_v37 = vpop.f32.mrf.mxu0 }
 0x139   : > { %v807_v39 = vadd.f32 %v806_v37, %v8087_v23  ;;  %1206 = vmatprep.mubr.bf16.mxu1 %v984_v35  ;;  %v932_v45 = vmax.f32 %v805_v38, 0.0 }
 0x13a   : > { %v808_v41 = vpop.f32.mrf.mxu0  ;;  %1207 = vmatmul.mubr.bf16.gmra.mxu1 %v983_v36 }
 0x13b   : > { %v809_v42 = vadd.f32 %v808_v41, %v8084_v22  ;;  %v933_v43 = vmax.f32 %v807_v39, 0.0 }
 0x13c   : > { %v812_v44 = vpop.f32.mrf.mxu0 }
 0x13d   : > { %v934_v46 = vmax.f32 %v809_v42, 0.0  ;;  %v985_v50 = vpack.c.bf16 %v933_v43, %v931_v47  ;;  %v813_v54 = vadd.f32 %v812_v44, %v8087_v23 }
 0x13e   : > { %v814_v48 = vpop.f32.mrf.mxu0 }
 0x13f   : > { %v986_v49 = vpack.c.bf16 %v934_v46, %v932_v45  ;;  %v815_v52 = vadd.f32 %v814_v48, %v8084_v22  ;;  %v935_v61 = vmax.f32 %v813_v54, 0.0 }
 0x140   : > { %v816_v51 = vpop.f32.mrf.mxu0 }
 0x141   : > { %v817_v53 = vadd.f32 %v816_v51, %v8087_v23  ;;  %1214 = vmatprep.mubr.bf16.mxu1 %v986_v49  ;;  %v936_v59 = vmax.f32 %v815_v52, 0.0 }
 0x142   : > { %v818_v55 = vpop.f32.mrf.mxu0  ;;  %1215 = vmatmul.mubr.bf16.gmra.mxu1 %v985_v50 }
 0x143   : > { %v819_v56 = vadd.f32 %v818_v55, %v8084_v22  ;;  %v937_v57 = vmax.f32 %v817_v53, 0.0 }
 0x144   : > { %v822_v58 = vpop.f32.mrf.mxu0 }
 0x145   : > { %v938_v60 = vmax.f32 %v819_v56, 0.0  ;;  %v987_v0 = vpack.c.bf16 %v937_v57, %v935_v61  ;;  %v823_v4 = vadd.f32 %v822_v58, %v8087_v23 }
 0x146   : > { %v824_v62 = vpop.f32.mrf.mxu0 }
 0x147   : > { %v988_v63 = vpack.c.bf16 %v938_v60, %v936_v59  ;;  %v825_v2 = vadd.f32 %v824_v62, %v8084_v22  ;;  %v939_v11 = vmax.f32 %v823_v4, 0.0 }
 0x148   : > { %v826_v1 = vpop.f32.mrf.mxu0 }
 0x149   : > { %v827_v3 = vadd.f32 %v826_v1, %v8087_v23  ;;  %1222 = vmatprep.mubr.bf16.mxu1 %v988_v63  ;;  %v940_v9 = vmax.f32 %v825_v2, 0.0 }
 0x14a   : > { %v828_v5 = vpop.f32.mrf.mxu0  ;;  %1223 = vmatmul.mubr.bf16.gmra.mxu1 %v987_v0 }
 0x14b   : > { %v829_v6 = vadd.f32 %v828_v5, %v8084_v22  ;;  %v941_v7 = vmax.f32 %v827_v3, 0.0 }
 0x14c   : > { %v832_v8 = vpop.f32.mrf.mxu0 }
 0x14d   : > { %v942_v10 = vmax.f32 %v829_v6, 0.0  ;;  %v989_v14 = vpack.c.bf16 %v941_v7, %v939_v11  ;;  %v833_v24 = vadd.f32 %v832_v8, %v8087_v23 }
 0x14e   : > { %v834_v12 = vpop.f32.mrf.mxu0 }
 0x14f   : > { %v990_v13 = vpack.c.bf16 %v942_v10, %v940_v9  ;;  %v835_v20 = vadd.f32 %v834_v12, %v8084_v22  ;;  %v943_v31 = vmax.f32 %v833_v24, 0.0 }
 0x150   : > { %v836_v15 = vpop.f32.mrf.mxu0 }
 0x151   : > { %v837_v21 = vadd.f32 %v836_v15, %v8087_v23  ;;  %1230 = vmatprep.mubr.bf16.mxu1 %v990_v13  ;;  %v944_v29 = vmax.f32 %v835_v20, 0.0 }
 0x152   : > { %v838_v25 = vpop.f32.mrf.mxu0  ;;  %1231 = vmatmul.mubr.bf16.gmra.mxu1 %v989_v14 }
 0x153   : > { %v839_v26 = vadd.f32 %v838_v25, %v8084_v22  ;;  %v945_v27 = vmax.f32 %v837_v21, 0.0 }
 0x154   : > { %v842_v28 = vpop.f32.mrf.mxu0 }
 0x155   : > { %v946_v30 = vmax.f32 %v839_v26, 0.0  ;;  %v991_v34 = vpack.c.bf16 %v945_v27, %v943_v31  ;;  %v843_v38 = vadd.f32 %v842_v28, %v8087_v23 }
 0x156   : > { %v844_v32 = vpop.f32.mrf.mxu0 }
 0x157   : > { %v992_v33 = vpack.c.bf16 %v946_v30, %v944_v29  ;;  %v845_v36 = vadd.f32 %v844_v32, %v8084_v22  ;;  %v947_v45 = vmax.f32 %v843_v38, 0.0 }
 0x158   : > { %v846_v35 = vpop.f32.mrf.mxu0 }
 0x159   : > { %v847_v37 = vadd.f32 %v846_v35, %v8087_v23  ;;  %1238 = vmatprep.mubr.bf16.mxu1 %v992_v33  ;;  %v948_v43 = vmax.f32 %v845_v36, 0.0 }
 0x15a   : > { %v848_v39 = vpop.f32.mrf.mxu0  ;;  %1239 = vmatmul.mubr.bf16.gmra.mxu1 %v991_v34 }
 0x15b   : > { %v849_v40 = vadd.f32 %v848_v39, %v8084_v22  ;;  %v949_v41 = vmax.f32 %v847_v37, 0.0 }
 0x15c   : > { %v852_v42 = vpop.f32.mrf.mxu0 }
 0x15d   : > { %v950_v44 = vmax.f32 %v849_v40, 0.0  ;;  %v993_v48 = vpack.c.bf16 %v949_v41, %v947_v45  ;;  %v853_v52 = vadd.f32 %v852_v42, %v8087_v23 }
 0x15e   : > { %v854_v46 = vpop.f32.mrf.mxu0 }
 0x15f   : > { %v994_v47 = vpack.c.bf16 %v950_v44, %v948_v43  ;;  %v855_v50 = vadd.f32 %v854_v46, %v8084_v22  ;;  %v951_v59 = vmax.f32 %v853_v52, 0.0  ;;  %v7367_v46 = vld [vmem:[%s11719_s6 + $0x8] sm:$0xff]  }
 0x160   : > { %v856_v49 = vpop.f32.mrf.mxu0  ;;  %7237 = vmatprep.subr.bf16.mxu1 %v7367_v46 }
 0x161   : > { %v857_v51 = vadd.f32 %v856_v49, %v8087_v23  ;;  %1246 = vmatprep.mubr.bf16.mxu1 %v994_v47  ;;  %v952_v57 = vmax.f32 %v855_v50, 0.0  ;;  %7238 = vmatpush3.bf16.msra.mxu1 %v7367_v46 }
 0x162   : > { %v858_v53 = vpop.f32.mrf.mxu0  ;;  %1247 = vmatmul.mubr.bf16.gmra.mxu1 %v993_v48 }
 0x163   : > { %v859_v54 = vadd.f32 %v858_v53, %v8084_v22  ;;  %v953_v55 = vmax.f32 %v857_v51, 0.0 }
 0x164   : > { %v862_v56 = vpop.f32.mrf.mxu0 }
 0x165   : > { %v954_v58 = vmax.f32 %v859_v54, 0.0  ;;  %v995_v62 = vpack.c.bf16 %v953_v55, %v951_v59  ;;  %v863_v2 = vadd.f32 %v862_v56, %v8087_v23 }
 0x166   : > { %v864_v60 = vpop.f32.mrf.mxu0 }
 0x167   : > { %v996_v61 = vpack.c.bf16 %v954_v58, %v952_v57  ;;  %v865_v0 = vadd.f32 %v864_v60, %v8084_v22  ;;  %v955_v9 = vmax.f32 %v863_v2, 0.0 }
 0x168   : > { %v866_v63 = vpop.f32.mrf.mxu0 }
 0x169   : > { %v867_v1 = vadd.f32 %v866_v63, %v8087_v23  ;;  %1254 = vmatprep.mubr.bf16.mxu1 %v996_v61  ;;  %v956_v7 = vmax.f32 %v865_v0, 0.0 }
 0x16a   : > { %v868_v3 = vpop.f32.mrf.mxu0  ;;  %1255 = vmatmul.mubr.bf16.gmra.mxu1 %v995_v62 }
 0x16b   : > { %v869_v4 = vadd.f32 %v868_v3, %v8084_v22  ;;  %v957_v5 = vmax.f32 %v867_v1, 0.0 }
 0x16c   : > { %v872_v6 = vpop.f32.mrf.mxu0 }
 0x16d   : > { %v958_v8 = vmax.f32 %v869_v4, 0.0  ;;  %v997_v12 = vpack.c.bf16 %v957_v5, %v955_v9  ;;  %v873_v20 = vadd.f32 %v872_v6, %v8087_v23 }
 0x16e   : > { %v874_v10 = vpop.f32.mrf.mxu0 }
 0x16f   : > { %v998_v11 = vpack.c.bf16 %v958_v8, %v956_v7  ;;  %v875_v14 = vadd.f32 %v874_v10, %v8084_v22  ;;  %v959_v29 = vmax.f32 %v873_v20, 0.0  ;;  %v7368_v10 = vld [vmem:[%s11719_s6] sm:$0xff]  }
 0x170   : > { %v876_v13 = vpop.f32.mrf.mxu0  ;;  %7239 = vmatprep.subr.bf16.mxu1 %v7368_v10 }
 0x171   : > { %v877_v15 = vadd.f32 %v876_v13, %v8087_v23  ;;  %1262 = vmatprep.mubr.bf16.mxu1 %v998_v11  ;;  %v960_v27 = vmax.f32 %v875_v14, 0.0  ;;  %7240 = vmatpush3.bf16.msra.mxu1 %v7368_v10 }
 0x172   : > { %v878_v21 = vpop.f32.mrf.mxu0  ;;  %1263 = vmatmul.mubr.bf16.gmra.mxu1 %v997_v12 }
 0x173   : > { %v879_v24 = vadd.f32 %v878_v21, %v8084_v22  ;;  %v961_v25 = vmax.f32 %v877_v15, 0.0 }
 0x174   : > { %v882_v26 = vpop.f32.mrf.mxu0 }
 0x175   : > { %v962_v28 = vmax.f32 %v879_v24, 0.0  ;;  %v999_v32 = vpack.c.bf16 %v961_v25, %v959_v29  ;;  %v883_v36 = vadd.f32 %v882_v26, %v8087_v23 }
 0x176   : > { %v884_v30 = vpop.f32.mrf.mxu0 }
 0x177   : > { %v1000_v31 = vpack.c.bf16 %v962_v28, %v960_v27  ;;  %v885_v34 = vadd.f32 %v884_v30, %v8084_v22  ;;  %v963_v43 = vmax.f32 %v883_v36, 0.0 }
 0x178   : > { %v886_v33 = vpop.f32.mrf.mxu0 }
 0x179   : > { %v887_v35 = vadd.f32 %v886_v33, %v8087_v23  ;;  %1270 = vmatprep.mubr.bf16.mxu1 %v1000_v31  ;;  %v964_v41 = vmax.f32 %v885_v34, 0.0 }
 0x17a   : > { %v888_v37 = vpop.f32.mrf.mxu0  ;;  %1271 = vmatmul.mubr.bf16.gmra.mxu1 %v999_v32 }
 0x17b   : > { %v889_v38 = vadd.f32 %v888_v37, %v8084_v22  ;;  %v965_v39 = vmax.f32 %v887_v35, 0.0 }
 0x17c   : > { %v892_v40 = vpop.f32.mrf.mxu0 }
 0x17d   : > { %v966_v42 = vmax.f32 %v889_v38, 0.0  ;;  %v1001_v47 = vpack.c.bf16 %v965_v39, %v963_v43  ;;  %v893_v51 = vadd.f32 %v892_v40, %v8087_v23 }
 0x17e   : > { %v894_v44 = vpop.f32.mrf.mxu0 }
 0x17f   : > { %v1002_v45 = vpack.c.bf16 %v966_v42, %v964_v41  ;;  %v895_v49 = vadd.f32 %v894_v44, %v8084_v22  ;;  %v967_v58 = vmax.f32 %v893_v51, 0.0 }
 0x180   : > { %v896_v48 = vpop.f32.mrf.mxu0 }
 0x181   : > { %v897_v50 = vadd.f32 %v896_v48, %v8087_v23  ;;  %1278 = vmatprep.mubr.bf16.mxu1 %v1002_v45  ;;  %v968_v56 = vmax.f32 %v895_v49, 0.0 }
 0x182   : > { %v898_v52 = vpop.f32.mrf.mxu0  ;;  %1279 = vmatmul.mubr.bf16.gmra.mxu1 %v1001_v47 }
 0x183   : > { %v899_v53 = vadd.f32 %v898_v52, %v8084_v22  ;;  %v969_v54 = vmax.f32 %v897_v50, 0.0 }
 0x184   : > { %v902_v55 = vpop.f32.mrf.mxu0 }
 0x185   : > { %v970_v57 = vmax.f32 %v899_v53, 0.0  ;;  %v1003_v61 = vpack.c.bf16 %v969_v54, %v967_v58  ;;  %v903_v1 = vadd.f32 %v902_v55, %v8087_v23 }
 0x186   : > { %v904_v59 = vpop.f32.mrf.mxu0 }
 0x187   : > { %v1004_v60 = vpack.c.bf16 %v970_v57, %v968_v56  ;;  %v905_v63 = vadd.f32 %v904_v59, %v8084_v22  ;;  %v971_v7 = vmax.f32 %v903_v1, 0.0 }
 0x188   : > { %v906_v62 = vpop.f32.mrf.mxu0 }
 0x189   : > { %v907_v0 = vadd.f32 %v906_v62, %v8087_v23  ;;  %1286 = vmatprep.mubr.bf16.mxu1 %v1004_v60  ;;  %v972_v5 = vmax.f32 %v905_v63, 0.0  ;;  %v8162_v23 = vld [vmem:[%s11718_s5] ss:$0 sm:$0xff] }
 0x18a   : > { %v908_v2 = vpop.f32.mrf.mxu0  ;;  %1287 = vmatmul.mubr.bf16.gmra.mxu1 %v1003_v61 }
 0x18b   : > { %v909_v3 = vadd.f32 %v908_v2, %v8084_v22  ;;  %v973_v4 = vmax.f32 %v907_v0, 0.0 }
 0x18d   : > { %v974_v6 = vmax.f32 %v909_v3, 0.0  ;;  %v1005_v9 = vpack.c.bf16 %v973_v4, %v971_v7 }
 0x18f   : > { %v1006_v8 = vpack.c.bf16 %v974_v6, %v972_v5 }
 0x191   : > { %1294 = vmatprep.mubr.bf16.mxu1 %v1006_v8 }
 0x192   : > { %1295 = vmatmul.mubr.bf16.gmra.mxu1 %v1005_v9 }
 0x1da   : > { %v7123_v11 = vpop.f32.mrf.mxu1 }
 0x1dc   : > { %v7124_v22 = vpop.f32.mrf.mxu1 }
 0x1dd   : > { %v7125_v12 = vadd.f32 %v7124_v22, %v7123_v11 }
 0x1de   : > { %v7126_v13 = vpop.f32.mrf.mxu1 }
 0x1df   : > { %v8165_v14 = vadd.f32 %v7125_v12, %v8162_v23 }
 0x1e0   : > { %v7127_v15 = vpop.f32.mrf.mxu1 }
 0x1e1   : > { %v7128_v20 = vadd.f32 %v7127_v15, %v7126_v13  ;;  %v8168_v21 = vmax.f32 %v8165_v14, 0.0 }
 0x1e2   : > { %v7129_v24 = vpop.f32.mrf.mxu1 }
 0x1e3   : > { %v8171_v25 = vadd.f32 %v7128_v20, %v8162_v23  ;;  %1367 = vrot.lane.b32.xlu0 %v8168_v21, %s7785_s27 }
 0x1e4   : > { %v7130_v26 = vpop.f32.mrf.mxu1 }
 0x1e5   : > { %v7131_v27 = vadd.f32 %v7130_v26, %v7129_v24  ;;  %v8176_v28 = vmax.f32 %v8171_v25, 0.0 }
 0x1e6   : > { %v7132_v29 = vpop.f32.mrf.mxu1 }
 0x1e7   : > { %v8179_v30 = vadd.f32 %v7131_v27, %v8162_v23  ;;  %1369 = vrot.lane.b32.xlu0 %v8176_v28, %s7785_s27  ;;  %7393 = vlog2.f32 %v8176_v28 }
 0x1e8   : > { %v7133_v31 = vpop.f32.mrf.mxu1  ;;  %7395 = vlog2.f32 %v8168_v21 }
 0x1e9   : > { %v7134_v32 = vadd.f32 %v7133_v31, %v7132_v29  ;;  %v8184_v33 = vmax.f32 %v8179_v30, 0.0 }
 0x1ea   : > { %v7135_v34 = vpop.f32.mrf.mxu1 }
 0x1eb   : > { %v8187_v35 = vadd.f32 %v7134_v32, %v8162_v23  ;;  %1371 = vrot.lane.b32.xlu1 %v8184_v33, %s7785_s27  ;;  %7397 = vlog2.f32 %v8184_v33 }
 0x1ec   : > { %v7136_v36 = vpop.f32.mrf.mxu1 }
 0x1ed   : > { %v7137_v37 = vadd.f32 %v7136_v36, %v7135_v34  ;;  %v8192_v38 = vmax.f32 %v8187_v35, 0.0 }
 0x1ee   : > { %v7138_v39 = vpop.f32.mrf.mxu1 }
 0x1ef   : > { %v8195_v40 = vadd.f32 %v7137_v37, %v8162_v23  ;;  %1373 = vrot.lane.b32.xlu1 %v8192_v38, %s7785_s27  ;;  %7399 = vlog2.f32 %v8192_v38 }
 0x1f0   : > { %v7139_v41 = vpop.f32.mrf.mxu1 }
 0x1f1   : > { %v7140_v42 = vadd.f32 %v7139_v41, %v7138_v39  ;;  %v8200_v43 = vmax.f32 %v8195_v40, 0.0 }
 0x1f2   : > { %v7141_v44 = vpop.f32.mrf.mxu1 }
 0x1f3   : > { %v8203_v45 = vadd.f32 %v7140_v42, %v8162_v23  ;;  %1375 = vrot.lane.b32.xlu0 %v8200_v43, %s7785_s27  ;;  %7401 = vlog2.f32 %v8200_v43 }
 0x1f4   : > { %v7142_v46 = vpop.f32.mrf.mxu1 }
 0x1f5   : > { %v7143_v47 = vadd.f32 %v7142_v46, %v7141_v44  ;;  %v8208_v48 = vmax.f32 %v8203_v45, 0.0 }
 0x1f6   : > { %v7144_v49 = vpop.f32.mrf.mxu1 }
 0x1f7   : > { %v8211_v50 = vadd.f32 %v7143_v47, %v8162_v23  ;;  %1377 = vrot.lane.b32.xlu1 %v8208_v48, %s7785_s27  ;;  %7403 = vlog2.f32 %v8208_v48 }
 0x1f8   : > { %v7145_v51 = vpop.f32.mrf.mxu1 }
 0x1f9   : > { %v7146_v52 = vadd.f32 %v7145_v51, %v7144_v49  ;;  %v8216_v53 = vmax.f32 %v8211_v50, 0.0 }
 0x1fa   : > { %v7147_v54 = vpop.f32.mrf.mxu1 }
 0x1fb   : > { %v8219_v55 = vadd.f32 %v7146_v52, %v8162_v23  ;;  %1379 = vrot.lane.b32.xlu0 %v8216_v53, %s7785_s27  ;;  %7405 = vlog2.f32 %v8216_v53 }
 0x1fc   : > { %v7148_v56 = vpop.f32.mrf.mxu1 }
 0x1fd   : > { %v7149_v57 = vadd.f32 %v7148_v56, %v7147_v54  ;;  %v8224_v58 = vmax.f32 %v8219_v55, 0.0 }
 0x1fe   : > { %v7150_v59 = vpop.f32.mrf.mxu1 }
 0x1ff   : > { %v8227_v60 = vadd.f32 %v7149_v57, %v8162_v23  ;;  %1381 = vrot.lane.b32.xlu1 %v8224_v58, %s7785_s27  ;;  %7407 = vlog2.f32 %v8224_v58 }
 0x200   : > { %v7151_v61 = vpop.f32.mrf.mxu1 }
 0x201   : > { %v7152_v62 = vadd.f32 %v7151_v61, %v7150_v59  ;;  %v8232_v63 = vmax.f32 %v8227_v60, 0.0 }
 0x202   : > { %v7153_v0 = vpop.f32.mrf.mxu1 }
 0x203   : > { %v8235_v1 = vadd.f32 %v7152_v62, %v8162_v23  ;;  %1383 = vrot.lane.b32.xlu0 %v8232_v63, %s7785_s27  ;;  %7409 = vlog2.f32 %v8232_v63 }
 0x204   : > { %v7154_v2 = vpop.f32.mrf.mxu1 }
 0x205   : > { %v7155_v3 = vadd.f32 %v7154_v2, %v7153_v0  ;;  %v8240_v4 = vmax.f32 %v8235_v1, 0.0 }
 0x206   : > { %v7156_v5 = vpop.f32.mrf.mxu1 }
 0x207   : > { %v8243_v6 = vadd.f32 %v7155_v3, %v8162_v23  ;;  %1385 = vrot.lane.b32.xlu1 %v8240_v4, %s7785_s27  ;;  %7411 = vlog2.f32 %v8240_v4 }
 0x208   : > { %v7157_v7 = vpop.f32.mrf.mxu1 }
 0x209   : > { %v7158_v8 = vadd.f32 %v7157_v7, %v7156_v5  ;;  %v8248_v9 = vmax.f32 %v8243_v6, 0.0 }
 0x20a   : > { %v7159_v10 = vpop.f32.mrf.mxu1 }
 0x20b   : > { %v8251_v11 = vadd.f32 %v7158_v8, %v8162_v23  ;;  %1387 = vrot.lane.b32.xlu0 %v8248_v9, %s7785_s27  ;;  %7413 = vlog2.f32 %v8248_v9 }
 0x20c   : > { %v7160_v22 = vpop.f32.mrf.mxu1 }
 0x20d   : > { %v7161_v12 = vadd.f32 %v7160_v22, %v7159_v10  ;;  %v8256_v13 = vmax.f32 %v8251_v11, 0.0 }
 0x20e   : > { %v7162_v15 = vpop.f32.mrf.mxu1 }
 0x20f   : > { %v8259_v20 = vadd.f32 %v7161_v12, %v8162_v23  ;;  %1389 = vrot.lane.b32.xlu1 %v8256_v13, %s7785_s27  ;;  %7415 = vlog2.f32 %v8256_v13 }
 0x210   : > { %v7163_v24 = vpop.f32.mrf.mxu1 }
 0x211   : > { %v7164_v26 = vadd.f32 %v7163_v24, %v7162_v15  ;;  %v8264_v27 = vmax.f32 %v8259_v20, 0.0 }
 0x212   : > { %v7165_v29 = vpop.f32.mrf.mxu1 }
 0x213   : > { %v8267_v31 = vadd.f32 %v7164_v26, %v8162_v23  ;;  %1391 = vrot.lane.b32.xlu0 %v8264_v27, %s7785_s27  ;;  %7417 = vlog2.f32 %v8264_v27 }
 0x214   : > { %v7166_v32 = vpop.f32.mrf.mxu1 }
 0x215   : > { %v7167_v34 = vadd.f32 %v7166_v32, %v7165_v29  ;;  %v8272_v36 = vmax.f32 %v8267_v31, 0.0 }
 0x216   : > { %v7168_v37 = vpop.f32.mrf.mxu1 }
 0x217   : > { %v8275_v39 = vadd.f32 %v7167_v34, %v8162_v23  ;;  %1393 = vrot.lane.b32.xlu1 %v8272_v36, %s7785_s27  ;;  %7419 = vlog2.f32 %v8272_v36 }
 0x218   : > { %v7169_v41 = vpop.f32.mrf.mxu1 }
 0x219   : > { %v7170_v42 = vadd.f32 %v7169_v41, %v7168_v37  ;;  %v8280_v44 = vmax.f32 %v8275_v39, 0.0 }
 0x21a   : > { %v7171_v46 = vpop.f32.mrf.mxu1 }
 0x21b   : > { %v8283_v47 = vadd.f32 %v7170_v42, %v8162_v23  ;;  %1395 = vrot.lane.b32.xlu0 %v8280_v44, %s7785_s27  ;;  %7421 = vlog2.f32 %v8280_v44 }
 0x21c   : > { %v7172_v49 = vpop.f32.mrf.mxu1 }
 0x21d   : > { %v7173_v51 = vadd.f32 %v7172_v49, %v7171_v46  ;;  %v8288_v52 = vmax.f32 %v8283_v47, 0.0 }
 0x21e   : > { %v7174_v54 = vpop.f32.mrf.mxu1 }
 0x21f   : > { %v8291_v56 = vadd.f32 %v7173_v51, %v8162_v23  ;;  %1397 = vrot.lane.b32.xlu1 %v8288_v52, %s7785_s27  ;;  %7423 = vlog2.f32 %v8288_v52 }
 0x220   : > { %v7175_v57 = vpop.f32.mrf.mxu1 }
 0x221   : > { %v7176_v59 = vadd.f32 %v7175_v57, %v7174_v54  ;;  %v8296_v61 = vmax.f32 %v8291_v56, 0.0 }
 0x222   : > { %v7177_v62 = vpop.f32.mrf.mxu1 }
 0x223   : > { %v8299_v0 = vadd.f32 %v7176_v59, %v8162_v23  ;;  %1399 = vrot.lane.b32.xlu0 %v8296_v61, %s7785_s27 }
 0x224   : > { %v7178_v2 = vpop.f32.mrf.mxu1 }
 0x225   : > { %v7179_v3 = vadd.f32 %v7178_v2, %v7177_v62  ;;  %v8304_v5 = vmax.f32 %v8299_v0, 0.0 }
 0x226   : > { %v7180_v7 = vpop.f32.mrf.mxu1 }
 0x227   : > { %11763 = vst [vmem:[#allocation5_spill] sm:$0xff] %v8304_v5  ;;  %v8307_v8 = vadd.f32 %v7179_v3, %v8162_v23  ;;  %1401 = vrot.lane.b32.xlu1 %v8304_v5, %s7785_s27 }
 0x228   : > { %v7181_v10 = vpop.f32.mrf.mxu1 }
 0x229   : > { %v7182_v22 = vadd.f32 %v7181_v10, %v7180_v7  ;;  %v8312_v12 = vmax.f32 %v8307_v8, 0.0 }
 0x22a   : > { %v7183_v15 = vpop.f32.mrf.mxu1 }
 0x22b   : > { %11764 = vst [vmem:[#allocation6_spill] sm:$0xff] %v8312_v12  ;;  %v8315_v24 = vadd.f32 %v7182_v22, %v8162_v23  ;;  %1403 = vrot.lane.b32.xlu0 %v8312_v12, %s7785_s27  ;;  %v7372_v12 = vld [vmem:[%s11721_s8 + $0x60] ss:$8 sps:$4 sm:$0xff]  }
 0x22c   : > { %v7184_v26 = vpop.f32.mrf.mxu1 }
 0x22d   : > { %v7185_v29 = vadd.f32 %v7184_v26, %v7183_v15  ;;  %v8320_v32 = vmax.f32 %v8315_v24, 0.0 }
 0x22e   : > { %v7186_v34 = vpop.f32.mrf.mxu1 }
 0x22f   : > { %11765 = vst [vmem:[#allocation7_spill] sm:$0xff] %v8320_v32  ;;  %v8323_v37 = vadd.f32 %v7185_v29, %v8162_v23  ;;  %1405 = vrot.lane.b32.xlu1 %v8320_v32, %s7785_s27 }
 0x230   : > { %v7187_v41 = vpop.f32.mrf.mxu1 }
 0x231   : > { %v7188_v42 = vadd.f32 %v7187_v41, %v7186_v34  ;;  %v8328_v46 = vmax.f32 %v8323_v37, 0.0 }
 0x232   : > { %v7189_v49 = vpop.f32.mrf.mxu1 }
 0x233   : > { %11766 = vst [vmem:[#allocation8_spill] sm:$0xff] %v8328_v46  ;;  %v8331_v51 = vadd.f32 %v7188_v42, %v8162_v23  ;;  %1407 = vrot.lane.b32.xlu0 %v8328_v46, %s7785_s27 }
 0x234   : > { %v7190_v54 = vpop.f32.mrf.mxu1 }
 0x235   : > { %v7191_v57 = vadd.f32 %v7190_v54, %v7189_v49  ;;  %v8336_v59 = vmax.f32 %v8331_v51, 0.0 }
 0x236   : > { %v7192_v62 = vpop.f32.mrf.mxu1 }
 0x237   : > { %11767 = vst [vmem:[#allocation9_spill] sm:$0xff] %v8336_v59  ;;  %v8339_v2 = vadd.f32 %v7191_v57, %v8162_v23  ;;  %1409 = vrot.lane.b32.xlu1 %v8336_v59, %s7785_s27 }
 0x238   : > { %v7193_v3 = vpop.f32.mrf.mxu1 }
 0x239   : > { %v7194_v7 = vadd.f32 %v7193_v3, %v7192_v62  ;;  %v8344_v10 = vmax.f32 %v8339_v2, 0.0 }
 0x23a   : > { %v7195_v22 = vpop.f32.mrf.mxu1 }
 0x23b   : > { %11768 = vst [vmem:[#allocation10_spill] sm:$0xff] %v8344_v10  ;;  %v8347_v15 = vadd.f32 %v7194_v7, %v8162_v23  ;;  %1411 = vrot.lane.b32.xlu0 %v8344_v10, %s7785_s27 }
 0x23c   : > { %v7196_v26 = vpop.f32.mrf.mxu1 }
 0x23d   : > { %v7197_v29 = vadd.f32 %v7196_v26, %v7195_v22  ;;  %v8352_v34 = vmax.f32 %v8347_v15, 0.0 }
 0x23e   : > { %v7198_v41 = vpop.f32.mrf.mxu1 }
 0x23f   : > { %11769 = vst [vmem:[#allocation11_spill] sm:$0xff] %v8352_v34  ;;  %v8355_v42 = vadd.f32 %v7197_v29, %v8162_v23  ;;  %1413 = vrot.lane.b32.xlu1 %v8352_v34, %s7785_s27 }
 0x240   : > { %v7199_v49 = vpop.f32.mrf.mxu1 }
 0x241   : > { %v7200_v54 = vadd.f32 %v7199_v49, %v7198_v41  ;;  %v8360_v57 = vmax.f32 %v8355_v42, 0.0 }
 0x242   : > { %v7201_v62 = vpop.f32.mrf.mxu1 }
 0x243   : > { %11770 = vst [vmem:[#allocation12_spill] sm:$0xff] %v8360_v57  ;;  %v8363_v3 = vadd.f32 %v7200_v54, %v8162_v23  ;;  %1415 = vrot.lane.b32.xlu0 %v8360_v57, %s7785_s27 }
 0x244   : > { %v7202_v7 = vpop.f32.mrf.mxu1 }
 0x245   : > { %v7203_v22 = vadd.f32 %v7202_v7, %v7201_v62  ;;  %v8368_v26 = vmax.f32 %v8363_v3, 0.0 }
 0x246   : > { %v7204_v29 = vpop.f32.mrf.mxu1 }
 0x247   : > { %11771 = vst [vmem:[#allocation13_spill] sm:$0xff] %v8368_v26  ;;  %v8371_v16 = vadd.f32 %v7203_v22, %v8162_v23  ;;  %1417 = vrot.lane.b32.xlu1 %v8368_v26, %s7785_s27 }
 0x248   : > { %v7205_v41 = vpop.f32.mrf.mxu1 }
 0x249   : > { %v7206_v49 = vadd.f32 %v7205_v41, %v7204_v29  ;;  %v8376_v54 = vmax.f32 %v8371_v16, 0.0  ;;  %v8389_v29 = vld [vmem:[%s11721_s8 + $0x70] ss:$8 sps:$4 sm:$0xff]   ;;  %v7371_v41 = vld [vmem:[%s11721_s8 + $0x74] ss:$8 sps:$4 sm:$0xff]  }
 0x24a   : > { %v7207_v17 = vpop.f32.mrf.mxu1  ;;  %1932 = vmatprep.subr.bf16.mxu0 %v7371_v41  ;;  %7273 = vmatprep.subr.bf16.mxu1 %v7371_v41 }
 0x24b   : > { %11772 = vst [vmem:[#allocation14_spill] sm:$0xff] %v8376_v54  ;;  %v8379_v18 = vadd.f32 %v7206_v49, %v8162_v23  ;;  %1419 = vrot.lane.b32.xlu0 %v8376_v54, %s7785_s27  ;;  %1933 = vmatpush1.bf16.msra.mxu0 %v8389_v29 }
 0x24c   : > { %v7208_v62 = vpop.f32.mrf.mxu1 }
 0x24d   : > { %v7209_v7 = vadd.f32 %v7208_v62, %v7207_v17  ;;  %v8384_v22 = vmax.f32 %v8379_v18, 0.0 }
 0x24e   : > { %v7210_v19 = vpop.f32.mrf.mxu1 }
 0x24f   : > { %11773 = vst [vmem:[#allocation15_spill] sm:$0xff] %v8384_v22  ;;  %v8395_v49 = vadd.f32 %v7209_v7, %v8162_v23  ;;  %1421 = vrot.lane.b32.xlu1 %v8384_v22, %s7785_s27 }
 0x250   : > { %v7211_v17 = vpop.f32.mrf.mxu1 }
 0x251   : > { %v7212_v62 = vadd.f32 %v7211_v17, %v7210_v19  ;;  %v8401_v54 = vmax.f32 %v8395_v49, 0.0  ;;  %v450_v17 = vld [vmem:[%s8407_s17] sm:$0xff] }
 0x252   : > { %v7213_v26 = vpop.f32.mrf.mxu1 }
 0x253   : > { %11774 = vst [vmem:[#allocation16_spill] sm:$0xff] %v8401_v54  ;;  %v8410_v7 = vadd.f32 %v7212_v62, %v8162_v23  ;;  %1423 = vrot.lane.b32.xlu0 %v8401_v54, %s7785_s27  ;;  %v451_v62 = vld [vmem:[%s8407_s17 + $0x8] sm:$0xff] }
 0x254   : > { %v7214_v19 = vpop.f32.mrf.mxu1 }
 0x255   : > { %v7215_v41 = vadd.f32 %v7214_v19, %v7213_v26  ;;  %v1368_v22 = vpop.permute.xlu0 %1367  ;;  %v8416_v57 = vmax.f32 %v8410_v7, 0.0 }
 0x256   : > { %v7216_v34 = vpop.f32.mrf.mxu1  ;;  %v1463_v59 = vmul.f32 %v1368_v22, %v450_v17 }
 0x257   : > { %11775 = vst [vmem:[#allocation17_spill] sm:$0xff] %v8416_v57  ;;  %v8419_v10 = vadd.f32 %v7215_v41, %v8162_v23  ;;  %1425 = vrot.lane.b32.xlu1 %v8416_v57, %s7785_s27  ;;  %v7374_v41 = vld [vmem:[%s11721_s8 + $0x64] ss:$8 sps:$4 sm:$0xff]  }
 0x258   : > { %v7217_v46 = vpop.f32.mrf.mxu1  ;;  %1934 = vmatprep.subr.bf16.mxu0 %v7374_v41 }
 0x259   : > { %v7218_v32 = vadd.f32 %v7217_v46, %v7216_v34  ;;  %v1370_v54 = vpop.permute.xlu0 %1369  ;;  %v8425_v26 = vmax.f32 %v8419_v10, 0.0  ;;  %v1495_v46 = vadd.f32 %v1463_v59, %v8165_v14  ;;  %1935 = vmatpush1.bf16.msra.mxu0 %v7372_v12 }
 0x25a   : > { %v1464_v19 = vmul.f32 %v1370_v54, %v451_v62  ;;  %v452_v54 = vld [vmem:[%s8407_s17 + $0x10] sm:$0xff]  ;;  %v3470_v62 = vmul.f32 %v8171_v25, %v8171_v25 }
 0x25b   : > { %11776 = vst [vmem:[#allocation18_spill] sm:$0xff] %v8425_v26  ;;  %v8434_v57 = vadd.f32 %v7218_v32, %v8162_v23  ;;  %1427 = vrot.lane.b32.xlu0 %v8425_v26, %s7785_s27  ;;  %v453_v32 = vld [vmem:[%s8407_s17 + $0x18] sm:$0xff]  ;;  %v3469_v26 = vmul.f32 %v8165_v14, %v8165_v14  ;;  %v3475_v14 = vmul.f32 %v8211_v50, %v8211_v50 }
 0x25c   : > { %v1496_v34 = vadd.f32 %v1464_v19, %v8171_v25  ;;  %v3473_v25 = vmul.f32 %v8195_v40, %v8195_v40 }
 0x25d   : > { %v1372_v22 = vpop.permute.xlu1 %1371  ;;  %v8442_v17 = vmax.f32 %v8434_v57, 0.0 }
 0x25e   : > { %v1527_v23 = vpack.c.bf16 %v1496_v34, %v1495_v46  ;;  %v1465_v59 = vmul.f32 %v1372_v22, %v452_v54  ;;  %v454_v54 = vld [vmem:[%s8407_s17 + $0x20] sm:$0xff] }
 0x25f   : > { %1429 = vrot.lane.b32.xlu1 %v8442_v17, %s7785_s27  ;;  %3535 = vrot.lane.b32.xlu0 %v3470_v62, %s7786_s21  ;;  %v3471_v62 = vmul.f32 %v8179_v30, %v8179_v30 }
 0x260   : > { %7241 = vmatprep.mubr.msk.bf16.mxu1 %vm1566_vm0, %v1527_v23  ;;  %v1497_v46 = vadd.f32 %v1465_v59, %v8179_v30  ;;  %v3477_v30 = vmul.f32 %v8227_v60, %v8227_v60 }
 0x261   : > { %v1374_v19 = vpop.permute.xlu1 %1373 }
 0x262   : > { %v1466_v5 = vmul.f32 %v1374_v19, %v453_v32 }
 0x263   : > { %3533 = vrot.lane.b32.xlu1 %v3469_v26, %s7786_s21  ;;  %3541 = vrot.lane.b32.xlu0 %v3473_v25, %s7786_s21  ;;  %v455_v26 = vld [vmem:[%s8407_s17 + $0x28] sm:$0xff]  ;;  %v7375_v25 = vld [vmem:[%s11721_s8 + $0x50] ss:$8 sps:$4 sm:$0xff]  }
 0x264   : > { %v1498_v34 = vadd.f32 %v1466_v5, %v8187_v35  ;;  %v3472_v5 = vmul.f32 %v8187_v35, %v8187_v35 }
 0x265   : > { %v1376_v22 = vpop.permute.xlu0 %1375 }
 0x266   : > { %v1528_v23 = vpack.c.bf16 %v1498_v34, %v1497_v46  ;;  %v1467_v32 = vmul.f32 %v1376_v22, %v454_v54  ;;  %v7377_v46 = vld [vmem:[%s11721_s8 + $0x54] ss:$8 sps:$4 sm:$0xff]   ;;  %v3474_v22 = vmul.f32 %v8203_v45, %v8203_v45 }
 0x267   : > { %3537 = vrot.lane.b32.xlu1 %v3471_v62, %s7786_s21  ;;  %3545 = vrot.lane.b32.xlu0 %v3475_v14, %s7786_s21  ;;  %v3479_v62 = vmul.f32 %v8243_v6, %v8243_v6 }
 0x268   : > { %7242 = vmatmul.mubr.msk.bf16.vlgmr.msra.gmra.mxu1 %vm1566_vm0, %v1528_v23  ;;  %v1499_v35 = vadd.f32 %v1467_v32, %v8195_v40  ;;  %1936 = vmatprep.subr.bf16.mxu0 %v7377_v46  ;;  %v457_v40 = vld [vmem:[%s8407_s17 + $0x38] sm:$0xff] }
 0x269   : > { %v1378_v59 = vpop.permute.xlu1 %1377  ;;  %7281 = vmatpush1.bf16.msra.mxu1 %v8389_v29  ;;  %v456_v29 = vld [vmem:[%s8407_s17 + $0x30] sm:$0xff]  ;;  %1937 = vmatpush1.bf16.msra.mxu0 %v7375_v25 }
 0x26a   : > { %v1468_v19 = vmul.f32 %v1378_v59, %v455_v26  ;;  %7274 = vmatprep.subr.bf16.mxu1 %v7374_v41  ;;  %v3481_v26 = vmul.f32 %v8259_v20, %v8259_v20 }
 0x26b   : > { %3539 = vrot.lane.b32.xlu1 %v3472_v5, %s7786_s21  ;;  %3549 = vrot.lane.b32.xlu0 %v3477_v30, %s7786_s21  ;;  %v458_v5 = vld [vmem:[%s8407_s17 + $0x40] sm:$0xff] }
 0x26c   : > { %v1500_v34 = vadd.f32 %v1468_v19, %v8203_v45  ;;  %v3476_v45 = vmul.f32 %v8219_v55, %v8219_v55  ;;  %v3478_v19 = vmul.f32 %v8235_v1, %v8235_v1 }
 0x26d   : > { %v1380_v54 = vpop.permute.xlu0 %1379  ;;  %7282 = vmatpush1.bf16.msra.mxu1 %v7372_v12 }
 0x26e   : > { %v1529_v41 = vpack.c.bf16 %v1500_v34, %v1499_v35  ;;  %7275 = vmatprep.subr.bf16.mxu1 %v7377_v46  ;;  %v1469_v14 = vmul.f32 %v1380_v54, %v456_v29  ;;  %v3483_v46 = vmul.f32 %v8275_v39, %v8275_v39  ;;  %v3485_v29 = vmul.f32 %v8291_v56, %v8291_v56 }
 0x26f   : > { %3543 = vrot.lane.b32.xlu1 %v3474_v22, %s7786_s21  ;;  %3553 = vrot.lane.b32.xlu0 %v3479_v62, %s7786_s21  ;;  %v7378_v22 = vld [vmem:[%s11721_s8 + $0x40] ss:$8 sps:$4 sm:$0xff]   ;;  %v7380_v62 = vld [vmem:[%s11721_s8 + $0x44] ss:$8 sps:$4 sm:$0xff]  }
 0x270   : > { %7245 = vmatprep.mubr.msk.bf16.mxu1 %vm1566_vm0, %v1529_v41  ;;  %v1501_v32 = vadd.f32 %v1469_v14, %v8211_v50  ;;  %1938 = vmatprep.subr.bf16.mxu0 %v7380_v62  ;;  %v460_v14 = vld [vmem:[%s8407_s17 + $0x50] sm:$0xff] }
 0x271   : > { %v1382_v23 = vpop.permute.xlu1 %1381  ;;  %7283 = vmatpush1.bf16.msra.mxu1 %v7375_v25  ;;  %v459_v25 = vld [vmem:[%s8407_s17 + $0x48] sm:$0xff]  ;;  %1939 = vmatpush1.bf16.msra.mxu0 %v7378_v22 }
 0x272   : > { %v1470_v12 = vmul.f32 %v1382_v23, %v457_v40  ;;  %7276 = vmatprep.subr.bf16.mxu1 %v7380_v62 }
 0x273   : > { %3547 = vrot.lane.b32.xlu1 %v3476_v45, %s7786_s21  ;;  %3557 = vrot.lane.b32.xlu0 %v3481_v26, %s7786_s21  ;;  %v3482_v45 = vmul.f32 %v8267_v31, %v8267_v31  ;;  %v3487_v26 = vmul.f32 %v8307_v8, %v8307_v8 }
 0x274   : > { %v1502_v59 = vadd.f32 %v1470_v12, %v8219_v55  ;;  %v3480_v55 = vmul.f32 %v8251_v11, %v8251_v11 }
 0x275   : > { %v1384_v30 = vpop.permute.xlu0 %1383  ;;  %7284 = vmatpush1.bf16.msra.mxu1 %v7378_v22  ;;  %v3493_v22 = vmul.f32 %v8355_v42, %v8355_v42 }
 0x276   : > { %v1530_v35 = vpack.c.bf16 %v1502_v59, %v1501_v32  ;;  %v1471_v34 = vmul.f32 %v1384_v30, %v458_v5  ;;  %v3484_v59 = vmul.f32 %v8283_v47, %v8283_v47  ;;  %v3489_v5 = vmul.f32 %v8323_v37, %v8323_v37 }
 0x277   : > { %3551 = vrot.lane.b32.xlu1 %v3478_v19, %s7786_s21  ;;  %3561 = vrot.lane.b32.xlu0 %v3483_v46, %s7786_s21 }
 0x278   : > { %7246 = vmatmul.mubr.msk.bf16.gmra.mxu1 %vm1566_vm0, %v1530_v35  ;;  %v1503_v41 = vadd.f32 %v1471_v34, %v8227_v60  ;;  %v461_v60 = vld [vmem:[%s8407_s17 + $0x58] sm:$0xff]  ;;  %v462_v35 = vld [vmem:[%s8407_s17 + $0x60] sm:$0xff]  ;;  %v3486_v34 = vmul.f32 %v8299_v0, %v8299_v0 }
 0x279   : > { %v1386_v50 = vpop.permute.xlu1 %1385 }
 0x27a   : > { %v1472_v54 = vmul.f32 %v1386_v50, %v459_v25  ;;  %v3491_v50 = vmul.f32 %v8339_v2, %v8339_v2 }
 0x27b   : > { %3555 = vrot.lane.b32.xlu1 %v3480_v55, %s7786_s21  ;;  %3565 = vrot.lane.b32.xlu0 %v3485_v29, %s7786_s21  ;;  %v463_v29 = vld [vmem:[%s8407_s17 + $0x68] sm:$0xff] }
 0x27c   : > { %v1504_v40 = vadd.f32 %v1472_v54, %v8235_v1 }
 0x27d   : > { %v1388_v23 = vpop.permute.xlu0 %1387 }
 0x27e   : > { %v1531_v12 = vpack.c.bf16 %v1504_v40, %v1503_v41  ;;  %v1473_v1 = vmul.f32 %v1388_v23, %v460_v14  ;;  %v7381_v41 = vld [vmem:[%s11721_s8 + $0x30] ss:$8 sps:$4 sm:$0xff]   ;;  %v7383_v40 = vld [vmem:[%s11721_s8 + $0x34] ss:$8 sps:$4 sm:$0xff]  }
 0x27f   : > { %3559 = vrot.lane.b32.xlu1 %v3482_v45, %s7786_s21  ;;  %3569 = vrot.lane.b32.xlu0 %v3487_v26, %s7786_s21  ;;  %v464_v45 = vld [vmem:[%s8407_s17 + $0x70] sm:$0xff] }
 0x280   : > { %7249 = vmatprep.mubr.msk.bf16.mxu1 %vm1566_vm0, %v1531_v12  ;;  %v1505_v19 = vadd.f32 %v1473_v1, %v8243_v6  ;;  %1940 = vmatprep.subr.bf16.mxu0 %v7383_v40  ;;  %v3490_v12 = vmul.f32 %v8331_v51, %v8331_v51 }
 0x281   : > { %v1390_v32 = vpop.permute.xlu1 %1389  ;;  %7277 = vmatprep.subr.bf16.mxu1 %v7383_v40  ;;  %1941 = vmatpush1.bf16.msra.mxu0 %v7381_v41  ;;  %v468_v40 = vld [vmem:[%s8407_s17 + $0x90] sm:$0xff] }
 0x282   : > { %v1474_v30 = vmul.f32 %v1390_v32, %v461_v60  ;;  %v3495_v60 = vmul.f32 %v8371_v16, %v8371_v16  ;;  %7285 = vmatpush1.bf16.msra.mxu1 %v7381_v41 }
 0x283   : > { %3563 = vrot.lane.b32.xlu1 %v3484_v59, %s7786_s21  ;;  %3573 = vrot.lane.b32.xlu0 %v3489_v5, %s7786_s21  ;;  %v3492_v59 = vmul.f32 %v8347_v15, %v8347_v15  ;;  %v3497_v5 = vmul.f32 %v8395_v49, %v8395_v49 }
 0x284   : > { %v1506_v46 = vadd.f32 %v1474_v30, %v8251_v11  ;;  %v3488_v11 = vmul.f32 %v8315_v24, %v8315_v24 }
 0x285   : > { %v1392_v25 = vpop.permute.xlu0 %1391 }
 0x286   : > { %v1532_v55 = vpack.c.bf16 %v1506_v46, %v1505_v19  ;;  %v1475_v54 = vmul.f32 %v1392_v25, %v462_v35  ;;  %v7384_v35 = vld [vmem:[%s11721_s8 + $0x20] ss:$8 sps:$4 sm:$0xff]   ;;  %v7386_v25 = vld [vmem:[%s11721_s8 + $0x24] ss:$8 sps:$4 sm:$0xff]  }
 0x287   : > { %3567 = vrot.lane.b32.xlu1 %v3486_v34, %s7786_s21  ;;  %3577 = vrot.lane.b32.xlu0 %v3491_v50, %s7786_s21  ;;  %v466_v34 = vld [vmem:[%s8407_s17 + $0x80] sm:$0xff] }
 0x288   : > { %7250 = vmatmul.mubr.msk.bf16.gmra.mxu1 %vm1566_vm0, %v1532_v55  ;;  %v1507_v14 = vadd.f32 %v1475_v54, %v8259_v20  ;;  %v465_v20 = vld [vmem:[%s8407_s17 + $0x78] sm:$0xff]  ;;  %v3494_v55 = vmul.f32 %v8363_v3, %v8363_v3  ;;  %1942 = vmatprep.subr.bf16.mxu0 %v7386_v25 }
 0x289   : > { %v1394_v6 = vpop.permute.xlu1 %1393  ;;  %7278 = vmatprep.subr.bf16.mxu1 %v7386_v25  ;;  %1943 = vmatpush1.bf16.msra.mxu0 %v7384_v35  ;;  %v472_v25 = vld [vmem:[%s8407_s17 + $0xb0] sm:$0xff] }
 0x28a   : > { %v1476_v62 = vmul.f32 %v1394_v6, %v463_v29  ;;  %v3499_v29 = vmul.f32 %v8419_v10, %v8419_v10  ;;  %7286 = vmatpush1.bf16.msra.mxu1 %v7384_v35 }
 0x28b   : > { %3571 = vrot.lane.b32.xlu1 %v3488_v11, %s7786_s21  ;;  %3581 = vrot.lane.b32.xlu0 %v3493_v22, %s7786_s21  ;;  %v3496_v11 = vmul.f32 %v8379_v18, %v8379_v18 }
 0x28c   : > { %v1508_v23 = vadd.f32 %v1476_v62, %v8267_v31 }
 0x28d   : > { %v1396_v26 = vpop.permute.xlu0 %1395 }
 0x28e   : > { %v1533_v1 = vpack.c.bf16 %v1508_v23, %v1507_v14  ;;  %v1477_v31 = vmul.f32 %v1396_v26, %v464_v45  ;;  %v3498_v23 = vmul.f32 %v8410_v7, %v8410_v7  ;;  %v469_v26 = vld [vmem:[%s8407_s17 + $0x98] sm:$0xff] }
 0x28f   : > { %3575 = vrot.lane.b32.xlu1 %v3490_v12, %s7786_s21  ;;  %3585 = vrot.lane.b32.xlu0 %v3495_v60, %s7786_s21 }
 0x290   : > { %7253 = vmatprep.mubr.msk.bf16.mxu1 %vm1566_vm0, %v1533_v1  ;;  %v1509_v19 = vadd.f32 %v1477_v31, %v8275_v39  ;;  %v467_v39 = vld [vmem:[%s8407_s17 + $0x88] sm:$0xff] }
 0x291   : > { %v1398_v32 = vpop.permute.xlu1 %1397 }
 0x292   : > { %v1478_v30 = vmul.f32 %v1398_v32, %v465_v20  ;;  %v470_v20 = vld [vmem:[%s8407_s17 + $0xa0] sm:$0xff] }
 0x293   : > { %3579 = vrot.lane.b32.xlu1 %v3492_v59, %s7786_s21  ;;  %3589 = vrot.lane.b32.xlu0 %v3497_v5, %s7786_s21  ;;  %v471_v59 = vld [vmem:[%s8407_s17 + $0xa8] sm:$0xff] }
 0x294   : > { %v1510_v46 = vadd.f32 %v1478_v30, %v8283_v47 }
 0x295   : > { %v1400_v50 = vpop.permute.xlu0 %1399 }
 0x296   : > { %v1534_v54 = vpack.c.bf16 %v1510_v46, %v1509_v19  ;;  %v1479_v47 = vmul.f32 %v1400_v50, %v466_v34  ;;  %v7387_v34 = vld [vmem:[%s11721_s8 + $0x10] ss:$8 sps:$4 sm:$0xff]  }
 0x297   : > { %3583 = vrot.lane.b32.xlu1 %v3494_v55, %s7786_s21  ;;  %3593 = vrot.lane.b32.xlu0 %v3499_v29, %s7786_s21  ;;  %v473_v55 = vld [vmem:[%s8407_s17 + $0xb8] sm:$0xff] }
 0x298   : > { %7254 = vmatmul.mubr.msk.bf16.gmra.mxu1 %vm1566_vm0, %v1534_v54  ;;  %v1511_v62 = vadd.f32 %v1479_v47, %v8291_v56  ;;  %v7390_v54 = vld [vmem:[%s11721_s8] ss:$8 sps:$4 sm:$0xff]  }
 0x299   : > { %v1402_v6 = vpop.permute.xlu1 %1401 }
 0x29a   : > { %v1480_v22 = vmul.f32 %v1402_v6, %v467_v39 }
 0x29b   : > { %3587 = vrot.lane.b32.xlu1 %v3496_v11, %s7786_s21  ;;  %v7787_v11 = vmov 0  }
 0x29c   : > { %v1512_v41 = vadd.f32 %v1480_v22, %v8299_v0  ;;  %1964 = vmatprep.mubr.bf16.mxu0 %v7787_v11  ;;  %7301 = vset.pattern.permute.xlu1 %v7787_v11  ;;  %v474_v22 = vld [vmem:[%s8407_s17 + $0xc0] sm:$0xff] }
 0x29d   : > { %v1404_v14 = vpop.permute.xlu0 %1403  ;;  %7302 = vset.pattern.permute.xlu0 %v7787_v11 }
 0x29e   : > { %v1535_v45 = vpack.c.bf16 %v1512_v41, %v1511_v62  ;;  %v1481_v12 = vmul.f32 %v1404_v14, %v468_v40  ;;  %v475_v40 = vld [vmem:[%s8407_s17 + $0xc8] sm:$0xff] }
 0x29f   : > { %3591 = vrot.lane.b32.xlu1 %v3498_v23, %s7786_s21 }
 0x2a0   : > { %7257 = vmatprep.mubr.msk.bf16.mxu1 %vm1566_vm0, %v1535_v45  ;;  %v1513_v56 = vadd.f32 %v1481_v12, %v8307_v8  ;;  %v7389_v8 = vld [vmem:[%s11721_s8 + $0x14] ss:$8 sps:$4 sm:$0xff]  }
 0x2a1   : > { %v1406_v60 = vpop.permute.xlu1 %1405  ;;  %1944 = vmatprep.subr.bf16.mxu0 %v7389_v8  ;;  %7279 = vmatprep.subr.bf16.mxu1 %v7389_v8 }
 0x2a2   : > { %v1482_v1 = vmul.f32 %v1406_v60, %v469_v26  ;;  %1945 = vmatpush1.bf16.msra.mxu0 %v7387_v34  ;;  %7287 = vmatpush1.bf16.msra.mxu1 %v7387_v34  ;;  %v476_v26 = vld [vmem:[%s8407_s17 + $0xd0] sm:$0xff] }
 0x2a4   : > { %v1514_v0 = vadd.f32 %v1482_v1, %v8315_v24  ;;  %v477_v1 = vld [vmem:[%s8407_s17 + $0xd8] sm:$0xff] }
 0x2a5   : > { %v1408_v31 = vpop.permute.xlu0 %1407 }
 0x2a6   : > { %v1536_v32 = vpack.c.bf16 %v1514_v0, %v1513_v56  ;;  %v1483_v5 = vmul.f32 %v1408_v31, %v470_v20 }
 0x2a8   : > { %7258 = vmatmul.mubr.msk.bf16.gmra.mxu1 %vm1566_vm0, %v1536_v32  ;;  %v1515_v46 = vadd.f32 %v1483_v5, %v8323_v37  ;;  %v7394_v32 = vpop.eup %7393  ;;  %7425 = vlog2.f32 %v8296_v61 }
 0x2a9   : > { %v1410_v30 = vpop.permute.xlu1 %1409 }
 0x2aa   : > { %v1484_v19 = vmul.f32 %v1410_v30, %v471_v59  ;;  %v479_v30 = vld [vmem:[%s8407_s17 + $0xe8] sm:$0xff] }
 0x2ac   : > { %v1516_v35 = vadd.f32 %v1484_v19, %v8331_v51  ;;  %v7392_v51 = vld [vmem:[%s11721_s8 + $0x4] ss:$8 sps:$4 sm:$0xff]   ;;  %v7396_v19 = vpop.eup %7395 }
 0x2ad   : > { %v1412_v24 = vpop.permute.xlu0 %1411  ;;  %1946 = vmatprep.subr.bf16.mxu0 %v7392_v51  ;;  %7280 = vmatprep.subr.bf16.mxu1 %v7392_v51  ;;  %v3310_v8 = vmul.f32 0.6931472, %v7396_v19 }
 0x2ae   : > { %v1537_v50 = vpack.c.bf16 %v1516_v35, %v1515_v46  ;;  %v1485_v37 = vmul.f32 %v1412_v24, %v472_v25  ;;  %1947 = vmatpush1.bf16.msra.mxu0 %v7390_v54  ;;  %7288 = vmatpush1.bf16.msra.mxu1 %v7390_v54  ;;  %v3312_v35 = vmul.f32 0.6931472, %v7394_v32  ;;  %v7398_v25 = vpop.eup %7397  ;;  %v481_v54 = vld [vmem:[%s8407_s17 + $0xf8] sm:$0xff] }
 0x2b0   : > { %7261 = vmatprep.mubr.msk.bf16.mxu1 %vm1566_vm0, %v1537_v50  ;;  %v1517_v47 = vadd.f32 %v1485_v37, %v8339_v2  ;;  %v3374_v50 = vsub.f32 0.0, %v3312_v35  ;;  %v3408_v35 = vmul.f32 %v8192_v38, %v8192_v38 }
 0x2b1   : > { %v1414_v29 = vpop.permute.xlu1 %1413 }
 0x2b2   : > { %v1486_v39 = vmul.f32 %v1414_v29, %v473_v55  ;;  %v480_v55 = vld [vmem:[%s8407_s17 + $0xf0] sm:$0xff]  ;;  %v3406_v29 = vmul.f32 %v8176_v28, %v8176_v28 }
 0x2b4   : > { %v1518_v6 = vadd.f32 %v1486_v39, %v8347_v15  ;;  %v3373_v39 = vsub.f32 0.0, %v3310_v8 }
 0x2b5   : > { %v1416_v62 = vpop.permute.xlu0 %1415 }
 0x2b6   : > { %v1538_v41 = vpack.c.bf16 %v1518_v6, %v1517_v47  ;;  %v1487_v14 = vmul.f32 %v1416_v62, %v474_v22  ;;  %v3314_v47 = vmul.f32 0.6931472, %v7398_v25  ;;  %v7400_v22 = vpop.eup %7399 }
 0x2b8   : > { %7262 = vmatmul.mubr.msk.bf16.gmra.mxu1 %vm1566_vm0, %v1538_v41  ;;  %v1519_v23 = vadd.f32 %v1487_v14, %v8355_v42  ;;  %v3405_v41 = vmul.f32 %v8168_v21, %v8168_v21 }
 0x2b9   : > { %v1418_v2 = vpop.permute.xlu1 %1417 }
 0x2ba   : > { %v1488_v15 = vmul.f32 %v1418_v2, %v475_v40  ;;  %v7402_v40 = vpop.eup %7401  ;;  %v3437_v2 = vadd.f32 %v3405_v41, %v3373_v39  ;;  %v3411_v39 = vmul.f32 %v8216_v53, %v8216_v53  ;;  %v3412_v53 = vmul.f32 %v8224_v58, %v8224_v58 }
 0x2bc   : > { %v1520_v45 = vadd.f32 %v1488_v15, %v8363_v3  ;;  %v478_v3 = vld [vmem:[%s8407_s17 + $0xe0] sm:$0xff]  ;;  %v3375_v15 = vsub.f32 0.0, %v3314_v47  ;;  %v11777_v47 = vld [vmem:[#allocation5_spill] sm:$0xff] }
 0x2bd   : > { %v1420_v12 = vpop.permute.xlu0 %1419  ;;  %7427 = vlog2.f32 %v11777_v47 }
 0x2be   : > { %v1539_v60 = vpack.c.bf16 %v1520_v45, %v1519_v23  ;;  %v1489_v56 = vmul.f32 %v1420_v12, %v476_v26  ;;  %v3316_v26 = vmul.f32 0.6931472, %v7400_v22  ;;  %v7404_v12 = vpop.eup %7403 }
 0x2c0   : > { %7265 = vmatprep.mubr.msk.bf16.mxu1 %vm1566_vm0, %v1539_v60  ;;  %v1521_v31 = vadd.f32 %v1489_v56, %v8371_v16  ;;  %v7406_v56 = vpop.eup %7405  ;;  %v3376_v32 = vsub.f32 0.0, %v3316_v26  ;;  %v11779_v26 = vld [vmem:[#allocation7_spill] sm:$0xff] }
 0x2c1   : > { %v1422_v0 = vpop.permute.xlu1 %1421 }
 0x2c2   : > { %v1490_v20 = vmul.f32 %v1422_v0, %v477_v1  ;;  %v3318_v1 = vmul.f32 0.6931472, %v7402_v40 }
 0x2c4   : > { %v1522_v42 = vadd.f32 %v1490_v20, %v8379_v18 }
 0x2c5   : > { %v1424_v59 = vpop.permute.xlu0 %1423 }
 0x2c6   : > { %v1540_v5 = vpack.c.bf16 %v1522_v42, %v1521_v31  ;;  %v1491_v46 = vmul.f32 %v1424_v59, %v478_v3  ;;  %v3500_v31 = vmul.f32 %v8434_v57, %v8434_v57  ;;  %v3320_v3 = vmul.f32 0.6931472, %v7404_v12  ;;  %v7408_v59 = vpop.eup %7407 }
 0x2c7   : > { %v3324_v25 = vmul.f32 0.6931472, %v7408_v59  ;;  %v3415_v59 = vmul.f32 %v8248_v9, %v8248_v9  ;;  %v3416_v9 = vmul.f32 %v8256_v13, %v8256_v13 }
 0x2c8   : > { %7266 = vmatmul.mubr.msk.bf16.gmra.mxu1 %vm1566_vm0, %v1540_v5  ;;  %v1523_v24 = vadd.f32 %v1491_v46, %v8395_v49  ;;  %v3438_v49 = vadd.f32 %v3406_v29, %v3374_v50  ;;  %v3377_v5 = vsub.f32 0.0, %v3318_v1  ;;  %v3378_v8 = vsub.f32 0.0, %v3320_v3 }
 0x2c9   : > { %v1426_v16 = vpop.permute.xlu1 %1425 }
 0x2ca   : > { %v1492_v18 = vmul.f32 %v1426_v16, %v479_v30  ;;  %v3409_v16 = vmul.f32 %v8200_v43, %v8200_v43  ;;  %v3410_v43 = vmul.f32 %v8208_v48, %v8208_v48 }
 0x2cc   : > { %v1524_v34 = vadd.f32 %v1492_v18, %v8410_v7  ;;  %v3440_v18 = vadd.f32 %v3408_v35, %v3376_v32 }
 0x2cd   : > { %v1428_v37 = vpop.permute.xlu0 %1427 }
 0x2ce   : > { %v1541_v51 = vpack.c.bf16 %v1524_v34, %v1523_v24  ;;  %v1493_v6 = vmul.f32 %v1428_v37, %v480_v55  ;;  %v3441_v34 = vadd.f32 %v3409_v16, %v3377_v5  ;;  %v11781_v5 = vld [vmem:[#allocation9_spill] sm:$0xff] }
 0x2d0   : > { %7269 = vmatprep.mubr.msk.bf16.mxu1 %vm1566_vm0, %v1541_v51  ;;  %v1525_v23 = vadd.f32 %v1493_v6, %v8419_v10  ;;  %v3407_v10 = vmul.f32 %v8184_v33, %v8184_v33  ;;  %v7410_v33 = vpop.eup %7409  ;;  %v3442_v6 = vadd.f32 %v3410_v43, %v3378_v8  ;;  %v11784_v43 = vld [vmem:[#allocation12_spill] sm:$0xff] }
 0x2d1   : > { %v1430_v7 = vpop.permute.xlu1 %1429  ;;  %v3536_v62 = vpop.permute.xlu0 %3535  ;;  %v3326_v37 = vmul.f32 0.6931472, %v7410_v33 }
 0x2d2   : > { %v1494_v14 = vmul.f32 %v1430_v7, %v481_v54  ;;  %v3630_v28 = vadd.f32 %v3536_v62, %v3438_v49  ;;  %v3439_v42 = vadd.f32 %v3407_v10, %v3375_v15  ;;  %v7412_v24 = vpop.eup %7411  ;;  %v3380_v49 = vsub.f32 0.0, %v3324_v25  ;;  %v11778_v62 = vld [vmem:[#allocation6_spill] sm:$0xff] }
 0x2d3   : > { %v7414_v29 = vpop.eup %7413  ;;  %v3328_v22 = vmul.f32 0.6931472, %v7412_v24  ;;  %7429 = vlog2.f32 %v11778_v62  ;;  %v3381_v40 = vsub.f32 0.0, %v3326_v37 }
 0x2d4   : > { %v1526_v45 = vadd.f32 %v1494_v14, %v8434_v57  ;;  %3695 = vrot.lane.b32.xlu1 %v3630_v28, %s7785_s27  ;;  %v3322_v57 = vmul.f32 0.6931472, %v7406_v56  ;;  %v7416_v7 = vpop.eup %7415  ;;  %v3330_v48 = vmul.f32 0.6931472, %v7414_v29  ;;  %7431 = vlog2.f32 %v11779_v26  ;;  %v11780_v56 = vld [vmem:[#allocation8_spill] sm:$0xff] }
 0x2d5   : > { %v3534_v60 = vpop.permute.xlu1 %3533  ;;  %v3542_v21 = vpop.permute.xlu0 %3541  ;;  %v3444_v12 = vadd.f32 %v3412_v53, %v3380_v49  ;;  %v3332_v1 = vmul.f32 0.6931472, %v7416_v7  ;;  %7433 = vlog2.f32 %v11780_v56  ;;  %v11786_v53 = vld [vmem:[#allocation14_spill] sm:$0xff] }
 0x2d6   : > { %v1542_v0 = vpack.c.bf16 %v1526_v45, %v1525_v23  ;;  %v3629_v20 = vadd.f32 %v3534_v60, %v3437_v2  ;;  %v3379_v50 = vsub.f32 0.0, %v3322_v57  ;;  %v3633_v54 = vadd.f32 %v3542_v21, %v3441_v34  ;;  %v7418_v2 = vpop.eup %7417 }
 0x2d7   : > { %v3413_v45 = vmul.f32 %v8232_v63, %v8232_v63  ;;  %v3382_v60 = vsub.f32 0.0, %v3328_v22  ;;  %v7420_v21 = vpop.eup %7419  ;;  %v3334_v58 = vmul.f32 0.6931472, %v7418_v2  ;;  %v3414_v63 = vmul.f32 %v8240_v4, %v8240_v4 }
 0x2d8   : > { %7270 = vmatmul.mubr.msk.bf16.gmra.mxu1 %vm1566_vm0, %v1542_v0  ;;  %3595 = vrot.lane.b32.xlu1 %v3500_v31, %s7786_s21  ;;  %v3443_v41 = vadd.f32 %v3411_v39, %v3379_v50  ;;  %7435 = vlog2.f32 %v11781_v5  ;;  %v3384_v57 = vsub.f32 0.0, %v3332_v1  ;;  %v3417_v50 = vmul.f32 %v8264_v27, %v8264_v27 }
 0x2d9   : > { %3693 = vrot.lane.b32.xlu0 %v3629_v20, %s7785_s27  ;;  %v3538_v30 = vpop.permute.xlu1 %3537  ;;  %v3546_v19 = vpop.permute.xlu0 %3545  ;;  %2064 = vmatprep.mubr.bf16.mxu1 %v7787_v11  ;;  %v3445_v0 = vadd.f32 %v3413_v45, %v3381_v40  ;;  %v3383_v20 = vsub.f32 0.0, %v3330_v48  ;;  %v3385_v16 = vsub.f32 0.0, %v3334_v58  ;;  %v3418_v27 = vmul.f32 %v8272_v36, %v8272_v36 }
 0x2da   : > { %v3631_v46 = vadd.f32 %v3538_v30, %v3439_v42  ;;  %v3635_v23 = vadd.f32 %v3546_v19, %v3443_v41  ;;  %v7422_v42 = vpop.eup %7421  ;;  %v3446_v30 = vadd.f32 %v3414_v63, %v3382_v60  ;;  %v3336_v19 = vmul.f32 0.6931472, %v7420_v21  ;;  %v11788_v63 = vld [vmem:[#allocation16_spill] sm:$0xff] }
 0x2db   : > { %v7424_v33 = vpop.eup %7423  ;;  %v3447_v35 = vadd.f32 %v3415_v59, %v3383_v20  ;;  %v3338_v4 = vmul.f32 0.6931472, %v7422_v42  ;;  %v3448_v37 = vadd.f32 %v3416_v9, %v3384_v57  ;;  %v3419_v40 = vmul.f32 %v8280_v44, %v8280_v44 }
 0x2dc   : > { %v7426_v25 = vpop.eup %7425  ;;  %v3340_v29 = vmul.f32 0.6931472, %v7424_v33  ;;  %v3420_v44 = vmul.f32 %v8288_v52, %v8288_v52  ;;  %v3421_v20 = vmul.f32 %v8296_v61, %v8296_v61  ;;  %v3422_v61 = vmul.f32 %v11777_v47, %v11777_v47 }
 0x2dd   : > { %3697 = vrot.lane.b32.xlu0 %v3631_v46, %s7785_s27  ;;  %v3540_v55 = vpop.permute.xlu1 %3539  ;;  %v3550_v51 = vpop.permute.xlu0 %3549  ;;  %v11782_v46 = vld [vmem:[#allocation10_spill] sm:$0xff]  ;;  %v3387_v39 = vsub.f32 0.0, %v3338_v4  ;;  %v3342_v13 = vmul.f32 0.6931472, %v7426_v25 }
 0x2de   : > { %v3632_v38 = vadd.f32 %v3540_v55, %v3440_v18  ;;  %v3637_v3 = vadd.f32 %v3550_v51, %v3445_v0  ;;  %7437 = vlog2.f32 %v11782_v46  ;;  %v11783_v55 = vld [vmem:[#allocation11_spill] sm:$0xff]  ;;  %v3386_v51 = vsub.f32 0.0, %v3336_v19 }
 0x2df   : > { %7439 = vlog2.f32 %v11783_v55  ;;  %v3389_v45 = vsub.f32 0.0, %v3342_v13 }
 0x2e0   : > { %3699 = vrot.lane.b32.xlu1 %v3632_v38, %s7785_s27  ;;  %v7428_v38 = vpop.eup %7427  ;;  %7441 = vlog2.f32 %v11784_v43  ;;  %v3450_v48 = vadd.f32 %v3418_v27, %v3386_v51 }
 0x2e1   : > { %3701 = vrot.lane.b32.xlu0 %v3633_v54, %s7785_s27  ;;  %v3544_v14 = vpop.permute.xlu1 %3543  ;;  %v3554_v28 = vpop.permute.xlu0 %3553  ;;  %v3449_v54 = vadd.f32 %v3417_v50, %v3385_v16  ;;  %v3344_v2 = vmul.f32 0.6931472, %v7428_v38  ;;  %v3423_v16 = vmul.f32 %v11778_v62, %v11778_v62  ;;  %v3424_v62 = vmul.f32 %v11779_v26, %v11779_v26 }
 0x2e2   : > { %v3634_v15 = vadd.f32 %v3544_v14, %v3442_v6  ;;  %v3639_v34 = vadd.f32 %v3554_v28, %v3447_v35  ;;  %v7430_v22 = vpop.eup %7429  ;;  %v11785_v14 = vld [vmem:[#allocation13_spill] sm:$0xff]  ;;  %v3388_v28 = vsub.f32 0.0, %v3340_v29  ;;  %v3426_v26 = vmul.f32 %v11781_v5, %v11781_v5 }
 0x2e3   : > { %7443 = vlog2.f32 %v11785_v14  ;;  %v3346_v36 = vmul.f32 0.6931472, %v7430_v22  ;;  %v3428_v5 = vmul.f32 %v11783_v55, %v11783_v55  ;;  %v3430_v55 = vmul.f32 %v11785_v14, %v11785_v14 }
 0x2e4   : > { %3703 = vrot.lane.b32.xlu1 %v3634_v15, %s7785_s27  ;;  %v7432_v15 = vpop.eup %7431  ;;  %7445 = vlog2.f32 %v11786_v53  ;;  %v3452_v58 = vadd.f32 %v3420_v44, %v3388_v28  ;;  %v3433_v14 = vmul.f32 %v11788_v63, %v11788_v63 }
 0x2e5   : > { %3705 = vrot.lane.b32.xlu0 %v3635_v23, %s7785_s27  ;;  %v3548_v31 = vpop.permute.xlu1 %3547  ;;  %v3558_v10 = vpop.permute.xlu0 %3557  ;;  %v3451_v23 = vadd.f32 %v3419_v40, %v3387_v39  ;;  %v3348_v42 = vmul.f32 0.6931472, %v7432_v15  ;;  %v3391_v59 = vsub.f32 0.0, %v3346_v36 }
 0x2e6   : > { %v3636_v32 = vadd.f32 %v3548_v31, %v3444_v12  ;;  %v3641_v41 = vadd.f32 %v3558_v10, %v3449_v54  ;;  %v7434_v1 = vpop.eup %7433  ;;  %v11787_v31 = vld [vmem:[#allocation15_spill] sm:$0xff]  ;;  %v3390_v10 = vsub.f32 0.0, %v3344_v2  ;;  %v3425_v54 = vmul.f32 %v11780_v56, %v11780_v56 }
 0x2e7   : > { %7447 = vlog2.f32 %v11787_v31  ;;  %v3350_v52 = vmul.f32 0.6931472, %v7434_v1  ;;  %v3455_v9 = vadd.f32 %v3423_v16, %v3391_v59  ;;  %v3427_v56 = vmul.f32 %v11782_v46, %v11782_v46 }
 0x2e8   : > { %3707 = vrot.lane.b32.xlu1 %v3636_v32, %s7785_s27  ;;  %v7436_v32 = vpop.eup %7435  ;;  %7449 = vlog2.f32 %v11788_v63  ;;  %v3454_v4 = vadd.f32 %v3422_v61, %v3390_v10  ;;  %v3429_v46 = vmul.f32 %v11784_v43, %v11784_v43  ;;  %v3431_v43 = vmul.f32 %v11786_v53, %v11786_v53 }
 0x2e9   : > { %3709 = vrot.lane.b32.xlu0 %v3637_v3, %s7785_s27  ;;  %v3552_v18 = vpop.permute.xlu1 %3551  ;;  %v3562_v8 = vpop.permute.xlu0 %3561  ;;  %v3453_v3 = vadd.f32 %v3421_v20, %v3389_v45  ;;  %v3352_v25 = vmul.f32 0.6931472, %v7436_v32 }
 0x2ea   : > { %v3638_v24 = vadd.f32 %v3552_v18, %v3446_v30  ;;  %v3643_v0 = vadd.f32 %v3562_v8, %v3451_v23  ;;  %v11789_v18 = vld [vmem:[#allocation17_spill] sm:$0xff]  ;;  %v3392_v8 = vsub.f32 0.0, %v3348_v42 }
 0x2eb   : > { %v7438_v19 = vpop.eup %7437  ;;  %7451 = vlog2.f32 %v11789_v18 }
 0x2ec   : > { %3711 = vrot.lane.b32.xlu1 %v3638_v24, %s7785_s27  ;;  %v7440_v24 = vpop.eup %7439  ;;  %v3456_v39 = vadd.f32 %v3424_v62, %v3392_v8  ;;  %v3434_v62 = vmul.f32 %v11789_v18, %v11789_v18  ;;  %7453 = vlog2.f32 %v8442_v17 }
 0x2ed   : > { %3713 = vrot.lane.b32.xlu0 %v3639_v34, %s7785_s27  ;;  %v3556_v6 = vpop.permute.xlu1 %3555  ;;  %v3566_v49 = vpop.permute.xlu0 %3565  ;;  %v3393_v34 = vsub.f32 0.0, %v3350_v52  ;;  %v3356_v13 = vmul.f32 0.6931472, %v7440_v24 }
 0x2ee   : > { %v3640_v7 = vadd.f32 %v3556_v6, %v3448_v37  ;;  %v3645_v35 = vadd.f32 %v3566_v49, %v3453_v3  ;;  %v3354_v37 = vmul.f32 0.6931472, %v7438_v19  ;;  %v7442_v51 = vpop.eup %7441  ;;  %v3394_v6 = vsub.f32 0.0, %v3352_v25 }
 0x2ef   : > { %v3457_v22 = vadd.f32 %v3425_v54, %v3393_v34  ;;  %v3396_v23 = vsub.f32 0.0, %v3356_v13  ;;  %v8781_v13 = vld [vmem:[%s11720_s7] ss:$0 sm:$0xff] }
 0x2f0   : > { %3715 = vrot.lane.b32.xlu1 %v3640_v7, %s7785_s27  ;;  %v7444_v49 = vpop.eup %7443  ;;  %v3395_v7 = vsub.f32 0.0, %v3354_v37  ;;  %v3458_v15 = vadd.f32 %v3426_v26, %v3394_v6 }
 0x2f1   : > { %3717 = vrot.lane.b32.xlu0 %v3641_v41, %s7785_s27  ;;  %v3560_v12 = vpop.permute.xlu1 %3559  ;;  %v3570_v60 = vpop.permute.xlu0 %3569  ;;  %v3358_v41 = vmul.f32 0.6931472, %v7442_v51  ;;  %v3360_v45 = vmul.f32 0.6931472, %v7444_v49 }
 0x2f2   : > { %v3642_v21 = vadd.f32 %v3560_v12, %v3450_v48  ;;  %v3647_v38 = vadd.f32 %v3570_v60, %v3455_v9  ;;  %v7446_v40 = vpop.eup %7445  ;;  %v3459_v36 = vadd.f32 %v3427_v56, %v3395_v7  ;;  %v3432_v9 = vmul.f32 %v11787_v31, %v11787_v31 }
 0x2f3   : > { %v3397_v60 = vsub.f32 0.0, %v3358_v41  ;;  %v3398_v10 = vsub.f32 0.0, %v3360_v45 }
 0x2f4   : > { %3719 = vrot.lane.b32.xlu1 %v3642_v21, %s7785_s27  ;;  %v7448_v12 = vpop.eup %7447  ;;  %v3362_v21 = vmul.f32 0.6931472, %v7446_v40 }
 0x2f5   : > { %3721 = vrot.lane.b32.xlu0 %v3643_v0, %s7785_s27  ;;  %v3564_v30 = vpop.permute.xlu1 %3563  ;;  %v3574_v57 = vpop.permute.xlu0 %3573  ;;  %v3364_v42 = vmul.f32 0.6931472, %v7448_v12  ;;  %v3461_v3 = vadd.f32 %v3429_v46, %v3397_v60  ;;  %v3462_v61 = vadd.f32 %v3430_v55, %v3398_v10  ;;  %v11790_v46 = vld [vmem:[#allocation18_spill] sm:$0xff] }
 0x2f6   : > { %v3644_v33 = vadd.f32 %v3564_v30, %v3452_v58  ;;  %v3649_v28 = vadd.f32 %v3574_v57, %v3457_v22  ;;  %v7450_v44 = vpop.eup %7449  ;;  %v3460_v58 = vadd.f32 %v3428_v5, %v3396_v23  ;;  %v3399_v59 = vsub.f32 0.0, %v3362_v21 }
 0x2f7   : > { %v3366_v52 = vmul.f32 0.6931472, %v7450_v44  ;;  %7455 = vlog2.f32 %v11790_v46 }
 0x2f8   : > { %3723 = vrot.lane.b32.xlu1 %v3644_v33, %s7785_s27  ;;  %v7452_v32 = vpop.eup %7451 }
 0x2f9   : > { %3725 = vrot.lane.b32.xlu0 %v3645_v35, %s7785_s27  ;;  %v3568_v50 = vpop.permute.xlu1 %3567  ;;  %v3578_v29 = vpop.permute.xlu0 %3577  ;;  %v3400_v35 = vsub.f32 0.0, %v3364_v42  ;;  %v3368_v16 = vmul.f32 0.6931472, %v7452_v32  ;;  %v3401_v8 = vsub.f32 0.0, %v3366_v52 }
 0x2fa   : > { %v3646_v47 = vadd.f32 %v3568_v50, %v3454_v4  ;;  %v3651_v20 = vadd.f32 %v3578_v29, %v3459_v36  ;;  %v3463_v4 = vadd.f32 %v3431_v43, %v3399_v59  ;;  %v7454_v59 = vpop.eup %7453 }
 0x2fb   : > { %v3464_v53 = vadd.f32 %v3432_v9, %v3400_v35  ;;  %v3402_v37 = vsub.f32 0.0, %v3368_v16  ;;  %v3465_v51 = vadd.f32 %v3433_v14, %v3401_v8  ;;  %v3372_v43 = vmul.f32 0.6931472, %v7454_v59 }
 0x2fc   : > { %3727 = vrot.lane.b32.xlu1 %v3646_v47, %s7785_s27 }
 0x2fd   : > { %3729 = vrot.lane.b32.xlu0 %v3647_v38, %s7785_s27  ;;  %v3572_v27 = vpop.permute.xlu1 %3571  ;;  %v3582_v2 = vpop.permute.xlu0 %3581  ;;  %v3466_v31 = vadd.f32 %v3434_v62, %v3402_v37 }
 0x2fe   : > { %v3648_v48 = vadd.f32 %v3572_v27, %v3456_v39  ;;  %v3653_v33 = vadd.f32 %v3582_v2, %v3461_v3 }
 0x300   : > { %3731 = vrot.lane.b32.xlu1 %v3648_v48, %s7785_s27 }
 0x301   : > { %3733 = vrot.lane.b32.xlu0 %v3649_v28, %s7785_s27  ;;  %v3576_v1 = vpop.permute.xlu1 %3575  ;;  %v3586_v57 = vpop.permute.xlu0 %3585 }
 0x302   : > { %v3650_v0 = vadd.f32 %v3576_v1, %v3458_v15  ;;  %v3655_v34 = vadd.f32 %v3586_v57, %v3463_v4  ;;  %v3404_v4 = vsub.f32 0.0, %v3372_v43 }
 0x304   : > { %3735 = vrot.lane.b32.xlu1 %v3650_v0, %s7785_s27 }
 0x305   : > { %3737 = vrot.lane.b32.xlu0 %v3651_v20, %s7785_s27  ;;  %v3580_v30 = vpop.permute.xlu1 %3579  ;;  %v3590_v50 = vpop.permute.xlu0 %3589 }
 0x306   : > { %v3652_v19 = vadd.f32 %v3580_v30, %v3460_v58  ;;  %v3657_v38 = vadd.f32 %v3590_v50, %v3465_v51 }
 0x308   : > { %3739 = vrot.lane.b32.xlu1 %v3652_v19, %s7785_s27 }
 0x309   : > { %3741 = vrot.lane.b32.xlu0 %v3653_v33, %s7785_s27  ;;  %v3584_v25 = vpop.permute.xlu1 %3583  ;;  %v3594_v58 = vpop.permute.xlu0 %3593 }
 0x30a   : > { %v3654_v24 = vadd.f32 %v3584_v25, %v3462_v61  ;;  %v3436_v25 = vmul.f32 %v8442_v17, %v8442_v17 }
 0x30c   : > { %3743 = vrot.lane.b32.xlu1 %v3654_v24, %s7785_s27 }
 0x30d   : > { %3745 = vrot.lane.b32.xlu0 %v3655_v34, %s7785_s27  ;;  %v3588_v47 = vpop.permute.xlu1 %3587  ;;  %v7456_v34 = vpop.eup %7455 }
 0x30e   : > { %v3656_v29 = vadd.f32 %v3588_v47, %v3464_v53  ;;  %v3468_v53 = vadd.f32 %v3436_v25, %v3404_v4  ;;  %v3370_v37 = vmul.f32 0.6931472, %v7456_v34 }
 0x310   : > { %3747 = vrot.lane.b32.xlu1 %v3656_v29, %s7785_s27  ;;  %v3403_v17 = vsub.f32 0.0, %v3370_v37 }
 0x311   : > { %3749 = vrot.lane.b32.xlu0 %v3657_v38, %s7785_s27  ;;  %v3592_v63 = vpop.permute.xlu1 %3591 }
 0x312   : > { %v3658_v54 = vadd.f32 %v3592_v63, %v3466_v31 }
 0x314   : > { %3751 = vrot.lane.b32.xlu1 %v3658_v54, %s7785_s27 }
 0x328   : > { %v7243_v39 = vpop.f32.mrf.mxu1 }
 0x329   : > { %v1658_v26 = vadd.f32 %v7243_v39, %v8781_v13  ;;  %v3435_v39 = vmul.f32 %v11790_v46, %v11790_v46 }
 0x32a   : > { %v1649_v6 = vpop.f32.mrf.mxu1 }
 0x32b   : > { %v1650_v18 = vadd.f32 %v8781_v13, %v1649_v6  ;;  %v1778_v2 = vmax.f32 %v1658_v26, 0.0 }
 0x32c   : > { %v7244_v49 = vpop.f32.mrf.mxu1 }
 0x32d   : > { %v1776_v27 = vmax.f32 %v1650_v18, 0.0  ;;  %v1661_v40 = vadd.f32 %v7244_v49, %v8781_v13  ;;  %v3467_v18 = vadd.f32 %v3435_v39, %v3403_v17 }
 0x32e   : > { %v1652_v22 = vpop.f32.mrf.mxu1 }
 0x32f   : > { %v1653_v7 = vadd.f32 %v8781_v13, %v1652_v22  ;;  %v1779_v28 = vmax.f32 %v1661_v40, 0.0 }
 0x331   : > { %v1777_v41 = vmax.f32 %v1653_v7, 0.0  ;;  %v1809_v23 = vpack.c.bf16 %v1779_v28, %v1778_v2  ;;  %v3659_v7 = vadd.f32 %v3594_v58, %v3467_v18 }
 0x333   : > { %v1808_v48 = vpack.c.bf16 %v1777_v41, %v1776_v27 }
 0x335   : > { %1965 = vmatmul.mubr.bf16.vlgmr.msra.gmra.mxu0 %v1808_v48 }
 0x336   : > { %1974 = vmatprep.mubr.bf16.mxu0 %v7787_v11 }
 0x338   : > { %v7247_v56 = vpop.f32.mrf.mxu1 }
 0x339   : > { %v1674_v5 = vadd.f32 %v7247_v56, %v8781_v13 }
 0x33a   : > { %v1665_v15 = vpop.f32.mrf.mxu1 }
 0x33b   : > { %v1666_v12 = vadd.f32 %v8781_v13, %v1665_v15  ;;  %v1782_v3 = vmax.f32 %v1674_v5, 0.0 }
 0x33c   : > { %v7248_v45 = vpop.f32.mrf.mxu1 }
 0x33d   : > { %1975 = vmatmul.mubr.bf16.gmra.mxu0 %v1809_v23  ;;  %v1780_v1 = vmax.f32 %v1666_v12, 0.0  ;;  %v1677_v44 = vadd.f32 %v7248_v45, %v8781_v13 }
 0x33e   : > { %v1668_v36 = vpop.f32.mrf.mxu1  ;;  %1984 = vmatprep.mubr.bf16.mxu0 %v7787_v11 }
 0x33f   : > { %v1669_v60 = vadd.f32 %v8781_v13, %v1668_v36  ;;  %v1783_v10 = vmax.f32 %v1677_v44, 0.0 }
 0x341   : > { %v1781_v21 = vmax.f32 %v1669_v60, 0.0  ;;  %v1811_v52 = vpack.c.bf16 %v1783_v10, %v1782_v3 }
 0x343   : > { %v1810_v0 = vpack.c.bf16 %v1781_v21, %v1780_v1 }
 0x345   : > { %1985 = vmatmul.mubr.bf16.gmra.mxu0 %v1810_v0 }
 0x346   : > { %v3696_v20 = vpop.permute.xlu1 %3695  ;;  %1994 = vmatprep.mubr.bf16.mxu0 %v7787_v11 }
 0x347   : > { %v3792_v42 = vsel %vm1566_vm0, %v3696_v20, 0.0 }
 0x348   : > { %v7251_v32 = vpop.f32.mrf.mxu1  ;;  %3793 = vadd.xlane.f32.xlu1 %v3792_v42 }
 0x349   : > { %v1690_v50 = vadd.f32 %v7251_v32, %v8781_v13 }
 0x34a   : > { %v1681_v30 = vpop.f32.mrf.mxu1  ;;  %v3596_v14 = vpop.permute.xlu1 %3595 }
 0x34b   : > { %v3694_v57 = vpop.permute.xlu0 %3693  ;;  %v1682_v33 = vadd.f32 %v8781_v13, %v1681_v30  ;;  %v3660_v51 = vadd.f32 %v3596_v14, %v3468_v53  ;;  %v1786_v62 = vmax.f32 %v1690_v50, 0.0 }
 0x34c   : > { %v7252_v19 = vpop.f32.mrf.mxu1  ;;  %v3789_v55 = vsel %vm1566_vm0, %v3694_v57, 0.0 }
 0x34d   : > { %3790 = vadd.xlane.f32.xlu0 %v3789_v55  ;;  %1995 = vmatmul.mubr.bf16.gmra.mxu0 %v1811_v52  ;;  %v1784_v16 = vmax.f32 %v1682_v33, 0.0  ;;  %v1693_v24 = vadd.f32 %v7252_v19, %v8781_v13 }
 0x34e   : > { %v1684_v61 = vpop.f32.mrf.mxu1  ;;  %2004 = vmatprep.mubr.bf16.mxu0 %v7787_v11 }
 0x34f   : > { %v1685_v35 = vadd.f32 %v8781_v13, %v1684_v61  ;;  %v1787_v47 = vmax.f32 %v1693_v24, 0.0  ;;  %v3698_v63 = vpop.permute.xlu0 %3697 }
 0x350   : > { %v3795_v14 = vsel %vm1566_vm0, %v3698_v63, 0.0 }
 0x351   : > { %v1785_v8 = vmax.f32 %v1685_v35, 0.0  ;;  %v1813_v31 = vpack.c.bf16 %v1787_v47, %v1786_v62 }
 0x352   : > { %v3700_v15 = vpop.permute.xlu1 %3699 }
 0x353   : > { %v1812_v9 = vpack.c.bf16 %v1785_v8, %v1784_v16  ;;  %v3702_v27 = vpop.permute.xlu0 %3701 }
 0x354   : > { %v3801_v61 = vsel %vm1566_vm0, %v3702_v27, 0.0 }
 0x355   : > { %2005 = vmatmul.mubr.bf16.gmra.mxu0 %v1812_v9 }
 0x356   : > { %2014 = vmatprep.mubr.bf16.mxu0 %v7787_v11  ;;  %v3704_v44 = vpop.permute.xlu1 %3703 }
 0x357   : > { %v3706_v56 = vpop.permute.xlu0 %3705 }
 0x358   : > { %v7255_v29 = vpop.f32.mrf.mxu1  ;;  %v3807_v24 = vsel %vm1566_vm0, %v3706_v56, 0.0 }
 0x359   : > { %3755 = vrot.lane.b32.xlu1 %v3660_v51, %s7785_s27  ;;  %v1706_v28 = vadd.f32 %v7255_v29, %v8781_v13  ;;  %v3798_v29 = vsel %vm1566_vm0, %v3700_v15, 0.0 }
 0x35a   : > { %v1697_v38 = vpop.f32.mrf.mxu1  ;;  %v3708_v32 = vpop.permute.xlu1 %3707 }
 0x35b   : > { %v1698_v6 = vadd.f32 %v8781_v13, %v1697_v38  ;;  %v1790_v45 = vmax.f32 %v1706_v28, 0.0  ;;  %v3710_v1 = vpop.permute.xlu0 %3709 }
 0x35c   : > { %v7256_v54 = vpop.f32.mrf.mxu1  ;;  %v3813_v37 = vsel %vm1566_vm0, %v3710_v1, 0.0 }
 0x35d   : > { %2015 = vmatmul.mubr.bf16.gmra.mxu0 %v1813_v31  ;;  %v1788_v41 = vmax.f32 %v1698_v6, 0.0  ;;  %v1709_v48 = vadd.f32 %v7256_v54, %v8781_v13  ;;  %v3804_v54 = vsel %vm1566_vm0, %v3704_v44, 0.0 }
 0x35e   : > { %v1700_v49 = vpop.f32.mrf.mxu1  ;;  %2024 = vmatprep.mubr.bf16.mxu0 %v7787_v11  ;;  %v3712_v19 = vpop.permute.xlu1 %3711 }
 0x35f   : > { %v1701_v22 = vadd.f32 %v8781_v13, %v1700_v49  ;;  %v1791_v2 = vmax.f32 %v1709_v48, 0.0  ;;  %v3714_v58 = vpop.permute.xlu0 %3713  ;;  %v3816_v15 = vsel %vm1566_vm0, %v3712_v19, 0.0 }
 0x360   : > { %v3819_v31 = vsel %vm1566_vm0, %v3714_v58, 0.0 }
 0x361   : > { %v1789_v40 = vmax.f32 %v1701_v22, 0.0  ;;  %v1815_v36 = vpack.c.bf16 %v1791_v2, %v1790_v45 }
 0x362   : > { %v3716_v25 = vpop.permute.xlu1 %3715 }
 0x363   : > { %v1814_v26 = vpack.c.bf16 %v1789_v40, %v1788_v41  ;;  %3753 = vrot.lane.b32.xlu0 %v3659_v7, %s7785_s27  ;;  %v3718_v52 = vpop.permute.xlu0 %3717  ;;  %v3810_v41 = vsel %vm1566_vm0, %v3708_v32, 0.0  ;;  %v3822_v1 = vsel %vm1566_vm0, %v3716_v25, 0.0 }
 0x364   : > { %v3825_v7 = vsel %vm1566_vm0, %v3718_v52, 0.0 }
 0x365   : > { %2025 = vmatmul.mubr.bf16.gmra.mxu0 %v1814_v26 }
 0x366   : > { %2034 = vmatprep.mubr.bf16.mxu0 %v7787_v11  ;;  %v3720_v62 = vpop.permute.xlu1 %3719 }
 0x367   : > { %v3722_v4 = vpop.permute.xlu0 %3721  ;;  %v3828_v58 = vsel %vm1566_vm0, %v3720_v62, 0.0 }
 0x368   : > { %v7259_v23 = vpop.f32.mrf.mxu1  ;;  %v3831_v26 = vsel %vm1566_vm0, %v3722_v4, 0.0 }
 0x369   : > { %v1722_v3 = vadd.f32 %v7259_v23, %v8781_v13 }
 0x36a   : > { %v1713_v12 = vpop.f32.mrf.mxu1  ;;  %v3724_v18 = vpop.permute.xlu1 %3723 }
 0x36b   : > { %v1714_v21 = vadd.f32 %v8781_v13, %v1713_v12  ;;  %v1794_v57 = vmax.f32 %v1722_v3, 0.0  ;;  %v3726_v51 = vpop.permute.xlu0 %3725  ;;  %v3834_v52 = vsel %vm1566_vm0, %v3724_v18, 0.0 }
 0x36c   : > { %v7260_v60 = vpop.f32.mrf.mxu1 }
 0x36d   : > { %2035 = vmatmul.mubr.bf16.gmra.mxu0 %v1815_v36  ;;  %v1792_v20 = vmax.f32 %v1714_v21, 0.0  ;;  %v1725_v10 = vadd.f32 %v7260_v60, %v8781_v13  ;;  %v3837_v36 = vsel %vm1566_vm0, %v3726_v51, 0.0 }
 0x36e   : > { %v1716_v0 = vpop.f32.mrf.mxu1  ;;  %2044 = vmatprep.mubr.bf16.mxu0 %v7787_v11  ;;  %v3728_v23 = vpop.permute.xlu1 %3727 }
 0x36f   : > { %v1717_v5 = vadd.f32 %v8781_v13, %v1716_v0  ;;  %v1795_v59 = vmax.f32 %v1725_v10, 0.0  ;;  %v3730_v6 = vpop.permute.xlu0 %3729 }
 0x371   : > { %v1793_v46 = vmax.f32 %v1717_v5, 0.0  ;;  %v1817_v33 = vpack.c.bf16 %v1795_v59, %v1794_v57 }
 0x372   : > { %v3732_v0 = vpop.permute.xlu1 %3731 }
 0x373   : > { %v1816_v42 = vpack.c.bf16 %v1793_v46, %v1792_v20  ;;  %v3734_v28 = vpop.permute.xlu0 %3733  ;;  %v3843_v20 = vsel %vm1566_vm0, %v3730_v6, 0.0 }
 0x374   : > { %v3849_v3 = vsel %vm1566_vm0, %v3734_v28, 0.0 }
 0x375   : > { %2045 = vmatmul.mubr.bf16.gmra.mxu0 %v1816_v42 }
 0x376   : > { %2054 = vmatprep.mubr.bf16.mxu0 %v7787_v11  ;;  %v3736_v57 = vpop.permute.xlu1 %3735 }
 0x377   : > { %v3738_v21 = vpop.permute.xlu0 %3737  ;;  %v3852_v51 = vsel %vm1566_vm0, %v3736_v57, 0.0 }
 0x378   : > { %v7263_v30 = vpop.f32.mrf.mxu1 }
 0x379   : > { %v1738_v47 = vadd.f32 %v7263_v30, %v8781_v13 }
 0x37a   : > { %v1729_v55 = vpop.f32.mrf.mxu1  ;;  %v3740_v25 = vpop.permute.xlu1 %3739 }
 0x37b   : > { %v1730_v35 = vadd.f32 %v8781_v13, %v1729_v55  ;;  %v1798_v63 = vmax.f32 %v1738_v47, 0.0  ;;  %v3742_v59 = vpop.permute.xlu0 %3741  ;;  %v3858_v62 = vsel %vm1566_vm0, %v3740_v25, 0.0 }
 0x37c   : > { %v7264_v43 = vpop.f32.mrf.mxu1 }
 0x37d   : > { %2055 = vmatmul.mubr.bf16.gmra.mxu0 %v1817_v33  ;;  %3802 = vadd.xlane.f32.xlu1 %v3801_v61  ;;  %v1796_v9 = vmax.f32 %v1730_v35, 0.0  ;;  %v1741_v50 = vadd.f32 %v7264_v43, %v8781_v13  ;;  %v3855_v33 = vsel %vm1566_vm0, %v3738_v21, 0.0  ;;  %v3840_v35 = vsel %vm1566_vm0, %v3728_v23, 0.0 }
 0x37e   : > { %v1732_v16 = vpop.f32.mrf.mxu1  ;;  %v3744_v47 = vpop.permute.xlu1 %3743 }
 0x37f   : > { %v1733_v8 = vadd.f32 %v8781_v13, %v1732_v16  ;;  %v1799_v38 = vmax.f32 %v1741_v50, 0.0  ;;  %v3746_v16 = vpop.permute.xlu0 %3745 }
 0x380   : > { %v3867_v50 = vsel %vm1566_vm0, %v3746_v16, 0.0 }
 0x381   : > { %v1797_v34 = vmax.f32 %v1733_v8, 0.0  ;;  %3808 = vadd.xlane.f32.xlu1 %v3807_v24  ;;  %v1819_v49 = vpack.c.bf16 %v1799_v38, %v1798_v63  ;;  %v3861_v24 = vsel %vm1566_vm0, %v3742_v59, 0.0 }
 0x382   : > { %3796 = vadd.xlane.f32.xlu0 %v3795_v14  ;;  %v3748_v38 = vpop.permute.xlu1 %3747 }
 0x383   : > { %v1818_v53 = vpack.c.bf16 %v1797_v34, %v1796_v9  ;;  %v3846_v34 = vsel %vm1566_vm0, %v3732_v0, 0.0 }
 0x385   : > { %2065 = vmatmul.mubr.bf16.vlgmr.msra.gmra.mxu1 %v1818_v53  ;;  %3814 = vadd.xlane.f32.xlu1 %v3813_v37  ;;  %v3750_v53 = vpop.permute.xlu0 %3749 }
 0x386   : > { %3799 = vadd.xlane.f32.xlu0 %v3798_v29  ;;  %2074 = vmatprep.mubr.bf16.mxu1 %v7787_v11 }
 0x388   : > { %v7267_v17 = vpop.f32.mrf.mxu1 }
 0x389   : > { %3820 = vadd.xlane.f32.xlu1 %v3819_v31  ;;  %v1754_v60 = vadd.f32 %v7267_v17, %v8781_v13  ;;  %v3870_v17 = vsel %vm1566_vm0, %v3748_v38, 0.0  ;;  %v3752_v31 = vpop.permute.xlu1 %3751 }
 0x38a   : > { %3805 = vadd.xlane.f32.xlu0 %v3804_v54  ;;  %v1745_v39 = vpop.f32.mrf.mxu1  ;;  %v3876_v63 = vsel %vm1566_vm0, %v3752_v31, 0.0 }
 0x38b   : > { %v1746_v27 = vadd.f32 %v8781_v13, %v1745_v39  ;;  %v1802_v46 = vmax.f32 %v1754_v60, 0.0 }
 0x38c   : > { %v7268_v22 = vpop.f32.mrf.mxu1 }
 0x38d   : > { %2075 = vmatmul.mubr.bf16.gmra.mxu1 %v1819_v49  ;;  %3826 = vadd.xlane.f32.xlu1 %v3825_v7  ;;  %v1800_v56 = vmax.f32 %v1746_v27, 0.0  ;;  %v1757_v45 = vadd.f32 %v7268_v22, %v8781_v13  ;;  %v1840_v49 = vld [vmem:[%s11722_s9] sm:$0x3]  ;;  %v11791_v7 = vld [vmem:[#allocation4_spill] sm:$0xff] }
 0x38e   : > { %3811 = vadd.xlane.f32.xlu0 %v3810_v41  ;;  %v1748_v40 = vpop.f32.mrf.mxu1  ;;  %2084 = vmatprep.mubr.bf16.mxu1 %v7787_v11  ;;  %v8872_v27 = vrot.slane %v1840_v49, %v11791_v7 }
 0x38f   : > { %v1749_v48 = vadd.f32 %v8781_v13, %v1748_v40  ;;  %v1803_v44 = vmax.f32 %v1757_v45, 0.0  ;;  %v11792_v40 = vld [vmem:[#allocation3_spill] sm:$0xff] }
 0x391   : > { %v1801_v2 = vmax.f32 %v1749_v48, 0.0  ;;  %3832 = vadd.xlane.f32.xlu1 %v3831_v26  ;;  %v1821_v42 = vpack.c.bf16 %v1803_v44, %v1802_v46  ;;  %v8875_v48 = vrot.slane %v1840_v49, %v11792_v40 }
 0x392   : > { %3817 = vadd.xlane.f32.xlu0 %v3816_v15 }
 0x393   : > { %v1820_v12 = vpack.c.bf16 %v1801_v2, %v1800_v56 }
 0x395   : > { %2085 = vmatmul.mubr.bf16.gmra.mxu1 %v1820_v12  ;;  %3838 = vadd.xlane.f32.xlu1 %v3837_v36 }
 0x396   : > { %3823 = vadd.xlane.f32.xlu0 %v3822_v1  ;;  %2094 = vmatprep.mubr.bf16.mxu1 %v7787_v11 }
 0x398   : > { %v7271_v5 = vpop.f32.mrf.mxu1 }
 0x399   : > { %3844 = vadd.xlane.f32.xlu1 %v3843_v20  ;;  %v1770_v9 = vadd.f32 %v7271_v5, %v8781_v13 }
 0x39a   : > { %3829 = vadd.xlane.f32.xlu0 %v3828_v58  ;;  %v1761_v10 = vpop.f32.mrf.mxu1 }
 0x39b   : > { %v1762_v30 = vadd.f32 %v8781_v13, %v1761_v10  ;;  %v1806_v37 = vmax.f32 %v1770_v9, 0.0 }
 0x39c   : > { %v7272_v32 = vpop.f32.mrf.mxu1 }
 0x39d   : > { %2095 = vmatmul.mubr.bf16.gmra.mxu1 %v1821_v42  ;;  %3850 = vadd.xlane.f32.xlu1 %v3849_v3  ;;  %v1804_v43 = vmax.f32 %v1762_v30, 0.0  ;;  %v1773_v4 = vadd.f32 %v7272_v32, %v8781_v13 }
 0x39e   : > { %3835 = vadd.xlane.f32.xlu0 %v3834_v52  ;;  %v1764_v19 = vpop.f32.mrf.mxu1  ;;  %2104 = vmatprep.mubr.bf16.mxu1 %v7787_v11 }
 0x39f   : > { %v1765_v55 = vadd.f32 %v8781_v13, %v1764_v19  ;;  %v1807_v14 = vmax.f32 %v1773_v4, 0.0  ;;  %v3873_v13 = vsel %vm1566_vm0, %v3750_v53, 0.0 }
 0x3a1   : > { %v1805_v61 = vmax.f32 %v1765_v55, 0.0  ;;  %3856 = vadd.xlane.f32.xlu1 %v3855_v33  ;;  %v1823_v29 = vpack.c.bf16 %v1807_v14, %v1806_v37 }
 0x3a2   : > { %3841 = vadd.xlane.f32.xlu0 %v3840_v35 }
 0x3a3   : > { %v1822_v8 = vpack.c.bf16 %v1805_v61, %v1804_v43 }
 0x3a5   : > { %2105 = vmatmul.mubr.bf16.gmra.mxu1 %v1822_v8  ;;  %3862 = vadd.xlane.f32.xlu1 %v3861_v24 }
 0x3a6   : > { %3847 = vadd.xlane.f32.xlu0 %v3846_v34  ;;  %2114 = vmatprep.mubr.bf16.mxu1 %v7787_v11  ;;  %v3864_v11 = vsel %vm1566_vm0, %v3744_v47, 0.0 }
 0x3a9   : > { %3868 = vadd.xlane.f32.xlu1 %v3867_v50 }
 0x3aa   : > { %3853 = vadd.xlane.f32.xlu0 %v3852_v51 }
 0x3ad   : > { %2115 = vmatmul.mubr.bf16.gmra.mxu1 %v1823_v29  ;;  %3874 = vadd.xlane.f32.xlu1 %v3873_v13 }
 0x3ae   : > { %3859 = vadd.xlane.f32.xlu0 %v3858_v62 }
 0x3b2   : > { %3865 = vadd.xlane.f32.xlu0 %v3864_v11 }
 0x3b6   : > { %3871 = vadd.xlane.f32.xlu0 %v3870_v17 }
 0x3ba   : > { %3877 = vadd.xlane.f32.xlu0 %v3876_v63 }
 0x3d1   : > { %v3794_v24 = vpop.xlane.xlu1 %3793 }
 0x3d2   : > { %v7073_v37 = vadd.f32 -1.0, %v3794_v24 }
 0x3d4   : > { %v8917_v17 = vmul.f32 0.5, %v7073_v37 }
 0x3d5   : > { %v3756_v47 = vpop.permute.xlu1 %3755 }
 0x3d6   : > { %v3791_v54 = vpop.xlane.xlu0 %3790  ;;  %11793 = vst [vmem:[#allocation5_spill] sm:$0xff] %v8917_v17 }
 0x3d7   : > { %v7072_v51 = vadd.f32 -1.0, %v3791_v54 }
 0x3d9   : > { %v8919_v31 = vmul.f32 0.5, %v7072_v51  ;;  %v7721_v51 = vld [vmem:[%s7894_s23 + $0x40] sm:$0xff] }
 0x3da   : > { %v3754_v39 = vpop.permute.xlu0 %3753 }
 0x3db   : > { %v3879_v6 = vsel %vm1566_vm0, %v3754_v39, 0.0  ;;  %11794 = vst [vmem:[#allocation6_spill] sm:$0xff] %v8919_v31  ;;  %v7713_v39 = vld [vmem:[%s7894_s23] sm:$0xff] }
 0x3dc   : > { %3880 = vadd.xlane.f32.xlu1 %v3879_v6 }
 0x3f5   : > { %v1966_v18 = vpop.f32.mrf.mxu0 }
 0x3f6   : > { %v8878_v28 = vadd.f32 %v1966_v18, %v8872_v27  ;;  %v7714_v18 = vld [vmem:[%s7894_s23 + $0x8] sm:$0xff] }
 0x3f7   : > { %v1968_v22 = vpop.f32.mrf.mxu0 }
 0x3f8   : > { %v8881_v2 = vadd.f32 %v1968_v22, %v8875_v48  ;;  %v2125_v23 = vand.u32 2147483647, %v8878_v28  ;;  %v8924_v54 = vmul.f32 %v7713_v39, %v8878_v28 }
 0x3f9   : > { %v1970_v41 = vpop.f32.mrf.mxu0 }
 0x3fa   : > { %v2126_v45 = vand.u32 2147483647, %v8881_v2  ;;  %v8886_v12 = vadd.f32 %v1970_v41, %v8872_v27  ;;  %v2189_v1 = vsub.f32 0.0, %v2125_v23  ;;  %v8930_v22 = vmul.f32 %v7714_v18, %v8881_v2 }
 0x3fb   : > { %v1972_v26 = vpop.f32.mrf.mxu0 }
 0x3fc   : > { %v8889_v36 = vadd.f32 %v1972_v26, %v8875_v48  ;;  %v2190_v0 = vsub.f32 0.0, %v2126_v45  ;;  %v2127_v5 = vand.u32 2147483647, %v8886_v12  ;;  %v2253_v10 = vmul.f32 1.442695, %v2189_v1  ;;  %v7726_v1 = vld [vmem:[%s7894_s23 + $0x68] sm:$0xff] }
 0x3fd   : > { %v1976_v56 = vpop.f32.mrf.mxu0 }
 0x3fe   : > { %v8892_v21 = vadd.f32 %v1976_v56, %v8872_v27  ;;  %v2128_v20 = vand.u32 2147483647, %v8889_v36  ;;  %v2255_v3 = vmul.f32 1.442695, %v2190_v0  ;;  %v2191_v59 = vsub.f32 0.0, %v2127_v5  ;;  %v7716_v0 = vld [vmem:[%s7894_s23 + $0x18] sm:$0xff] }
 0x3ff   : > { %v1978_v15 = vpop.f32.mrf.mxu0  ;;  %7457 = vpow2.f32 %v2253_v10  ;;  %v8947_v5 = vmul.f32 %v7716_v0, %v8889_v36  ;;  %v7717_v10 = vld [vmem:[%s7894_s23 + $0x20] sm:$0xff] }
 0x400   : > { %v8895_v44 = vadd.f32 %v1978_v15, %v8875_v48  ;;  %v2129_v42 = vand.u32 2147483647, %v8892_v21  ;;  %v2192_v30 = vsub.f32 0.0, %v2128_v20  ;;  %7459 = vpow2.f32 %v2255_v3  ;;  %v7715_v15 = vld [vmem:[%s7894_s23 + $0x10] sm:$0xff] }
 0x401   : > { %v1980_v60 = vpop.f32.mrf.mxu0  ;;  %v2257_v43 = vmul.f32 1.442695, %v2191_v59  ;;  %v8938_v23 = vmul.f32 %v7715_v15, %v8886_v12  ;;  %v8957_v59 = vsel %vm1566_vm0, %v3756_v47, 0.0 }
 0x402   : > { %v8900_v46 = vadd.f32 %v1980_v60, %v8872_v27  ;;  %v2130_v32 = vand.u32 2147483647, %v8895_v44  ;;  %v2193_v19 = vsub.f32 0.0, %v2129_v42  ;;  %v2259_v35 = vmul.f32 1.442695, %v2192_v30  ;;  %11795 = vst [vmem:[#allocation7_spill] sm:$0xff] %v8957_v59 }
 0x403   : > { %v1982_v58 = vpop.f32.mrf.mxu0  ;;  %7461 = vpow2.f32 %v2257_v43  ;;  %v8954_v42 = vmul.f32 %v7717_v10, %v8892_v21 }
 0x404   : > { %v2131_v52 = vand.u32 2147483647, %v8900_v46  ;;  %v2194_v55 = vsub.f32 0.0, %v2130_v32  ;;  %v8906_v33 = vadd.f32 %v1982_v58, %v8875_v48  ;;  %v2261_v4 = vmul.f32 1.442695, %v2193_v19 }
 0x405   : > { %v1986_v57 = vpop.f32.mrf.mxu0  ;;  %7463 = vpow2.f32 %v2259_v35 }
 0x406   : > { %v8909_v61 = vadd.f32 %v1986_v57, %v8872_v27  ;;  %v2195_v16 = vsub.f32 0.0, %v2131_v52  ;;  %v2263_v8 = vmul.f32 1.442695, %v2194_v55  ;;  %v2132_v25 = vand.u32 2147483647, %v8906_v33  ;;  %v3803_v41 = vpop.xlane.xlu1 %3802  ;;  %v7718_v57 = vld [vmem:[%s7894_s23 + $0x28] sm:$0xff] }
 0x407   : > { %7465 = vpow2.f32 %v2261_v4  ;;  %v1988_v53 = vpop.f32.mrf.mxu0  ;;  %v7076_v32 = vadd.f32 -1.0, %v3803_v41  ;;  %v8964_v19 = vmul.f32 %v7718_v57, %v8895_v44  ;;  %v7723_v52 = vld [vmem:[%s7894_s23 + $0x50] sm:$0xff] }
 0x408   : > { %v2133_v9 = vand.u32 2147483647, %v8909_v61  ;;  %v2265_v34 = vmul.f32 1.442695, %v2195_v16  ;;  %7467 = vpow2.f32 %v2263_v8  ;;  %v2196_v14 = vsub.f32 0.0, %v2132_v25  ;;  %v7719_v16 = vld [vmem:[%s7894_s23 + $0x30] sm:$0xff] }
 0x409   : > { %v1990_v38 = vpop.f32.mrf.mxu0  ;;  %v8933_v26 = vadd.f32 %v1988_v53, %v8875_v48  ;;  %v8972_v4 = vmul.f32 %v7719_v16, %v8900_v46  ;;  %v8988_v47 = vmul.f32 %v7721_v51, %v8909_v61 }
 0x40a   : > { %v2197_v50 = vsub.f32 0.0, %v2133_v9  ;;  %7469 = vpow2.f32 %v2265_v34  ;;  %v2267_v13 = vmul.f32 1.442695, %v2196_v14  ;;  %v8941_v45 = vadd.f32 %v1990_v38, %v8872_v27  ;;  %v7720_v14 = vld [vmem:[%s7894_s23 + $0x38] sm:$0xff] }
 0x40b   : > { %v1992_v3 = vpop.f32.mrf.mxu0  ;;  %v2134_v55 = vand.u32 2147483647, %v8933_v26  ;;  %11797 = vst [vmem:[#allocation9_spill] sm:$0xff] %v8988_v47 }
 0x40c   : > { %v8913_v29 = vpop.eup %7457  ;;  %v2269_v62 = vmul.f32 1.442695, %v2197_v50  ;;  %7471 = vpow2.f32 %v2267_v13  ;;  %v2135_v25 = vand.u32 2147483647, %v8941_v45  ;;  %v8982_v50 = vmul.f32 %v7720_v14, %v8906_v33 }
 0x40d   : > { %v8915_v11 = vpop.eup %7459  ;;  %v2445_v6 = vadd.f32 1.0, %v8913_v29  ;;  %v2448_v9 = vmul.f32 -0.5, %v8913_v29  ;;  %v8990_v13 = vmul.f32 0.5, %v7076_v32  ;;  %v2198_v18 = vsub.f32 0.0, %v2134_v55 }
 0x40e   : > { %v2454_v60 = vadd.f32 1.0, %v8915_v11  ;;  %7473 = vpow2.f32 %v2269_v62  ;;  %11796 = vst [vmem:[#allocation8_spill] sm:$0xff] %v8982_v50  ;;  %v1996_v62 = vpop.f32.mrf.mxu0  ;;  %v2457_v39 = vmul.f32 -0.5, %v8915_v11  ;;  %v2199_v10 = vsub.f32 0.0, %v2135_v25 }
 0x40f   : > { %7475 = vlog2.f32 %v2445_v6  ;;  %11798 = vst [vmem:[#allocation10_spill] sm:$0xff] %v8990_v13  ;;  %v9003_v32 = vadd.f32 %v1992_v3, %v8875_v48  ;;  %v2449_v57 = vadd.f32 1.0, %v2448_v9  ;;  %v9007_v14 = vadd.f32 %v1996_v62, %v8872_v27 }
 0x410   : > { %v8949_v20 = vpop.eup %7461  ;;  %7477 = vlog2.f32 %v2454_v60  ;;  %v7722_v60 = vld [vmem:[%s7894_s23 + $0x48] sm:$0xff]  ;;  %v2451_v55 = vand.u32 2147483647, %v8913_v29  ;;  %v2458_v41 = vadd.f32 1.0, %v2457_v39  ;;  %v2271_v25 = vmul.f32 1.442695, %v2198_v18  ;;  %v1998_v37 = vpop.f32.mrf.mxu0 }
 0x411   : > { %v2463_v34 = vadd.f32 1.0, %v8949_v20  ;;  %v9000_v0 = vmul.f32 %v7722_v60, %v8933_v26  ;;  %v2466_v16 = vmul.f32 -0.5, %v8949_v20  ;;  %v2460_v9 = vand.u32 2147483647, %v8915_v11 }
 0x412   : > { %v8959_v30 = vpop.eup %7463  ;;  %v2136_v62 = vand.u32 2147483647, %v9003_v32  ;;  %v9022_v39 = vmul.f32 %v7723_v52, %v8941_v45  ;;  %vm9029_vm1 = vcmp.lt.f32.partialorder %v2451_v55, 0.0004427343  ;;  %v3809_v55 = vpop.xlane.xlu1 %3808  ;;  %v9044_v56 = vadd.f32 %v1998_v37, %v8875_v48 }
 0x413   : > { %v2472_v53 = vadd.f32 1.0, %v8959_v30  ;;  %11799 = vst [vmem:[#allocation11_spill] sm:$0xff] %v9000_v0  ;;  %7479 = vlog2.f32 %v2463_v34  ;;  %v2475_v51 = vmul.f32 -0.5, %v8959_v30  ;;  %v2273_v34 = vmul.f32 1.442695, %v2199_v10 }
 0x414   : > { %v8967_v43 = vpop.eup %7465  ;;  %v2467_v35 = vadd.f32 1.0, %v2466_v16  ;;  %11800 = vst [vmem:[#allocation12_spill] sm:$0xff] %v9022_v39  ;;  %v2478_v52 = vand.u32 2147483647, %v8959_v30  ;;  %vm9038_vm2 = vcmp.lt.f32.partialorder %v2460_v9, 0.0004427343 }
 0x415   : > { %v8976_v24 = vpop.eup %7467  ;;  %v2481_v6 = vadd.f32 1.0, %v8967_v43  ;;  %7481 = vlog2.f32 %v2472_v53  ;;  %v9018_v53 = vmul.f32 %v8913_v29, %v2449_v57  ;;  %v2476_v10 = vadd.f32 1.0, %v2475_v51 }
 0x416   : > { %v2490_v15 = vadd.f32 1.0, %v8976_v24  ;;  %v2484_v3 = vmul.f32 -0.5, %v8967_v43  ;;  %v9034_v29 = vmul.f32 %v8915_v11, %v2458_v41  ;;  %v2493_v57 = vmul.f32 -0.5, %v8976_v24  ;;  %v2000_v11 = vpop.f32.mrf.mxu0 }
 0x417   : > { %v8992_v38 = vpop.eup %7469  ;;  %7483 = vlog2.f32 %v2481_v6  ;;  %v2137_v6 = vand.u32 2147483647, %v9007_v14  ;;  %v9047_v41 = vmul.f32 %v8949_v20, %v2467_v35  ;;  %v2487_v49 = vand.u32 2147483647, %v8967_v43  ;;  %v3797_v35 = vpop.xlane.xlu0 %3796 }
 0x418   : > { %v2499_v60 = vadd.f32 1.0, %v8992_v38  ;;  %7485 = vlog2.f32 %v2490_v15  ;;  %v2469_v15 = vand.u32 2147483647, %v8949_v20  ;;  %v9052_v59 = vmul.f32 %v8959_v30, %v2476_v10  ;;  %v2002_v10 = vpop.f32.mrf.mxu0 }
 0x419   : > { %v9015_v8 = vpop.eup %7471  ;;  %v2201_v9 = vsub.f32 0.0, %v2137_v6  ;;  %v2485_v13 = vadd.f32 1.0, %v2484_v3  ;;  %v2494_v40 = vadd.f32 1.0, %v2493_v57  ;;  %v2496_v7 = vand.u32 2147483647, %v8976_v24 }
 0x41a   : > { %7487 = vlog2.f32 %v2499_v60  ;;  %v2508_v51 = vadd.f32 1.0, %v9015_v8  ;;  %v2200_v60 = vsub.f32 0.0, %v2136_v62  ;;  %v2511_v62 = vmul.f32 -0.5, %v9015_v8 }
 0x41b   : > { %v9025_v18 = vpop.eup %7473  ;;  %7489 = vpow2.f32 %v2271_v25  ;;  %v7078_v20 = vadd.f32 -1.0, %v3809_v55  ;;  %vm9057_vm3 = vcmp.lt.f32.partialorder %v2469_v15, 0.0004427343  ;;  %v2138_v3 = vand.u32 2147483647, %v9044_v56 }
 0x41c   : > { %v7476_v16 = vpop.eup %7475  ;;  %7491 = vpow2.f32 %v2273_v34  ;;  %v2517_v25 = vadd.f32 1.0, %v9025_v18  ;;  %v2502_v34 = vmul.f32 -0.5, %v8992_v38  ;;  %v2520_v6 = vmul.f32 -0.5, %v9025_v18 }
 0x41d   : > { %v7478_v63 = vpop.eup %7477  ;;  %v2447_v37 = vmul.f32 0.6931472, %v7476_v16  ;;  %7493 = vlog2.f32 %v2508_v51  ;;  %v2275_v30 = vmul.f32 1.442695, %v2200_v60  ;;  %vm9063_vm4 = vcmp.lt.f32.partialorder %v2478_v52, 0.0004427343 }
 0x41e   : > { %v2456_v31 = vmul.f32 0.6931472, %v7478_v63  ;;  %7495 = vlog2.f32 %v2517_v25  ;;  %v2277_v57 = vmul.f32 1.442695, %v2201_v9  ;;  %v9068_v16 = vadd.f32 %v2000_v11, %v8872_v27  ;;  %v7725_v25 = vld [vmem:[%s7894_s23 + $0x60] sm:$0xff] }
 0x41f   : > { %v9071_v55 = vmul.f32 %v8967_v43, %v2485_v13  ;;  %vm9073_vm5 = vcmp.lt.f32.partialorder %v2487_v49, 0.0004427343  ;;  %v2503_v60 = vadd.f32 1.0, %v2502_v34  ;;  %v2512_v0 = vadd.f32 1.0, %v2511_v62 }
 0x420   : > { %v7480_v15 = vpop.eup %7479  ;;  %v7074_v63 = vadd.f32 -1.0, %v3797_v35  ;;  %v9078_v47 = vmul.f32 %v8976_v24, %v2494_v40  ;;  %vm9080_vm6 = vcmp.lt.f32.partialorder %v2496_v7, 0.0004427343  ;;  %v2505_v11 = vand.u32 2147483647, %v8992_v38  ;;  %v2006_v40 = vpop.f32.mrf.mxu0 }
 0x421   : > { %v2514_v43 = vand.u32 2147483647, %v9015_v8  ;;  %v9086_v13 = vmul.f32 0.5, %v7078_v20  ;;  %v2453_v9 = vsel %vm9029_vm1, %v9018_v53, %v2447_v37  ;;  %v2521_v34 = vadd.f32 1.0, %v2520_v6 }
 0x422   : > { %v7482_v52 = vpop.eup %7481  ;;  %7497 = vpow2.f32 %v2275_v30  ;;  %v2202_v62 = vsub.f32 0.0, %v2138_v3  ;;  %v2462_v7 = vsel %vm9038_vm2, %v9034_v29, %v2456_v31  ;;  %v2465_v35 = vmul.f32 0.6931472, %v7480_v15  ;;  %v3800_v3 = vpop.xlane.xlu0 %3799 }
 0x423   : > { %11813 = vst [vmem:[#allocation13_spill] sm:$0xff] %v9086_v13  ;;  %7499 = vpow2.f32 %v2277_v57  ;;  %v2139_v50 = vand.u32 2147483647, %v9068_v16  ;;  %v2474_v20 = vmul.f32 0.6931472, %v7482_v52  ;;  %v9096_v13 = vmul.f32 %v8992_v38, %v2503_v60  ;;  %v3815_v38 = vpop.xlane.xlu1 %3814 }
 0x424   : > { %v7484_v49 = vpop.eup %7483  ;;  %v9099_v58 = vmul.f32 %v9015_v8, %v2512_v0  ;;  %v2523_v53 = vand.u32 2147483647, %v9025_v18  ;;  %v11814_v6 = vmax.f32 %v8878_v28, 0.0  ;;  %vm9106_vm7 = vcmp.lt.f32.partialorder %v2505_v11, 0.0004427343  ;;  %v2008_v11 = vpop.f32.mrf.mxu0 }
 0x425   : > { %v7486_v24 = vpop.eup %7485  ;;  %v2483_v31 = vmul.f32 0.6931472, %v7484_v49  ;;  %v9110_v29 = vmul.f32 0.5, %v7074_v63  ;;  %v9113_v8 = vadd.f32 %v2002_v10, %v8875_v48  ;;  %v11818_v57 = vmax.f32 %v8881_v2, 0.0 }
 0x426   : > { %v9104_v30 = vadd.f32 %v2453_v9, %v11814_v6  ;;  %v2492_v15 = vmul.f32 0.6931472, %v7486_v24  ;;  %v9122_v60 = vmul.f32 %v9025_v18, %v2521_v34  ;;  %v2279_v52 = vmul.f32 1.442695, %v2202_v62  ;;  %v7724_v9 = vld [vmem:[%s7894_s23 + $0x58] sm:$0xff]  ;;  %v2010_v51 = vpop.f32.mrf.mxu0 }
 0x427   : > { %v7488_v37 = vpop.eup %7487  ;;  %11817 = vst [vmem:[#allocation14_spill] sm:$0xff] %v9110_v29  ;;  %v9119_v28 = vadd.f32 %v2462_v7, %v11818_v57  ;;  %v2471_v63 = vsel %vm9057_vm3, %v9047_v41, %v2465_v35  ;;  %v9132_v6 = vmul.f32 %v7724_v9, %v9003_v32  ;;  %v2203_v2 = vsub.f32 0.0, %v2139_v50 }
 0x428   : > { %v9115_v0 = vpop.eup %7489  ;;  %v2480_v18 = vsel %vm9063_vm4, %v9052_v59, %v2474_v20  ;;  %v7080_v34 = vadd.f32 -1.0, %v3815_v38  ;;  %v7075_v62 = vadd.f32 -1.0, %v3800_v3  ;;  %v9138_v24 = vadd.f32 %v2006_v40, %v8872_v27 }
 0x429   : > { %v9124_v49 = vpop.eup %7491  ;;  %11819 = vst [vmem:[#allocation15_spill] sm:$0xff] %v9132_v6  ;;  %v2489_v17 = vsel %vm9073_vm5, %v9071_v55, %v2483_v31  ;;  %vm9143_vm8 = vcmp.lt.f32.partialorder %v2514_v43, 0.0004427343  ;;  %v2526_v50 = vadd.f32 1.0, %v9115_v0  ;;  %v2140_v59 = vand.u32 2147483647, %v9113_v8 }
 0x42a   : > { %v2498_v39 = vsel %vm9080_vm6, %v9078_v47, %v2492_v15  ;;  %v2501_v40 = vmul.f32 0.6931472, %v7488_v37  ;;  %vm9153_vm9 = vcmp.lt.f32.partialorder %v2523_v53, 0.0004427343  ;;  %v2535_v55 = vadd.f32 1.0, %v9124_v49  ;;  %v7494_v43 = vpop.eup %7493 }
 0x42b   : > { %7501 = vpow2.f32 %v2279_v52  ;;  %v11824_v20 = vmax.f32 %v8886_v12, 0.0  ;;  %v11825_v38 = vmax.f32 %v8889_v36, 0.0  ;;  %v9168_v47 = vmul.f32 %v7725_v25, %v9007_v14  ;;  %v7496_v37 = vpop.eup %7495 }
 0x42c   : > { %v2281_v53 = vmul.f32 1.442695, %v2203_v2  ;;  %v11827_v57 = vmax.f32 %v8892_v21, 0.0  ;;  %v9174_v52 = vmul.f32 0.5, %v7080_v34  ;;  %v9176_v9 = vmul.f32 0.5, %v7075_v62 }
 0x42d   : > { %v9160_v31 = vadd.f32 %v2471_v63, %v11824_v20  ;;  %v9164_v3 = vadd.f32 %v2480_v18, %v11825_v38  ;;  %11826 = vst [vmem:[#allocation16_spill] sm:$0xff] %v9168_v47  ;;  %v2141_v12 = vand.u32 2147483647, %v9138_v24  ;;  %v11830_v36 = vmax.f32 %v8895_v44, 0.0  ;;  %v2012_v20 = vpop.f32.mrf.mxu0  ;;  %v7727_v38 = vld [vmem:[%s7894_s23 + $0x70] sm:$0xff] }
 0x42e   : > { %v9172_v15 = vadd.f32 %v2489_v17, %v11827_v57  ;;  %11828 = vst [vmem:[#allocation17_spill] sm:$0xff] %v9174_v52  ;;  %11829 = vst [vmem:[#allocation18_spill] sm:$0xff] %v9176_v9  ;;  %7503 = vlog2.f32 %v2526_v50  ;;  %v2204_v18 = vsub.f32 0.0, %v2140_v59  ;;  %v9184_v2 = vadd.f32 %v2008_v11, %v8875_v48  ;;  %v3821_v17 = vpop.xlane.xlu1 %3820 }
 0x42f   : > { %v9181_v63 = vadd.f32 %v2498_v39, %v11830_v36  ;;  %v2507_v21 = vsel %vm9106_vm7, %v9096_v13, %v2501_v40  ;;  %v2510_v34 = vmul.f32 0.6931472, %v7494_v43  ;;  %v2529_v62 = vmul.f32 -0.5, %v9115_v0  ;;  %v9190_v44 = vpop.eup %7497 }
 0x430   : > { %7505 = vlog2.f32 %v2535_v55  ;;  %v2519_v39 = vmul.f32 0.6931472, %v7496_v37  ;;  %v2538_v50 = vmul.f32 -0.5, %v9124_v49  ;;  %v9194_v11 = vadd.f32 %v2010_v51, %v8872_v27  ;;  %v9196_v59 = vpop.eup %7499  ;;  %v2016_v55 = vpop.f32.mrf.mxu0 }
 0x431   : > { %7507 = vpow2.f32 %v2281_v53  ;;  %v9201_v40 = vmul.f32 %v7726_v1, %v9044_v56  ;;  %v2205_v43 = vsub.f32 0.0, %v2141_v12  ;;  %v9206_v25 = vmul.f32 %v7727_v38, %v9068_v16  ;;  %v3806_v53 = vpop.xlane.xlu0 %3805 }
 0x432   : > { %v7082_v37 = vadd.f32 -1.0, %v3821_v17  ;;  %v2283_v57 = vmul.f32 1.442695, %v2204_v18  ;;  %v2142_v51 = vand.u32 2147483647, %v9184_v2  ;;  %v11833_v36 = vmax.f32 %v8900_v46, 0.0 }
 0x433   : > { %11831 = vst [vmem:[#allocation19_spill] sm:$0xff] %v9201_v40  ;;  %11832 = vst [vmem:[#allocation20_spill] sm:$0xff] %v9206_v25  ;;  %v2516_v1 = vsel %vm9143_vm8, %v9099_v58, %v2510_v34  ;;  %v2530_v13 = vadd.f32 1.0, %v2529_v62  ;;  %v2544_v12 = vadd.f32 1.0, %v9190_v44  ;;  %v2525_v17 = vsel %vm9153_vm9, %v9122_v60, %v2519_v39 }
 0x434   : > { %v9211_v7 = vadd.f32 %v2507_v21, %v11833_v36  ;;  %v2539_v38 = vadd.f32 1.0, %v2538_v50  ;;  %v2553_v18 = vadd.f32 1.0, %v9196_v59  ;;  %v2143_v10 = vand.u32 2147483647, %v9194_v11 }
 0x435   : > { %v2532_v46 = vand.u32 2147483647, %v9115_v0  ;;  %v2541_v21 = vand.u32 2147483647, %v9124_v49  ;;  %v2285_v36 = vmul.f32 1.442695, %v2205_v43  ;;  %v9225_v58 = vadd.f32 %v2012_v20, %v8875_v48  ;;  %v3827_v20 = vpop.xlane.xlu1 %3826 }
 0x436   : > { %v7077_v41 = vadd.f32 -1.0, %v3806_v53  ;;  %7509 = vpow2.f32 %v2283_v57  ;;  %v2206_v34 = vsub.f32 0.0, %v2142_v51  ;;  %v9228_v62 = vadd.f32 %v2016_v55, %v8872_v27  ;;  %v2018_v51 = vpop.f32.mrf.mxu0 }
 0x437   : > { %v11834_v60 = vmax.f32 %v8906_v33, 0.0  ;;  %v11835_v39 = vmax.f32 %v8909_v61, 0.0  ;;  %v9239_v52 = vmul.f32 %v9115_v0, %v2530_v13  ;;  %7511 = vlog2.f32 %v2544_v12  ;;  %v3812_v33 = vpop.xlane.xlu0 %3811 }
 0x438   : > { %v9241_v43 = vpop.eup %7501  ;;  %v9244_v53 = vmul.f32 %v9124_v49, %v2539_v38  ;;  %7513 = vlog2.f32 %v2553_v18  ;;  %v9246_v55 = vmul.f32 0.5, %v7082_v37  ;;  %v2207_v57 = vsub.f32 0.0, %v2143_v10  ;;  %v2020_v25 = vpop.f32.mrf.mxu0 }
 0x439   : > { %v9232_v35 = vadd.f32 %v2516_v1, %v11834_v60  ;;  %v9236_v50 = vadd.f32 %v2525_v17, %v11835_v39  ;;  %vm9248_vm10 = vcmp.lt.f32.partialorder %v2532_v46, 0.0004427343  ;;  %v2547_v0 = vmul.f32 -0.5, %v9190_v44 }
 0x43a   : > { %11836 = vst [vmem:[#allocation21_spill] sm:$0xff] %v9246_v55  ;;  %v2556_v13 = vmul.f32 -0.5, %v9196_v59  ;;  %7515 = vpow2.f32 %v2285_v36  ;;  %v2144_v49 = vand.u32 2147483647, %v9225_v58  ;;  %vm9255_vm11 = vcmp.lt.f32.partialorder %v2541_v21, 0.0004427343 }
 0x43b   : > { %v9259_v37 = vmul.f32 0.5, %v7077_v41  ;;  %v7084_v10 = vadd.f32 -1.0, %v3827_v20  ;;  %v2287_v12 = vmul.f32 1.442695, %v2206_v34  ;;  %v2145_v17 = vand.u32 2147483647, %v9228_v62  ;;  %v7504_v38 = vpop.eup %7503 }
 0x43c   : > { %v2562_v18 = vadd.f32 1.0, %v9241_v43  ;;  %v7079_v60 = vadd.f32 -1.0, %v3812_v33  ;;  %v9265_v36 = vadd.f32 %v2018_v51, %v8875_v48  ;;  %v7728_v21 = vld [vmem:[%s7894_s23 + $0x78] sm:$0xff]  ;;  %v7729_v20 = vld [vmem:[%s7894_s23 + $0x80] sm:$0xff]  ;;  %v2548_v29 = vadd.f32 1.0, %v2547_v0 }
 0x43d   : > { %11841 = vst [vmem:[#allocation22_spill] sm:$0xff] %v9259_v37  ;;  %v7506_v39 = vpop.eup %7505  ;;  %v9269_v55 = vmul.f32 %v7728_v21, %v9113_v8  ;;  %v9274_v34 = vmul.f32 %v7729_v20, %v9138_v24  ;;  %v2289_v37 = vmul.f32 1.442695, %v2207_v57  ;;  %v2550_v33 = vand.u32 2147483647, %v9190_v44 }
 0x43e   : > { %v9276_v9 = vpop.eup %7507  ;;  %v2557_v46 = vadd.f32 1.0, %v2556_v13  ;;  %v2208_v51 = vsub.f32 0.0, %v2144_v49  ;;  %v2528_v40 = vmul.f32 0.6931472, %v7504_v38  ;;  %v2559_v47 = vand.u32 2147483647, %v9196_v59  ;;  %v3833_v13 = vpop.xlane.xlu1 %3832 }
 0x43f   : > { %11842 = vst [vmem:[#allocation23_spill] sm:$0xff] %v9269_v55  ;;  %11843 = vst [vmem:[#allocation24_spill] sm:$0xff] %v9274_v34  ;;  %7517 = vpow2.f32 %v2287_v12  ;;  %v2209_v21 = vsub.f32 0.0, %v2145_v17  ;;  %v2537_v55 = vmul.f32 0.6931472, %v7506_v39  ;;  %v2565_v20 = vmul.f32 -0.5, %v9241_v43 }
 0x440   : > { %7519 = vlog2.f32 %v2562_v18  ;;  %v2146_v57 = vand.u32 2147483647, %v9265_v36  ;;  %v2571_v41 = vadd.f32 1.0, %v9276_v9  ;;  %v9283_v0 = vmul.f32 0.5, %v7084_v10  ;;  %v3818_v18 = vpop.xlane.xlu0 %3817 }
 0x441   : > { %7521 = vpow2.f32 %v2289_v37  ;;  %v9286_v49 = vadd.f32 %v2020_v25, %v8872_v27  ;;  %v9289_v38 = vmul.f32 %v9190_v44, %v2548_v29  ;;  %v9292_v12 = vmul.f32 %v9196_v59, %v2557_v46  ;;  %v2022_v59 = vpop.f32.mrf.mxu0 }
 0x442   : > { %11844 = vst [vmem:[#allocation25_spill] sm:$0xff] %v9283_v0  ;;  %v9294_v17 = vmul.f32 0.5, %v7079_v60  ;;  %v2291_v39 = vmul.f32 1.442695, %v2208_v51  ;;  %v2534_v10 = vsel %vm9248_vm10, %v9239_v52, %v2528_v40  ;;  %vm9299_vm12 = vcmp.lt.f32.partialorder %v2550_v33, 0.0004427343 }
 0x443   : > { %v7730_v0 = vld [vmem:[%s7894_s23 + $0x88] sm:$0xff]  ;;  %v2293_v44 = vmul.f32 1.442695, %v2209_v21  ;;  %v9308_v46 = vpop.eup %7509  ;;  %v2543_v60 = vsel %vm9255_vm11, %v9244_v53, %v2537_v55  ;;  %vm9313_vm13 = vcmp.lt.f32.partialorder %v2559_v47, 0.0004427343  ;;  %v2566_v40 = vadd.f32 1.0, %v2565_v20 }
 0x444   : > { %11845 = vst [vmem:[#allocation26_spill] sm:$0xff] %v9294_v17  ;;  %v9306_v29 = vmul.f32 %v7730_v0, %v9184_v2  ;;  %v7086_v61 = vadd.f32 -1.0, %v3833_v13  ;;  %v2210_v33 = vsub.f32 0.0, %v2146_v57  ;;  %v7512_v51 = vpop.eup %7511  ;;  %v2568_v25 = vand.u32 2147483647, %v9241_v43 }
 0x445   : > { %7523 = vlog2.f32 %v2571_v41  ;;  %v7081_v21 = vadd.f32 -1.0, %v3818_v18  ;;  %v2147_v0 = vand.u32 2147483647, %v9286_v49  ;;  %v7514_v17 = vpop.eup %7513  ;;  %v11851_v34 = vmax.f32 %v8933_v26, 0.0  ;;  %v2026_v26 = vpop.f32.mrf.mxu0 }
 0x446   : > { %11848 = vst [vmem:[#allocation27_spill] sm:$0xff] %v9306_v29  ;;  %v2574_v47 = vmul.f32 -0.5, %v9276_v9  ;;  %7525 = vpow2.f32 %v2291_v39  ;;  %v11852_v20 = vmax.f32 %v8941_v45, 0.0  ;;  %v2580_v41 = vadd.f32 1.0, %v9308_v46 }
 0x447   : > { %v9321_v1 = vadd.f32 %v2534_v10, %v11851_v34  ;;  %v9325_v55 = vpop.eup %7515  ;;  %7527 = vpow2.f32 %v2293_v44  ;;  %v9333_v13 = vadd.f32 %v2022_v59, %v8875_v48  ;;  %v2546_v34 = vmul.f32 0.6931472, %v7512_v51  ;;  %v7731_v10 = vld [vmem:[%s7894_s23 + $0x90] sm:$0xff] }
 0x448   : > { %v9329_v57 = vadd.f32 %v2543_v60, %v11852_v20  ;;  %v9336_v18 = vmul.f32 %v9241_v43, %v2566_v40  ;;  %v9340_v39 = vmul.f32 %v7731_v10, %v9194_v11  ;;  %v2295_v53 = vmul.f32 1.442695, %v2210_v33  ;;  %v7732_v10 = vld [vmem:[%s7894_s23 + $0x98] sm:$0xff] }
 0x449   : > { %v2555_v29 = vmul.f32 0.6931472, %v7514_v17  ;;  %v9342_v45 = vmul.f32 0.5, %v7086_v61  ;;  %v9344_v60 = vmul.f32 0.5, %v7081_v21  ;;  %v2211_v44 = vsub.f32 0.0, %v2147_v0  ;;  %v2028_v21 = vpop.f32.mrf.mxu0 }
 0x44a   : > { %11853 = vst [vmem:[#allocation28_spill] sm:$0xff] %v9340_v39  ;;  %v2575_v20 = vadd.f32 1.0, %v2574_v47  ;;  %v2577_v59 = vand.u32 2147483647, %v9276_v9  ;;  %v2583_v51 = vmul.f32 -0.5, %v9308_v46  ;;  %v2589_v43 = vadd.f32 1.0, %v9325_v55 }
 0x44b   : > { %11854 = vst [vmem:[#allocation29_spill] sm:$0xff] %v9342_v45  ;;  %11855 = vst [vmem:[#allocation30_spill] sm:$0xff] %v9344_v60  ;;  %vm9349_vm14 = vcmp.lt.f32.partialorder %v2568_v25, 0.0004427343  ;;  %7529 = vlog2.f32 %v2580_v41  ;;  %v2592_v17 = vmul.f32 -0.5, %v9325_v55  ;;  %v2552_v47 = vsel %vm9299_vm12, %v9289_v38, %v2546_v34  ;;  %v7733_v39 = vld [vmem:[%s7894_s23 + $0xa0] sm:$0xff]  ;;  %v3824_v60 = vpop.xlane.xlu0 %3823 }
 0x44c   : > { %v2148_v33 = vand.u32 2147483647, %v9333_v13  ;;  %v9356_v0 = vpop.eup %7517  ;;  %v9363_v25 = vmul.f32 %v7732_v10, %v9225_v58  ;;  %7531 = vpow2.f32 %v2295_v53  ;;  %v9366_v41 = vadd.f32 %v2026_v26, %v8872_v27 }
 0x44d   : > { %v7520_v45 = vpop.eup %7519  ;;  %v2561_v61 = vsel %vm9313_vm13, %v9292_v12, %v2555_v29  ;;  %v9374_v6 = vmul.f32 %v7733_v39, %v9228_v62  ;;  %v2297_v38 = vmul.f32 1.442695, %v2211_v44  ;;  %v9379_v34 = vmul.f32 %v9276_v9, %v2575_v20 }
 0x44e   : > { %11858 = vst [vmem:[#allocation31_spill] sm:$0xff] %v9363_v25  ;;  %v9376_v37 = vpop.eup %7521  ;;  %v2584_v53 = vadd.f32 1.0, %v2583_v51  ;;  %v2586_v26 = vand.u32 2147483647, %v9308_v46  ;;  %7533 = vlog2.f32 %v2589_v43  ;;  %v11860_v10 = vmax.f32 %v9003_v32, 0.0 }
 0x44f   : > { %11859 = vst [vmem:[#allocation32_spill] sm:$0xff] %v9374_v6  ;;  %v2593_v12 = vadd.f32 1.0, %v2592_v17  ;;  %v2598_v29 = vadd.f32 1.0, %v9356_v0  ;;  %v2212_v39 = vsub.f32 0.0, %v2148_v33  ;;  %v2030_v6 = vpop.f32.mrf.mxu0  ;;  %v11861_v44 = vmax.f32 %v9007_v14, 0.0 }
 0x450   : > { %v9384_v52 = vadd.f32 %v2552_v47, %v11860_v10  ;;  %v2564_v9 = vmul.f32 0.6931472, %v7520_v45  ;;  %vm9391_vm15 = vcmp.lt.f32.partialorder %v2577_v59, 0.0004427343  ;;  %v2601_v51 = vmul.f32 -0.5, %v9356_v0 }
 0x451   : > { %v9389_v25 = vadd.f32 %v2561_v61, %v11861_v44  ;;  %v2149_v32 = vand.u32 2147483647, %v9366_v41  ;;  %v2607_v43 = vadd.f32 1.0, %v9376_v37  ;;  %7535 = vpow2.f32 %v2297_v38 }
 0x452   : > { %v9399_v17 = vadd.f32 %v2028_v21, %v8875_v48  ;;  %v3150_v14 = vsub.f32 %v8930_v22, %v9119_v28  ;;  %v7524_v61 = vpop.eup %7523  ;;  %v9404_v45 = vmul.f32 %v9308_v46, %v2584_v53  ;;  %v2595_v59 = vand.u32 2147483647, %v9325_v55 }
 0x453   : > { %11862 = vst [vmem:[#allocation33_spill] sm:$0xff] %v9389_v25  ;;  %v7083_v33 = vadd.f32 -1.0, %v3824_v60  ;;  %v9408_v47 = vadd.f32 %v2030_v6, %v8872_v27  ;;  %v9410_v10 = vpop.eup %7525  ;;  %v9413_v38 = vmul.f32 %v9325_v55, %v2593_v12  ;;  %7537 = vlog2.f32 %v2598_v29 }
 0x454   : > { %v2299_v21 = vmul.f32 1.442695, %v2212_v39  ;;  %v3149_v22 = vsub.f32 %v8924_v54, %v9104_v30  ;;  %v9417_v28 = vpop.eup %7527  ;;  %v2570_v46 = vsel %vm9349_vm14, %v9336_v18, %v2564_v9  ;;  %v2602_v60 = vadd.f32 1.0, %v2601_v51  ;;  %v3830_v18 = vpop.xlane.xlu0 %3829 }
 0x455   : > { %v2610_v6 = vmul.f32 -0.5, %v9376_v37  ;;  %v2213_v53 = vsub.f32 0.0, %v2149_v32  ;;  %v2573_v44 = vmul.f32 0.6931472, %v7524_v61  ;;  %7539 = vlog2.f32 %v2607_v43  ;;  %v2032_v9 = vpop.f32.mrf.mxu0 }
 0x456   : > { %v2150_v55 = vand.u32 2147483647, %v9399_v17  ;;  %v3213_v12 = vadd.f32 %v3150_v14, %v3149_v22  ;;  %vm9424_vm0 = vcmp.lt.f32.partialorder %v2586_v26, 0.0004427343  ;;  %v2604_v54 = vand.u32 2147483647, %v9356_v0 }
 0x457   : > { %v2616_v30 = vadd.f32 1.0, %v9410_v10  ;;  %v9430_v40 = vmul.f32 0.5, %v7083_v33  ;;  %v2151_v39 = vand.u32 2147483647, %v9408_v47  ;;  %v11868_v51 = vmax.f32 %v9044_v56, 0.0  ;;  %v7734_v22 = vld [vmem:[%s7894_s23 + $0xa8] sm:$0xff] }
 0x458   : > { %v2625_v43 = vadd.f32 1.0, %v9417_v28  ;;  %7541 = vpow2.f32 %v2299_v21  ;;  %3214 = vadd.xlane.f32.xlu0 %v3213_v12  ;;  %v7530_v14 = vpop.eup %7529  ;;  %v9440_v61 = vmul.f32 %v9356_v0, %v2602_v60  ;;  %v2611_v33 = vadd.f32 1.0, %v2610_v6  ;;  %v7735_v6 = vld [vmem:[%s7894_s23 + $0xb0] sm:$0xff] }
 0x459   : > { %11867 = vst [vmem:[#allocation34_spill] sm:$0xff] %v9430_v40  ;;  %v9435_v32 = vadd.f32 %v2570_v46, %v11868_v51  ;;  %v9444_v40 = vmul.f32 %v7734_v22, %v9265_v36  ;;  %v2301_v25 = vmul.f32 1.442695, %v2213_v53  ;;  %v9446_v56 = vpop.eup %7531  ;;  %v2579_v46 = vsel %vm9391_vm15, %v9379_v34, %v2573_v44 }
 0x45a   : > { %vm9451_vm1 = vcmp.lt.f32.partialorder %v2595_v59, 0.0004427343  ;;  %v7085_v12 = vadd.f32 -1.0, %v3830_v18  ;;  %v2214_v51 = vsub.f32 0.0, %v2150_v55  ;;  %v9456_v0 = vadd.f32 %v2032_v9, %v8875_v48  ;;  %v2036_v9 = vpop.f32.mrf.mxu0 }
 0x45b   : > { %v2613_v60 = vand.u32 2147483647, %v9376_v37  ;;  %7543 = vlog2.f32 %v2616_v30  ;;  %v9461_v53 = vmul.f32 %v7735_v6, %v9286_v49  ;;  %v2215_v22 = vsub.f32 0.0, %v2151_v39  ;;  %v7534_v26 = vpop.eup %7533 }
 0x45c   : > { %v2582_v20 = vmul.f32 0.6931472, %v7530_v14  ;;  %7545 = vlog2.f32 %v2625_v43  ;;  %v2152_v34 = vand.u32 2147483647, %v9456_v0  ;;  %v3152_v59 = vsub.f32 %v8947_v5, %v9164_v3  ;;  %v2038_v29 = vpop.f32.mrf.mxu0 }
 0x45d   : > { %v11871_v44 = vmax.f32 %v9068_v16, 0.0  ;;  %v2634_v18 = vadd.f32 1.0, %v9446_v56  ;;  %7547 = vpow2.f32 %v2301_v25  ;;  %v9473_v39 = vmul.f32 %v9376_v37, %v2611_v33 }
 0x45e   : > { %v9475_v14 = vmul.f32 0.5, %v7085_v12  ;;  %v2303_v43 = vmul.f32 1.442695, %v2214_v51  ;;  %v3151_v5 = vsub.f32 %v8938_v23, %v9160_v31  ;;  %v9479_v3 = vpop.eup %7535  ;;  %v2591_v16 = vmul.f32 0.6931472, %v7534_v26 }
 0x45f   : > { %v9468_v55 = vadd.f32 %v2579_v46, %v11871_v44  ;;  %vm9481_vm2 = vcmp.lt.f32.partialorder %v2604_v54, 0.0004427343  ;;  %v2305_v6 = vmul.f32 1.442695, %v2215_v22  ;;  %v2216_v37 = vsub.f32 0.0, %v2152_v34  ;;  %v7736_v22 = vld [vmem:[%s7894_s23 + $0xb8] sm:$0xff] }
 0x460   : > { %11872 = vst [vmem:[#allocation35_spill] sm:$0xff] %v9475_v14  ;;  %v2588_v33 = vsel %vm9424_vm0, %v9404_v45, %v2582_v20  ;;  %v2619_v12 = vmul.f32 -0.5, %v9410_v10  ;;  %v3216_v51 = vadd.f32 %v3152_v59, %v3151_v5  ;;  %v9491_v23 = vadd.f32 %v2036_v9, %v8872_v27  ;;  %v7538_v31 = vpop.eup %7537  ;;  %v7737_v59 = vld [vmem:[%s7894_s23 + $0xc0] sm:$0xff] }
 0x461   : > { %vm9493_vm3 = vcmp.lt.f32.partialorder %v2613_v60, 0.0004427343  ;;  %v2628_v26 = vmul.f32 -0.5, %v9417_v28  ;;  %7549 = vlog2.f32 %v2634_v18  ;;  %v9500_v34 = vmul.f32 %v7736_v22, %v9333_v13 }
 0x462   : > { %v2643_v20 = vadd.f32 1.0, %v9479_v3  ;;  %v9506_v44 = vmul.f32 %v7737_v59, %v9366_v41  ;;  %7551 = vpow2.f32 %v2303_v43  ;;  %3217 = vadd.xlane.f32.xlu1 %v3216_v51  ;;  %v2153_v60 = vand.u32 2147483647, %v9491_v23  ;;  %v7540_v9 = vpop.eup %7539 }
 0x463   : > { %v11878_v18 = vmax.f32 %v9113_v8, 0.0  ;;  %v2597_v22 = vsel %vm9451_vm1, %v9413_v38, %v2591_v16  ;;  %7553 = vpow2.f32 %v2305_v6  ;;  %v2307_v45 = vmul.f32 1.442695, %v2216_v37  ;;  %v2040_v37 = vpop.f32.mrf.mxu0 }
 0x464   : > { %11877 = vst [vmem:[#allocation36_spill] sm:$0xff] %v9506_v44  ;;  %v2600_v25 = vmul.f32 0.6931472, %v7538_v31  ;;  %v2620_v30 = vadd.f32 1.0, %v2619_v12  ;;  %v2622_v59 = vand.u32 2147483647, %v9410_v10  ;;  %v9518_v43 = vadd.f32 %v2038_v29, %v8875_v48 }
 0x465   : > { %v9511_v5 = vadd.f32 %v2588_v33, %v11878_v18  ;;  %v9520_v51 = vpop.eup %7541  ;;  %v2629_v14 = vadd.f32 1.0, %v2628_v26  ;;  %v2631_v8 = vand.u32 2147483647, %v9417_v28  ;;  %v3153_v33 = vsub.f32 %v8954_v42, %v9172_v15 }
 0x466   : > { %v3154_v38 = vsub.f32 %v8964_v19, %v9181_v63  ;;  %v2609_v21 = vmul.f32 0.6931472, %v7540_v9  ;;  %7555 = vlog2.f32 %v2643_v20  ;;  %v2217_v16 = vsub.f32 0.0, %v2153_v60 }
 0x467   : > { %v2154_v6 = vand.u32 2147483647, %v9518_v43  ;;  %v11879_v12 = vmax.f32 %v9138_v24, 0.0  ;;  %v2637_v26 = vmul.f32 -0.5, %v9446_v56  ;;  %7557 = vpow2.f32 %v2307_v45 }
 0x468   : > { %v3219_v29 = vadd.f32 %v3154_v38, %v3153_v33  ;;  %v7544_v18 = vpop.eup %7543  ;;  %v2606_v42 = vsel %vm9481_vm2, %v9440_v61, %v2600_v25  ;;  %vm9536_vm4 = vcmp.lt.f32.partialorder %v2622_v59, 0.0004427343  ;;  %v2646_v15 = vmul.f32 -0.5, %v9479_v3  ;;  %v7738_v33 = vld [vmem:[%s7894_s23 + $0xc8] sm:$0xff] }
 0x469   : > { %v9530_v31 = vadd.f32 %v2597_v22, %v11879_v12  ;;  %v2652_v63 = vadd.f32 1.0, %v9520_v51  ;;  %v7546_v24 = vpop.eup %7545  ;;  %v2621_v20 = vmul.f32 %v9410_v10, %v2620_v30  ;;  %v9544_v45 = vmul.f32 %v9417_v28, %v2629_v14  ;;  %v2042_v28 = vpop.f32.mrf.mxu0 }
 0x46a   : > { %vm9546_vm5 = vcmp.lt.f32.partialorder %v2631_v8, 0.0004427343  ;;  %3220 = vadd.xlane.f32.xlu0 %v3219_v29  ;;  %v9551_v61 = vadd.f32 %v2040_v37, %v8872_v27  ;;  %v9553_v46 = vpop.eup %7547  ;;  %v2615_v25 = vsel %vm9493_vm3, %v9473_v39, %v2609_v21  ;;  %v2640_v9 = vand.u32 2147483647, %v9446_v56 }
 0x46b   : > { %v2309_v10 = vmul.f32 1.442695, %v2217_v16  ;;  %v2218_v30 = vsub.f32 0.0, %v2154_v6  ;;  %v11884_v14 = vmax.f32 %v9184_v2, 0.0  ;;  %v2638_v59 = vadd.f32 1.0, %v2637_v26 }
 0x46c   : > { %v9566_v38 = vmul.f32 %v7738_v33, %v9399_v17  ;;  %v2618_v37 = vmul.f32 0.6931472, %v7544_v18  ;;  %v2647_v12 = vadd.f32 1.0, %v2646_v15  ;;  %7559 = vlog2.f32 %v2652_v63  ;;  %v2046_v15 = vpop.f32.mrf.mxu0 }
 0x46d   : > { %v9561_v22 = vadd.f32 %v2606_v42, %v11884_v14  ;;  %v2155_v39 = vand.u32 2147483647, %v9551_v61  ;;  %v11885_v54 = vmax.f32 %v9194_v11, 0.0  ;;  %v2627_v2 = vmul.f32 0.6931472, %v7546_v24  ;;  %v7739_v24 = vld [vmem:[%s7894_s23 + $0xd0] sm:$0xff] }
 0x46e   : > { %v2649_v16 = vand.u32 2147483647, %v9479_v3  ;;  %v2661_v6 = vadd.f32 1.0, %v9553_v46  ;;  %v7550_v26 = vpop.eup %7549  ;;  %vm9575_vm6 = vcmp.lt.f32.partialorder %v2640_v9, 0.0004427343  ;;  %7561 = vpow2.f32 %v2309_v10 }
 0x46f   : > { %v9571_v21 = vadd.f32 %v2615_v25, %v11885_v54  ;;  %v2311_v18 = vmul.f32 1.442695, %v2218_v30  ;;  %v2219_v42 = vsub.f32 0.0, %v2155_v39  ;;  %v9579_v63 = vpop.eup %7551  ;;  %v2639_v11 = vmul.f32 %v9446_v56, %v2638_v59 }
 0x470   : > { %v9585_v14 = vmul.f32 %v7739_v24, %v9408_v47  ;;  %v9588_v33 = vadd.f32 %v2042_v28, %v8875_v48  ;;  %v9590_v9 = vpop.eup %7553  ;;  %v2624_v10 = vsel %vm9536_vm4, %v2621_v20, %v2618_v37  ;;  %v9595_v30 = vmul.f32 %v9479_v3, %v2647_v12  ;;  %v2048_v12 = vpop.f32.mrf.mxu0 }
 0x471   : > { %v2655_v39 = vmul.f32 -0.5, %v9520_v51  ;;  %v2633_v59 = vsel %vm9546_vm5, %v9544_v45, %v2627_v2  ;;  %vm9602_vm7 = vcmp.lt.f32.partialorder %v2649_v16, 0.0004427343  ;;  %v2658_v28 = vand.u32 2147483647, %v9520_v51  ;;  %v11891_v16 = vld [vmem:[#allocation8_spill] sm:$0xff] }
 0x472   : > { %11888 = vst [vmem:[#allocation37_spill] sm:$0xff] %v9585_v14  ;;  %7563 = vlog2.f32 %v2661_v6  ;;  %v2313_v19 = vmul.f32 1.442695, %v2219_v42  ;;  %v2664_v20 = vmul.f32 -0.5, %v9553_v46  ;;  %v2670_v3 = vadd.f32 1.0, %v9579_v63 }
 0x473   : > { %7565 = vpow2.f32 %v2311_v18  ;;  %v2156_v37 = vand.u32 2147483647, %v9588_v33  ;;  %v7556_v24 = vpop.eup %7555  ;;  %v2636_v60 = vmul.f32 0.6931472, %v7550_v26  ;;  %v2679_v45 = vadd.f32 1.0, %v9590_v9  ;;  %v7740_v26 = vld [vmem:[%s7894_s23 + $0xd8] sm:$0xff] }
 0x474   : > { %v3155_v2 = vsub.f32 %v8972_v4, %v9211_v7  ;;  %v3156_v6 = vsub.f32 %v11891_v16, %v9232_v35  ;;  %v9615_v42 = vpop.eup %7557  ;;  %v2656_v56 = vadd.f32 1.0, %v2655_v39  ;;  %7567 = vpow2.f32 %v2313_v19 }
 0x475   : > { %v2220_v25 = vsub.f32 0.0, %v2156_v37  ;;  %v9618_v18 = vadd.f32 %v2046_v15, %v8872_v27  ;;  %v11892_v8 = vmax.f32 %v9225_v58, 0.0  ;;  %v9626_v44 = vmul.f32 %v7740_v26, %v9456_v0 }
 0x476   : > { %v3222_v4 = vadd.f32 %v3156_v6, %v3155_v2  ;;  %v9629_v7 = vadd.f32 %v2048_v12, %v8875_v48  ;;  %v11893_v35 = vmax.f32 %v9228_v62, 0.0  ;;  %v2645_v19 = vmul.f32 0.6931472, %v7556_v24 }
 0x477   : > { %v9622_v14 = vadd.f32 %v2624_v10, %v11892_v8  ;;  %v2665_v37 = vadd.f32 1.0, %v2664_v20  ;;  %7569 = vlog2.f32 %v2670_v3  ;;  %v2642_v58 = vsel %vm9575_vm6, %v2639_v11, %v2636_v60  ;;  %v2050_v60 = vpop.f32.mrf.mxu0 }
 0x478   : > { %v9633_v39 = vadd.f32 %v2633_v59, %v11893_v35  ;;  %7571 = vlog2.f32 %v2679_v45  ;;  %v2688_v8 = vadd.f32 1.0, %v9615_v42  ;;  %3223 = vadd.xlane.f32.xlu0 %v3222_v4  ;;  %v2157_v15 = vand.u32 2147483647, %v9618_v18 }
 0x479   : > { %v2657_v10 = vmul.f32 %v9520_v51, %v2656_v56  ;;  %vm9640_vm8 = vcmp.lt.f32.partialorder %v2658_v28, 0.0004427343  ;;  %v2667_v62 = vand.u32 2147483647, %v9553_v46  ;;  %v2315_v59 = vmul.f32 1.442695, %v2220_v25  ;;  %v7560_v20 = vpop.eup %7559 }
 0x47a   : > { %v2673_v29 = vmul.f32 -0.5, %v9579_v63  ;;  %v2221_v3 = vsub.f32 0.0, %v2157_v15  ;;  %v2158_v24 = vand.u32 2147483647, %v9629_v7  ;;  %v11896_v45 = vmax.f32 %v9265_v36, 0.0  ;;  %v7741_v28 = vld [vmem:[%s7894_s23 + $0xe0] sm:$0xff] }
 0x47b   : > { %v2651_v56 = vsel %vm9602_vm7, %v9595_v30, %v2645_v19  ;;  %v9656_v25 = vmul.f32 %v9553_v46, %v2665_v37  ;;  %v9660_v2 = vmul.f32 %v7741_v28, %v9491_v23  ;;  %v9662_v16 = vpop.eup %7561  ;;  %v2682_v6 = vmul.f32 -0.5, %v9590_v9  ;;  %v11901_v37 = vld [vmem:[#allocation9_spill] sm:$0xff] }
 0x47c   : > { %v9650_v51 = vadd.f32 %v2642_v58, %v11896_v45  ;;  %7573 = vlog2.f32 %v2688_v8  ;;  %v2317_v26 = vmul.f32 1.442695, %v2221_v3  ;;  %v2222_v36 = vsub.f32 0.0, %v2158_v24  ;;  %v7742_v58 = vld [vmem:[%s7894_s23 + $0xe8] sm:$0xff] }
 0x47d   : > { %11897 = vst [vmem:[#allocation8_spill] sm:$0xff] %v9660_v2  ;;  %v2654_v4 = vmul.f32 0.6931472, %v7560_v20  ;;  %v9668_v30 = vmul.f32 %v7742_v58, %v9518_v43  ;;  %7575 = vpow2.f32 %v2315_v59  ;;  %vm9670_vm9 = vcmp.lt.f32.partialorder %v2667_v62, 0.0004427343  ;;  %v11902_v8 = vld [vmem:[#allocation11_spill] sm:$0xff]  ;;  %v2052_v20 = vpop.f32.mrf.mxu0 }
 0x47e   : > { %v2674_v54 = vadd.f32 1.0, %v2673_v29  ;;  %v2319_v19 = vmul.f32 1.442695, %v2222_v36  ;;  %v3157_v15 = vsub.f32 %v11901_v37, %v9236_v50  ;;  %v3158_v3 = vsub.f32 %v11902_v8, %v9321_v1 }
 0x47f   : > { %11898 = vst [vmem:[#allocation38_spill] sm:$0xff] %v9668_v30  ;;  %v7564_v24 = vpop.eup %7563  ;;  %v11903_v45 = vmax.f32 %v9286_v49, 0.0  ;;  %v2676_v62 = vand.u32 2147483647, %v9579_v63  ;;  %v2685_v59 = vand.u32 2147483647, %v9590_v9  ;;  %7577 = vpow2.f32 %v2317_v26 }
 0x480   : > { %v2697_v29 = vadd.f32 1.0, %v9662_v16  ;;  %v9685_v36 = vpop.eup %7565  ;;  %v2683_v58 = vadd.f32 1.0, %v2682_v6  ;;  %v3225_v50 = vadd.f32 %v3158_v3, %v3157_v15  ;;  %v9688_v1 = vadd.f32 %v2050_v60, %v8872_v27  ;;  %v7743_v26 = vld [vmem:[%s7894_s23 + $0xf0] sm:$0xff] }
 0x481   : > { %v9680_v28 = vadd.f32 %v2651_v56, %v11903_v45  ;;  %v2660_v49 = vsel %vm9640_vm8, %v2657_v10, %v2654_v4  ;;  %v2691_v56 = vmul.f32 -0.5, %v9615_v42  ;;  %7579 = vpow2.f32 %v2319_v19  ;;  %v9696_v8 = vpop.eup %7567  ;;  %v7746_v19 = vld [vmem:[%s7894_s23 + $0x108] sm:$0xff] }
 0x482   : > { %v9694_v37 = vadd.f32 %v2052_v20, %v8875_v48  ;;  %v9699_v45 = vmul.f32 %v9579_v63, %v2674_v54  ;;  %v9704_v60 = vmul.f32 %v7743_v26, %v9551_v61  ;;  %3226 = vadd.xlane.f32.xlu1 %v3225_v50  ;;  %v2159_v10 = vand.u32 2147483647, %v9688_v1  ;;  %v2056_v54 = vpop.f32.mrf.mxu0 }
 0x483   : > { %v2663_v12 = vmul.f32 0.6931472, %v7564_v24  ;;  %vm9707_vm10 = vcmp.lt.f32.partialorder %v2676_v62, 0.0004427343  ;;  %vm9711_vm11 = vcmp.lt.f32.partialorder %v2685_v59, 0.0004427343  ;;  %7581 = vlog2.f32 %v2697_v29 }
 0x484   : > { %11904 = vst [vmem:[#allocation9_spill] sm:$0xff] %v9704_v60  ;;  %v2706_v63 = vadd.f32 1.0, %v9685_v36  ;;  %v7570_v15 = vpop.eup %7569  ;;  %v11909_v3 = vmax.f32 %v9333_v13, 0.0  ;;  %v2684_v50 = vmul.f32 %v9590_v9, %v2683_v58  ;;  %v2694_v24 = vand.u32 2147483647, %v9615_v42  ;;  %v11910_v60 = vld [vmem:[#allocation12_spill] sm:$0xff] }
 0x485   : > { %v7572_v26 = vpop.eup %7571  ;;  %v2692_v59 = vadd.f32 1.0, %v2691_v56  ;;  %v2715_v6 = vadd.f32 1.0, %v9696_v8  ;;  %v2223_v35 = vsub.f32 0.0, %v2159_v10  ;;  %v2160_v29 = vand.u32 2147483647, %v9694_v37 }
 0x486   : > { %v9718_v20 = vadd.f32 %v2660_v49, %v11909_v3  ;;  %v2700_v11 = vmul.f32 -0.5, %v9662_v16  ;;  %v3159_v13 = vsub.f32 %v11910_v60, %v9329_v57  ;;  %v11911_v49 = vld [vmem:[#allocation15_spill] sm:$0xff]  ;;  %v9731_v58 = vadd.f32 %v2056_v54, %v8872_v27  ;;  %v2058_v60 = vpop.f32.mrf.mxu0 }
 0x487   : > { %v3160_v9 = vsub.f32 %v11911_v49, %v9384_v52  ;;  %v2669_v56 = vsel %vm9670_vm9, %v9656_v25, %v2663_v12  ;;  %7583 = vlog2.f32 %v2706_v63  ;;  %v2321_v10 = vmul.f32 1.442695, %v2223_v35  ;;  %v7744_v49 = vld [vmem:[%s7894_s23 + $0xf8] sm:$0xff] }
 0x488   : > { %v2224_v3 = vsub.f32 0.0, %v2160_v29  ;;  %v2672_v62 = vmul.f32 0.6931472, %v7570_v15  ;;  %v2681_v2 = vmul.f32 0.6931472, %v7572_v26  ;;  %v2709_v57 = vmul.f32 -0.5, %v9685_v36 }
 0x489   : > { %vm9736_vm12 = vcmp.lt.f32.partialorder %v2694_v24, 0.0004427343  ;;  %v3228_v52 = vadd.f32 %v3160_v9, %v3159_v13  ;;  %v7574_v54 = vpop.eup %7573  ;;  %7585 = vlog2.f32 %v2715_v6  ;;  %v9743_v46 = vmul.f32 %v7744_v49, %v9588_v33  ;;  %v7745_v13 = vld [vmem:[%s7894_s23 + $0x100] sm:$0xff] }
 0x48a   : > { %v2323_v25 = vmul.f32 1.442695, %v2224_v3  ;;  %v2161_v35 = vand.u32 2147483647, %v9731_v58  ;;  %v9746_v12 = vpop.eup %7575  ;;  %v11915_v63 = vmax.f32 %v9366_v41, 0.0  ;;  %v2693_v24 = vmul.f32 %v9615_v42, %v2692_v59 }
 0x48b   : > { %11914 = vst [vmem:[#allocation11_spill] sm:$0xff] %v9743_v46  ;;  %v2701_v26 = vadd.f32 1.0, %v2700_v11  ;;  %v2703_v29 = vand.u32 2147483647, %v9662_v16  ;;  %3229 = vadd.xlane.f32.xlu0 %v3228_v52  ;;  %v9757_v9 = vmul.f32 %v7745_v13, %v9618_v18  ;;  %7587 = vpow2.f32 %v2321_v10 }
 0x48c   : > { %v9750_v15 = vadd.f32 %v2669_v56, %v11915_v63  ;;  %v2225_v3 = vsub.f32 0.0, %v2161_v35  ;;  %v2678_v41 = vsel %vm9707_vm10, %v9699_v45, %v2672_v62  ;;  %v2687_v42 = vsel %vm9711_vm11, %v2684_v50, %v2681_v2  ;;  %v2060_v56 = vpop.f32.mrf.mxu0  ;;  %v9767_v52 = vpop.eup %7577 }
 0x48d   : > { %11916 = vst [vmem:[#allocation12_spill] sm:$0xff] %v9757_v9  ;;  %v2710_v11 = vadd.f32 1.0, %v2709_v57  ;;  %v9765_v59 = vadd.f32 %v2058_v60, %v8875_v48  ;;  %v2690_v49 = vmul.f32 0.6931472, %v7574_v54  ;;  %v2724_v63 = vadd.f32 1.0, %v9746_v12 }
 0x48e   : > { %7589 = vpow2.f32 %v2323_v25  ;;  %v2325_v10 = vmul.f32 1.442695, %v2225_v3  ;;  %v9770_v35 = vpop.eup %7579  ;;  %v2702_v4 = vmul.f32 %v9662_v16, %v2701_v26  ;;  %vm9773_vm13 = vcmp.lt.f32.partialorder %v2703_v29, 0.0004427343  ;;  %v2062_v3 = vpop.f32.mrf.mxu0 }
 0x48f   : > { %v9780_v50 = vmul.f32 %v7746_v19, %v9629_v7  ;;  %v11920_v62 = vmax.f32 %v9399_v17, 0.0  ;;  %v11921_v60 = vmax.f32 %v9408_v47, 0.0  ;;  %v2712_v16 = vand.u32 2147483647, %v9685_v36  ;;  %v11922_v19 = vld [vmem:[#allocation33_spill] sm:$0xff] }
 0x490   : > { %7591 = vpow2.f32 %v2325_v10  ;;  %v7582_v25 = vpop.eup %7581  ;;  %v9792_v26 = vmul.f32 %v9685_v36, %v2710_v11  ;;  %v2718_v29 = vmul.f32 -0.5, %v9696_v8  ;;  %v2733_v13 = vadd.f32 1.0, %v9767_v52  ;;  %v11923_v36 = vld [vmem:[#allocation16_spill] sm:$0xff] }
 0x491   : > { %11919 = vst [vmem:[#allocation15_spill] sm:$0xff] %v9780_v50  ;;  %v9784_v57 = vadd.f32 %v2678_v41, %v11920_v62  ;;  %v9788_v54 = vadd.f32 %v2687_v42, %v11921_v60  ;;  %v2162_v17 = vand.u32 2147483647, %v9765_v59  ;;  %v2696_v47 = vsel %vm9736_vm12, %v2693_v24, %v2690_v49  ;;  %v11924_v62 = vld [vmem:[#allocation19_spill] sm:$0xff]  ;;  %v7747_v24 = vld [vmem:[%s7894_s23 + $0x110] sm:$0xff] }
 0x492   : > { %v2721_v41 = vand.u32 2147483647, %v9696_v8  ;;  %7593 = vlog2.f32 %v2724_v63  ;;  %v2742_v42 = vadd.f32 1.0, %v9770_v35  ;;  %v3161_v11 = vsub.f32 %v11923_v36, %v11922_v19 }
 0x493   : > { %v2226_v10 = vsub.f32 0.0, %v2162_v17  ;;  %v3162_v60 = vsub.f32 %v11924_v62, %v9435_v32  ;;  %v9806_v2 = vadd.f32 %v2060_v56, %v8872_v27  ;;  %v2699_v6 = vmul.f32 0.6931472, %v7582_v25 }
 0x494   : > { %vm9808_vm14 = vcmp.lt.f32.partialorder %v2712_v16, 0.0004427343  ;;  %v9815_v49 = vmul.f32 %v7747_v24, %v9688_v1  ;;  %v9818_v63 = vadd.f32 %v2062_v3, %v8875_v48  ;;  %v7584_v17 = vpop.eup %7583  ;;  %7595 = vlog2.f32 %v2733_v13 }
 0x495   : > { %v2327_v32 = vmul.f32 1.442695, %v2226_v10  ;;  %v3231_v19 = vadd.f32 %v3162_v60, %v3161_v11  ;;  %v2163_v56 = vand.u32 2147483647, %v9806_v2  ;;  %v11928_v16 = vmax.f32 %v9456_v0, 0.0 }
 0x496   : > { %11927 = vst [vmem:[#allocation33_spill] sm:$0xff] %v9815_v49  ;;  %v2719_v36 = vadd.f32 1.0, %v2718_v29  ;;  %vm9825_vm15 = vcmp.lt.f32.partialorder %v2721_v41, 0.0004427343  ;;  %v7586_v30 = vpop.eup %7585  ;;  %v2727_v3 = vmul.f32 -0.5, %v9746_v12  ;;  %7597 = vlog2.f32 %v2742_v42  ;;  %v2066_v41 = vpop.f32.mrf.mxu1  ;;  %v11931_v42 = vld [vmem:[#allocation23_spill] sm:$0xff] }
 0x497   : > { %v9823_v25 = vadd.f32 %v2696_v47, %v11928_v16  ;;  %3232 = vadd.xlane.f32.xlu1 %v3231_v19  ;;  %v2227_v13 = vsub.f32 0.0, %v2163_v56  ;;  %v2164_v10 = vand.u32 2147483647, %v9818_v63  ;;  %v2705_v0 = vsel %vm9773_vm13, %v2702_v4, %v2699_v6  ;;  %v7748_v6 = vld [vmem:[%s7894_s23 + $0x118] sm:$0xff] }
 0x498   : > { %v2708_v47 = vmul.f32 0.6931472, %v7584_v17  ;;  %v2736_v29 = vmul.f32 -0.5, %v9767_v52  ;;  %7599 = vpow2.f32 %v2327_v32  ;;  %v9835_v11 = vpop.eup %7587  ;;  %v2745_v60 = vmul.f32 -0.5, %v9770_v35 }
 0x499   : > { %v2329_v16 = vmul.f32 1.442695, %v2227_v13  ;;  %v2228_v24 = vsub.f32 0.0, %v2164_v10  ;;  %v3164_v19 = vsub.f32 %v11931_v42, %v9511_v5  ;;  %v2717_v56 = vmul.f32 0.6931472, %v7586_v30  ;;  %v11934_v5 = vld [vmem:[#allocation20_spill] sm:$0xff] }
 0x49a   : > { %v2720_v49 = vmul.f32 %v9696_v8, %v2719_v36  ;;  %v2730_v45 = vand.u32 2147483647, %v9746_v12  ;;  %v9844_v4 = vmul.f32 %v7748_v6, %v9694_v37  ;;  %v11933_v32 = vmax.f32 %v9491_v23, 0.0 }
 0x49b   : > { %v9846_v17 = vpop.eup %7589  ;;  %v2728_v13 = vadd.f32 1.0, %v2727_v3  ;;  %v3163_v30 = vsub.f32 %v11934_v5, %v9468_v55  ;;  %v2737_v42 = vadd.f32 1.0, %v2736_v29  ;;  %v2739_v8 = vand.u32 2147483647, %v9767_v52 }
 0x49c   : > { %11932 = vst [vmem:[#allocation16_spill] sm:$0xff] %v9844_v4  ;;  %v9850_v50 = vadd.f32 %v2705_v0, %v11933_v32  ;;  %v2751_v36 = vadd.f32 1.0, %v9835_v11  ;;  %v2331_v6 = vmul.f32 1.442695, %v2228_v24  ;;  %v2068_v4 = vpop.f32.mrf.mxu1  ;;  %v2714_v23 = vsel %vm9808_vm14, %v9792_v26, %v2708_v47  ;;  %v7749_v26 = vld [vmem:[%s7894_s23 + $0x120] sm:$0xff] }
 0x49d   : > { %v9857_v46 = vpop.eup %7591  ;;  %v2746_v3 = vadd.f32 1.0, %v2745_v60  ;;  %7601 = vpow2.f32 %v2329_v16  ;;  %v3234_v0 = vadd.f32 %v3164_v19, %v3163_v30  ;;  %v2723_v55 = vsel %vm9825_vm15, %v2720_v49, %v2717_v56  ;;  %v7751_v49 = vld [vmem:[%s7894_s23 + $0x130] sm:$0xff] }
 0x49e   : > { %vm9864_vm0 = vcmp.lt.f32.partialorder %v2730_v45, 0.0004427343  ;;  %v2748_v32 = vand.u32 2147483647, %v9770_v35  ;;  %v2760_v24 = vadd.f32 1.0, %v9846_v17  ;;  %7603 = vpow2.f32 %v2331_v6  ;;  %v2070_v45 = vpop.f32.mrf.mxu1 }
 0x49f   : > { %v7594_v5 = vpop.eup %7593  ;;  %v9871_v9 = vmul.f32 %v9746_v12, %v2728_v13  ;;  %v9875_v47 = vmul.f32 %v7749_v26, %v9731_v58  ;;  %3235 = vadd.xlane.f32.xlu0 %v3234_v0  ;;  %v9879_v62 = vadd.f32 %v2066_v41, %v8872_v27  ;;  %v11938_v60 = vmax.f32 %v9518_v43, 0.0  ;;  %v7750_v43 = vld [vmem:[%s7894_s23 + $0x128] sm:$0xff] }
 0x4a0   : > { %v2738_v19 = vmul.f32 %v9767_v52, %v2737_v42  ;;  %vm9886_vm1 = vcmp.lt.f32.partialorder %v2739_v8, 0.0004427343  ;;  %7605 = vlog2.f32 %v2751_v36  ;;  %v2769_v12 = vadd.f32 1.0, %v9857_v46  ;;  %v11946_v0 = vld [vmem:[#allocation27_spill] sm:$0xff] }
 0x4a1   : > { %11937 = vst [vmem:[#allocation19_spill] sm:$0xff] %v9875_v47  ;;  %v9883_v16 = vadd.f32 %v2714_v23, %v11938_v60  ;;  %v11941_v13 = vmax.f32 %v9551_v61, 0.0  ;;  %v9896_v41 = vmul.f32 %v9770_v35, %v2746_v3  ;;  %v9900_v6 = vmul.f32 %v7750_v43, %v9765_v59  ;;  %v7596_v42 = vpop.eup %7595 }
 0x4a2   : > { %v2165_v52 = vand.u32 2147483647, %v9879_v62  ;;  %v2726_v8 = vmul.f32 0.6931472, %v7594_v5  ;;  %vm9903_vm2 = vcmp.lt.f32.partialorder %v2748_v32, 0.0004427343  ;;  %7607 = vlog2.f32 %v2760_v24 }
 0x4a3   : > { %v9893_v30 = vadd.f32 %v2723_v55, %v11941_v13  ;;  %11943 = vst [vmem:[#allocation20_spill] sm:$0xff] %v9900_v6  ;;  %v2754_v61 = vmul.f32 -0.5, %v9835_v11  ;;  %v9909_v23 = vadd.f32 %v2068_v4, %v8875_v48  ;;  %v2763_v35 = vmul.f32 -0.5, %v9846_v17  ;;  %v7598_v32 = vpop.eup %7597  ;;  %v11947_v24 = vld [vmem:[#allocation24_spill] sm:$0xff] }
 0x4a4   : > { %v2229_v3 = vsub.f32 0.0, %v2165_v52  ;;  %v3166_v55 = vsub.f32 %v11946_v0, %v9561_v22  ;;  %v9915_v26 = vadd.f32 %v2070_v45, %v8872_v27  ;;  %7609 = vlog2.f32 %v2769_v12  ;;  %v2072_v0 = vpop.f32.mrf.mxu1 }
 0x4a5   : > { %11942 = vst [vmem:[#allocation23_spill] sm:$0xff] %v9893_v30  ;;  %v2166_v60 = vand.u32 2147483647, %v9909_v23  ;;  %v3165_v13 = vsub.f32 %v11947_v24, %v9530_v31  ;;  %v9921_v4 = vpop.eup %7599  ;;  %v2735_v43 = vmul.f32 0.6931472, %v7596_v42  ;;  %v9926_v22 = vmul.f32 %v7751_v49, %v9806_v2 }
 0x4a6   : > { %v2757_v52 = vand.u32 2147483647, %v9835_v11  ;;  %v2333_v45 = vmul.f32 1.442695, %v2229_v3  ;;  %v2772_v12 = vmul.f32 -0.5, %v9857_v46  ;;  %v2732_v31 = vsel %vm9864_vm0, %v9871_v9, %v2726_v8  ;;  %v2076_v9 = vpop.f32.mrf.mxu1 }
 0x4a7   : > { %11948 = vst [vmem:[#allocation27_spill] sm:$0xff] %v9926_v22  ;;  %v2230_v10 = vsub.f32 0.0, %v2166_v60  ;;  %v3237_v5 = vadd.f32 %v3166_v55, %v3165_v13  ;;  %v2167_v47 = vand.u32 2147483647, %v9915_v26  ;;  %v2744_v42 = vmul.f32 0.6931472, %v7598_v32 }
 0x4a8   : > { %v2755_v24 = vadd.f32 1.0, %v2754_v61  ;;  %v2764_v6 = vadd.f32 1.0, %v2763_v35  ;;  %v2778_v30 = vadd.f32 1.0, %v9921_v4  ;;  %7611 = vpow2.f32 %v2333_v45  ;;  %v7752_v35 = vld [vmem:[%s7894_s23 + $0x138] sm:$0xff] }
 0x4a9   : > { %v2335_v49 = vmul.f32 1.442695, %v2230_v10  ;;  %3238 = vadd.xlane.f32.xlu1 %v3237_v5  ;;  %v2231_v3 = vsub.f32 0.0, %v2167_v47  ;;  %v2741_v60 = vsel %vm9886_vm1, %v2738_v19, %v2735_v43  ;;  %v2766_v55 = vand.u32 2147483647, %v9846_v17 }
 0x4aa   : > { %v9939_v29 = vadd.f32 %v2072_v0, %v8875_v48  ;;  %v9941_v8 = vpop.eup %7601  ;;  %v2773_v61 = vadd.f32 1.0, %v2772_v12  ;;  %v9945_v32 = vmul.f32 %v7752_v35, %v9818_v63  ;;  %v11950_v19 = vmax.f32 %v9588_v33, 0.0 }
 0x4ab   : > { %7613 = vpow2.f32 %v2335_v49  ;;  %v2337_v10 = vmul.f32 1.442695, %v2231_v3  ;;  %v9947_v47 = vpop.eup %7603  ;;  %v2750_v5 = vsel %vm9903_vm2, %v9896_v41, %v2744_v42  ;;  %v9957_v43 = vmul.f32 %v9835_v11, %v2755_v24  ;;  %v2078_v42 = vpop.f32.mrf.mxu1  ;;  %v7753_v3 = vld [vmem:[%s7894_s23 + $0x140] sm:$0xff]  ;;  %v7755_v49 = vld [vmem:[%s7894_s23 + $0x150] sm:$0xff] }
 0x4ac   : > { %11949 = vst [vmem:[#allocation24_spill] sm:$0xff] %v9945_v32  ;;  %v9951_v56 = vadd.f32 %v2732_v31, %v11950_v19  ;;  %v2775_v45 = vand.u32 2147483647, %v9857_v46  ;;  %v11951_v0 = vmax.f32 %v9618_v18, 0.0  ;;  %vm9964_vm3 = vcmp.lt.f32.partialorder %v2757_v52, 0.0004427343 }
 0x4ad   : > { %v9969_v33 = vmul.f32 %v9846_v17, %v2764_v6  ;;  %7615 = vlog2.f32 %v2778_v30  ;;  %v2781_v41 = vmul.f32 -0.5, %v9921_v4  ;;  %v7606_v36 = vpop.eup %7605  ;;  %vm9972_vm4 = vcmp.lt.f32.partialorder %v2766_v55, 0.0004427343  ;;  %v2080_v32 = vpop.f32.mrf.mxu1 }
 0x4ae   : > { %v9962_v12 = vadd.f32 %v2741_v60, %v11951_v0  ;;  %v2787_v18 = vadd.f32 1.0, %v9941_v8  ;;  %7617 = vpow2.f32 %v2337_v10  ;;  %v2168_v52 = vand.u32 2147483647, %v9939_v29 }
 0x4af   : > { %v11956_v24 = vmax.f32 %v9629_v7, 0.0  ;;  %v9984_v30 = vmul.f32 %v9857_v46, %v2773_v61  ;;  %v2796_v6 = vadd.f32 1.0, %v9947_v47  ;;  %v9989_v60 = vmul.f32 %v7753_v3, %v9879_v62  ;;  %v7608_v55 = vpop.eup %7607  ;;  %v11960_v7 = vld [vmem:[#allocation28_spill] sm:$0xff]  ;;  %v11961_v46 = vld [vmem:[#allocation31_spill] sm:$0xff]  ;;  %v2082_v11 = vpop.f32.mrf.mxu1 }
 0x4b0   : > { %vm9991_vm5 = vcmp.lt.f32.partialorder %v2775_v45, 0.0004427343  ;;  %v2784_v10 = vand.u32 2147483647, %v9921_v4  ;;  %v2232_v19 = vsub.f32 0.0, %v2168_v52  ;;  %v3168_v61 = vsub.f32 %v11961_v46, %v9622_v14 }
 0x4b1   : > { %v9981_v17 = vadd.f32 %v2750_v5, %v11956_v24  ;;  %11957 = vst [vmem:[#allocation39_spill] sm:$0xff] %v9989_v60  ;;  %v3167_v5 = vsub.f32 %v11960_v7, %v9571_v21  ;;  %v2753_v0 = vmul.f32 0.6931472, %v7606_v36  ;;  %v2782_v24 = vadd.f32 1.0, %v2781_v41  ;;  %v7610_v45 = vpop.eup %7609  ;;  %v11962_v41 = vld [vmem:[#allocation32_spill] sm:$0xff] }
 0x4b2   : > { %v10001_v31 = vadd.f32 %v2076_v9, %v8872_v27  ;;  %v10004_v3 = vadd.f32 %v2078_v42, %v8875_v48  ;;  %7619 = vlog2.f32 %v2787_v18  ;;  %v2790_v13 = vmul.f32 -0.5, %v9941_v8 }
 0x4b3   : > { %v2339_v60 = vmul.f32 1.442695, %v2232_v19  ;;  %v3240_v52 = vadd.f32 %v3168_v61, %v3167_v5  ;;  %v2762_v22 = vmul.f32 0.6931472, %v7608_v55  ;;  %7621 = vlog2.f32 %v2796_v6 }
 0x4b4   : > { %v2169_v21 = vand.u32 2147483647, %v10001_v31  ;;  %v2170_v14 = vand.u32 2147483647, %v10004_v3  ;;  %v2799_v9 = vmul.f32 -0.5, %v9947_v47  ;;  %v3169_v36 = vsub.f32 %v11962_v41, %v9633_v39 }
 0x4b5   : > { %7623 = vpow2.f32 %v2339_v60  ;;  %3241 = vadd.xlane.f32.xlu0 %v3240_v52  ;;  %v3170_v18 = vsub.f32 %v9444_v40, %v9650_v51  ;;  %v2771_v42 = vmul.f32 0.6931472, %v7610_v45  ;;  %v10016_v6 = vadd.f32 %v2080_v32, %v8872_v27  ;;  %v10018_v7 = vpop.eup %7611  ;;  %v7754_v51 = vld [vmem:[%s7894_s23 + $0x148] sm:$0xff] }
 0x4b6   : > { %v2233_v55 = vsub.f32 0.0, %v2169_v21  ;;  %v2759_v60 = vsel %vm9964_vm3, %v9957_v43, %v2753_v0  ;;  %v2791_v5 = vadd.f32 1.0, %v2790_v13  ;;  %v2234_v46 = vsub.f32 0.0, %v2170_v14 }
 0x4b7   : > { %v3243_v39 = vadd.f32 %v3170_v18, %v3169_v36  ;;  %v2768_v40 = vsel %vm9972_vm4, %v9969_v33, %v2762_v22  ;;  %v10028_v61 = vmul.f32 %v7754_v51, %v9909_v23  ;;  %v10034_v21 = vmul.f32 %v9921_v4, %v2782_v24  ;;  %v2086_v51 = vpop.f32.mrf.mxu1 }
 0x4b8   : > { %v2341_v45 = vmul.f32 1.442695, %v2233_v55  ;;  %v10031_v52 = vpop.eup %7613  ;;  %vm10036_vm6 = vcmp.lt.f32.partialorder %v2784_v10, 0.0004427343  ;;  %v2800_v43 = vadd.f32 1.0, %v2799_v9  ;;  %v10042_v22 = vmul.f32 %v7755_v49, %v9915_v26 }
 0x4b9   : > { %3244 = vadd.xlane.f32.xlu1 %v3243_v39  ;;  %v2171_v33 = vand.u32 2147483647, %v10016_v6  ;;  %v11965_v0 = vmax.f32 %v9688_v1, 0.0  ;;  %v2777_v4 = vsel %vm9991_vm5, %v9984_v30, %v2771_v42  ;;  %v2793_v10 = vand.u32 2147483647, %v9941_v8 }
 0x4ba   : > { %v2805_v24 = vadd.f32 1.0, %v10018_v7  ;;  %v7616_v9 = vpop.eup %7615  ;;  %v11966_v41 = vmax.f32 %v9694_v37, 0.0  ;;  %v10059_v18 = vmul.f32 %v9941_v8, %v2791_v5  ;;  %v2802_v1 = vand.u32 2147483647, %v9947_v47 }
 0x4bb   : > { %v10047_v14 = vadd.f32 %v2759_v60, %v11965_v0  ;;  %v2343_v55 = vmul.f32 1.442695, %v2234_v46  ;;  %v10062_v60 = vpop.eup %7617  ;;  %v2814_v30 = vadd.f32 1.0, %v10031_v52  ;;  %7625 = vpow2.f32 %v2341_v45  ;;  %v7756_v46 = vld [vmem:[%s7894_s23 + $0x158] sm:$0xff] }
 0x4bc   : > { %v10056_v36 = vadd.f32 %v2768_v40, %v11966_v41  ;;  %v2235_v35 = vsub.f32 0.0, %v2171_v33  ;;  %v10066_v42 = vadd.f32 %v2082_v11, %v8875_v48  ;;  %v11967_v37 = vmax.f32 %v9731_v58, 0.0  ;;  %v7757_v33 = vld [vmem:[%s7894_s23 + $0x160] sm:$0xff] }
 0x4bd   : > { %v10073_v8 = vmul.f32 %v9947_v47, %v2800_v43  ;;  %v10078_v40 = vmul.f32 %v7756_v46, %v9939_v29  ;;  %v2780_v49 = vmul.f32 0.6931472, %v7616_v9  ;;  %vm10080_vm7 = vcmp.lt.f32.partialorder %v2793_v10, 0.0004427343 }
 0x4be   : > { %v10070_v39 = vadd.f32 %v2777_v4, %v11967_v37  ;;  %7627 = vlog2.f32 %v2805_v24  ;;  %v2823_v58 = vadd.f32 1.0, %v10062_v60  ;;  %v3172_v47 = vsub.f32 %v9500_v34, %v9718_v20 }
 0x4bf   : > { %v10090_v11 = vmul.f32 %v7757_v33, %v10001_v31  ;;  %7629 = vpow2.f32 %v2343_v55  ;;  %v2345_v0 = vmul.f32 1.442695, %v2235_v35  ;;  %v7620_v4 = vpop.eup %7619  ;;  %vm10092_vm8 = vcmp.lt.f32.partialorder %v2802_v1, 0.0004427343  ;;  %v7758_v55 = vld [vmem:[%s7894_s23 + $0x168] sm:$0xff]  ;;  %v2088_v1 = vpop.f32.mrf.mxu1 }
 0x4c0   : > { %7631 = vlog2.f32 %v2814_v30  ;;  %v2172_v9 = vand.u32 2147483647, %v10066_v42  ;;  %v3171_v34 = vsub.f32 %v9461_v53, %v9680_v28  ;;  %v7622_v20 = vpop.eup %7621  ;;  %v2808_v41 = vmul.f32 -0.5, %v10018_v7 }
 0x4c1   : > { %v2811_v37 = vand.u32 2147483647, %v10018_v7  ;;  %v10104_v35 = vmul.f32 %v7758_v55, %v10004_v3  ;;  %7633 = vpow2.f32 %v2345_v0  ;;  %v2786_v30 = vsel %vm10036_vm6, %v10034_v21, %v2780_v49 }
 0x4c2   : > { %v10106_v46 = vpop.eup %7623  ;;  %7635 = vlog2.f32 %v2823_v58  ;;  %v2236_v33 = vsub.f32 0.0, %v2172_v9  ;;  %v3246_v53 = vadd.f32 %v3172_v47, %v3171_v34  ;;  %v2789_v28 = vmul.f32 0.6931472, %v7620_v4 }
 0x4c3   : > { %v2832_v24 = vadd.f32 1.0, %v10106_v46  ;;  %v10114_v5 = vadd.f32 %v2086_v51, %v8872_v27  ;;  %v2817_v0 = vmul.f32 -0.5, %v10031_v52  ;;  %v10118_v32 = vadd.f32 %v2088_v1, %v8875_v48  ;;  %v2090_v51 = vpop.f32.mrf.mxu1  ;;  %v11973_v1 = vld [vmem:[#allocation36_spill] sm:$0xff] }
 0x4c4   : > { %v2347_v55 = vmul.f32 1.442695, %v2236_v33  ;;  %3247 = vadd.xlane.f32.xlu0 %v3246_v53  ;;  %v3174_v21 = vsub.f32 %v9566_v38, %v9784_v57  ;;  %v11972_v13 = vmax.f32 %v9765_v59, 0.0  ;;  %v2798_v58 = vmul.f32 0.6931472, %v7622_v20 }
 0x4c5   : > { %v2809_v47 = vadd.f32 1.0, %v2808_v41  ;;  %v2173_v4 = vand.u32 2147483647, %v10114_v5  ;;  %v2826_v9 = vmul.f32 -0.5, %v10062_v60  ;;  %v2174_v34 = vand.u32 2147483647, %v10118_v32 }
 0x4c6   : > { %v10124_v49 = vadd.f32 %v2786_v30, %v11972_v13  ;;  %7637 = vpow2.f32 %v2347_v55  ;;  %v3173_v33 = vsub.f32 %v11973_v1, %v9750_v15  ;;  %v2795_v38 = vsel %vm10080_vm7, %v10059_v18, %v2789_v28 }
 0x4c7   : > { %v2820_v59 = vand.u32 2147483647, %v10031_v52  ;;  %7639 = vlog2.f32 %v2832_v24  ;;  %v2237_v57 = vsub.f32 0.0, %v2173_v4  ;;  %v2818_v20 = vadd.f32 1.0, %v2817_v0 }
 0x4c8   : > { %v2238_v41 = vsub.f32 0.0, %v2174_v34  ;;  %v3249_v30 = vadd.f32 %v3174_v21, %v3173_v33  ;;  %v10136_v53 = vadd.f32 %v2090_v51, %v8872_v27  ;;  %v10138_v55 = vpop.eup %7625  ;;  %v2804_v15 = vsel %vm10092_vm8, %v10073_v8, %v2798_v58  ;;  %v7759_v8 = vld [vmem:[%s7894_s23 + $0x170] sm:$0xff] }
 0x4c9   : > { %v2829_v45 = vand.u32 2147483647, %v10062_v60  ;;  %v2835_v18 = vmul.f32 -0.5, %v10106_v46  ;;  %v2349_v28 = vmul.f32 1.442695, %v2237_v57  ;;  %v10146_v24 = vmul.f32 %v10018_v7, %v2809_v47 }
 0x4ca   : > { %vm10148_vm9 = vcmp.lt.f32.partialorder %v2811_v37, 0.0004427343  ;;  %v2827_v21 = vadd.f32 1.0, %v2826_v9  ;;  %v2841_v13 = vadd.f32 1.0, %v10138_v55  ;;  %3250 = vadd.xlane.f32.xlu1 %v3249_v30  ;;  %vm10153_vm10 = vcmp.lt.f32.partialorder %v2820_v59, 0.0004427343  ;;  %v2092_v59 = vpop.f32.mrf.mxu1 }
 0x4cb   : > { %v7628_v4 = vpop.eup %7627  ;;  %v10159_v58 = vmul.f32 %v7759_v8, %v10016_v6  ;;  %7641 = vpow2.f32 %v2349_v28  ;;  %v2351_v7 = vmul.f32 1.442695, %v2238_v41  ;;  %v11979_v47 = vmax.f32 %v9806_v2, 0.0 }
 0x4cc   : > { %v10161_v37 = vpop.eup %7629  ;;  %v11980_v9 = vmax.f32 %v9818_v63, 0.0  ;;  %v10172_v1 = vmul.f32 %v10031_v52, %v2818_v20  ;;  %v2175_v33 = vand.u32 2147483647, %v10136_v53  ;;  %vm10175_vm11 = vcmp.lt.f32.partialorder %v2829_v45, 0.0004427343  ;;  %v7760_v20 = vld [vmem:[%s7894_s23 + $0x178] sm:$0xff] }
 0x4cd   : > { %11978 = vst [vmem:[#allocation28_spill] sm:$0xff] %v10159_v58  ;;  %v10165_v51 = vadd.f32 %v2795_v38, %v11979_v47  ;;  %v7632_v57 = vpop.eup %7631  ;;  %v2836_v30 = vadd.f32 1.0, %v2835_v18  ;;  %7643 = vlog2.f32 %v2841_v13  ;;  %v2850_v2 = vadd.f32 1.0, %v10161_v37  ;;  %v2096_v38 = vpop.f32.mrf.mxu1 }
 0x4ce   : > { %v10169_v34 = vadd.f32 %v2804_v15, %v11980_v9  ;;  %v10181_v63 = vpop.eup %7633  ;;  %v2828_v15 = vmul.f32 %v10062_v60, %v2827_v21  ;;  %v2838_v52 = vand.u32 2147483647, %v10106_v46  ;;  %v10187_v28 = vmul.f32 %v7760_v20, %v10066_v42 }
 0x4cf   : > { %7645 = vpow2.f32 %v2351_v7  ;;  %v7636_v45 = vpop.eup %7635  ;;  %v2807_v8 = vmul.f32 0.6931472, %v7628_v4  ;;  %v2844_v18 = vmul.f32 -0.5, %v10138_v55  ;;  %v10192_v47 = vadd.f32 %v2092_v59, %v8875_v48  ;;  %v7761_v7 = vld [vmem:[%s7894_s23 + $0x180] sm:$0xff] }
 0x4d0   : > { %11983 = vst [vmem:[#allocation31_spill] sm:$0xff] %v10187_v28  ;;  %v2816_v9 = vmul.f32 0.6931472, %v7632_v57  ;;  %7647 = vlog2.f32 %v2850_v2  ;;  %v2859_v60 = vadd.f32 1.0, %v10181_v63  ;;  %v2239_v21 = vsub.f32 0.0, %v2175_v33  ;;  %v7762_v2 = vld [vmem:[%s7894_s23 + $0x188] sm:$0xff] }
 0x4d1   : > { %v10196_v20 = vmul.f32 %v10106_v46, %v2836_v30  ;;  %v10200_v4 = vmul.f32 %v7761_v7, %v10114_v5  ;;  %v3176_v13 = vsub.f32 %v9626_v44, %v9823_v25  ;;  %v2825_v59 = vmul.f32 0.6931472, %v7636_v45 }
 0x4d2   : > { %vm10205_vm12 = vcmp.lt.f32.partialorder %v2838_v52, 0.0004427343  ;;  %v2853_v33 = vmul.f32 -0.5, %v10161_v37  ;;  %v10212_v46 = vmul.f32 %v7762_v2, %v10118_v32  ;;  %v2353_v30 = vmul.f32 1.442695, %v2239_v21  ;;  %v11988_v52 = vld [vmem:[#allocation37_spill] sm:$0xff] }
 0x4d3   : > { %11984 = vst [vmem:[#allocation32_spill] sm:$0xff] %v10200_v4  ;;  %v10214_v19 = vpop.eup %7637  ;;  %v2813_v7 = vsel %vm10148_vm9, %v10146_v24, %v2807_v8  ;;  %v2847_v44 = vand.u32 2147483647, %v10138_v55  ;;  %v2176_v25 = vand.u32 2147483647, %v10192_v47  ;;  %v3175_v45 = vsub.f32 %v11988_v52, %v9788_v54  ;;  %v2098_v4 = vpop.f32.mrf.mxu1 }
 0x4d4   : > { %11987 = vst [vmem:[#allocation36_spill] sm:$0xff] %v10212_v46  ;;  %v7640_v43 = vpop.eup %7639  ;;  %v2822_v2 = vsel %vm10153_vm10, %v10172_v1, %v2816_v9  ;;  %v2845_v46 = vadd.f32 1.0, %v2844_v18  ;;  %7649 = vlog2.f32 %v2859_v60  ;;  %v2868_v21 = vadd.f32 1.0, %v10214_v19 }
 0x4d5   : > { %v2856_v0 = vand.u32 2147483647, %v10161_v37  ;;  %7651 = vpow2.f32 %v2353_v30  ;;  %v2240_v24 = vsub.f32 0.0, %v2176_v25  ;;  %v3252_v8 = vadd.f32 %v3176_v13, %v3175_v45  ;;  %v2100_v30 = vpop.f32.mrf.mxu1  ;;  %v12010_v45 = vld [vmem:[#allocation23_spill] sm:$0xff] }
 0x4d6   : > { %v2831_v28 = vsel %vm10175_vm11, %v2828_v15, %v2825_v59  ;;  %v2854_v58 = vadd.f32 1.0, %v2853_v33  ;;  %v2862_v54 = vmul.f32 -0.5, %v10181_v63  ;;  %7653 = vlog2.f32 %v2868_v21 }
 0x4d7   : > { %v2834_v52 = vmul.f32 0.6931472, %v7640_v43  ;;  %v2355_v10 = vmul.f32 1.442695, %v2240_v24  ;;  %3253 = vadd.xlane.f32.xlu0 %v3252_v8  ;;  %v10232_v1 = vadd.f32 %v2096_v38, %v8872_v27  ;;  %v10235_v18 = vadd.f32 %v2098_v4, %v8875_v48 }
 0x4d8   : > { %v10237_v9 = vpop.eup %7641  ;;  %v11989_v13 = vmax.f32 %v9879_v62, 0.0  ;;  %v11990_v41 = vmax.f32 %v9909_v23, 0.0  ;;  %v10248_v43 = vmul.f32 %v10138_v55, %v2845_v46  ;;  %v2871_v59 = vmul.f32 -0.5, %v10214_v19 }
 0x4d9   : > { %v11991_v38 = vmax.f32 %v9915_v26, 0.0  ;;  %vm10255_vm13 = vcmp.lt.f32.partialorder %v2847_v44, 0.0004427343  ;;  %v2865_v62 = vand.u32 2147483647, %v10181_v63  ;;  %v2877_v23 = vadd.f32 1.0, %v10237_v9 }
 0x4da   : > { %v10241_v60 = vadd.f32 %v2813_v7, %v11989_v13  ;;  %v10245_v15 = vadd.f32 %v2822_v2, %v11990_v41  ;;  %7655 = vpow2.f32 %v2355_v10  ;;  %v7644_v7 = vpop.eup %7643  ;;  %v10262_v55 = vmul.f32 %v10161_v37, %v2854_v58  ;;  %v7763_v2 = vld [vmem:[%s7894_s23 + $0x190] sm:$0xff]  ;;  %v11998_v10 = vld [vmem:[#allocation38_spill] sm:$0xff] }
 0x4db   : > { %v10253_v4 = vadd.f32 %v2831_v28, %v11991_v38  ;;  %v2863_v46 = vadd.f32 1.0, %v2862_v54  ;;  %v2177_v28 = vand.u32 2147483647, %v10232_v1  ;;  %v2840_v25 = vsel %vm10205_vm12, %v10196_v20, %v2834_v52  ;;  %v7764_v20 = vld [vmem:[%s7894_s23 + $0x198] sm:$0xff]  ;;  %v2102_v38 = vpop.f32.mrf.mxu1 }
 0x4dc   : > { %v10266_v44 = vpop.eup %7645  ;;  %vm10271_vm14 = vcmp.lt.f32.partialorder %v2856_v0, 0.0004427343  ;;  %7657 = vlog2.f32 %v2877_v23  ;;  %v10277_v58 = vmul.f32 %v7763_v2, %v10136_v53  ;;  %v2178_v37 = vand.u32 2147483647, %v10235_v18 }
 0x4dd   : > { %v2872_v21 = vadd.f32 1.0, %v2871_v59  ;;  %v2874_v24 = vand.u32 2147483647, %v10214_v19  ;;  %v2886_v8 = vadd.f32 1.0, %v10266_v44  ;;  %v7648_v57 = vpop.eup %7647  ;;  %v10285_v0 = vmul.f32 %v7764_v20, %v10192_v47 }
 0x4de   : > { %11996 = vst [vmem:[#allocation37_spill] sm:$0xff] %v10277_v58  ;;  %v2241_v52 = vsub.f32 0.0, %v2177_v28  ;;  %v3178_v13 = vsub.f32 %v11998_v10, %v9883_v16  ;;  %v10290_v41 = vadd.f32 %v2100_v30, %v8872_v27  ;;  %v11999_v59 = vmax.f32 %v9939_v29, 0.0  ;;  %v12002_v30 = vld [vmem:[#allocation8_spill] sm:$0xff] }
 0x4df   : > { %11997 = vst [vmem:[#allocation40_spill] sm:$0xff] %v10285_v0  ;;  %v2843_v2 = vmul.f32 0.6931472, %v7644_v7  ;;  %v10297_v54 = vmul.f32 %v10181_v63, %v2863_v46  ;;  %v2242_v26 = vsub.f32 0.0, %v2178_v37  ;;  %vm10299_vm15 = vcmp.lt.f32.partialorder %v2865_v62, 0.0004427343 }
 0x4e0   : > { %v10294_v23 = vadd.f32 %v2840_v25, %v11999_v59  ;;  %v2880_v28 = vmul.f32 -0.5, %v10237_v9  ;;  %7659 = vlog2.f32 %v2886_v8  ;;  %v2357_v16 = vmul.f32 1.442695, %v2241_v52 }
 0x4e1   : > { %v3177_v10 = vsub.f32 %v12002_v30, %v9850_v50  ;;  %v2852_v0 = vmul.f32 0.6931472, %v7648_v57  ;;  %v10307_v29 = vmul.f32 %v10214_v19, %v2872_v21  ;;  %vm10309_vm0 = vcmp.lt.f32.partialorder %v2874_v24, 0.0004427343  ;;  %v7650_v46 = vpop.eup %7649 }
 0x4e2   : > { %v2359_v63 = vmul.f32 1.442695, %v2242_v26  ;;  %v10314_v62 = vadd.f32 %v2102_v38, %v8875_v48  ;;  %v2889_v25 = vmul.f32 -0.5, %v10266_v44  ;;  %7661 = vpow2.f32 %v2357_v16  ;;  %v10318_v8 = vpop.eup %7651  ;;  %v7765_v38 = vld [vmem:[%s7894_s23 + $0x1a0] sm:$0xff]  ;;  %v2106_v16 = vpop.f32.mrf.mxu1 }
 0x4e3   : > { %v3255_v37 = vadd.f32 %v3178_v13, %v3177_v10  ;;  %v2179_v50 = vand.u32 2147483647, %v10290_v41  ;;  %v2849_v19 = vsel %vm10255_vm13, %v10248_v43, %v2843_v2  ;;  %v2883_v21 = vand.u32 2147483647, %v10237_v9  ;;  %v7654_v24 = vpop.eup %7653  ;;  %v10335_v10 = vpop.xlane.xlu0 %3835 }
 0x4e4   : > { %7663 = vpow2.f32 %v2359_v63  ;;  %v2881_v57 = vadd.f32 1.0, %v2880_v28  ;;  %v2895_v52 = vadd.f32 1.0, %v10318_v8  ;;  %v10328_v13 = vmul.f32 %v7765_v38, %v10232_v1  ;;  %12006 = vst [vmem:[#allocation8_spill] sm:$0xff] %v10335_v10  ;;  %v12012_v10 = vld [vmem:[#allocation11_spill] sm:$0xff] }
 0x4e5   : > { %3256 = vadd.xlane.f32.xlu1 %v3255_v37  ;;  %v2243_v59 = vsub.f32 0.0, %v2179_v50  ;;  %v2858_v43 = vsel %vm10271_vm14, %v10262_v55, %v2852_v0  ;;  %v2861_v33 = vmul.f32 0.6931472, %v7650_v46  ;;  %v2892_v2 = vand.u32 2147483647, %v10266_v44  ;;  %v12011_v0 = vld [vmem:[#allocation9_spill] sm:$0xff] }
 0x4e6   : > { %12005 = vst [vmem:[#allocation38_spill] sm:$0xff] %v10328_v13  ;;  %v2180_v30 = vand.u32 2147483647, %v10314_v62  ;;  %v12007_v28 = vmax.f32 %v10001_v31, 0.0  ;;  %v2870_v38 = vmul.f32 0.6931472, %v7654_v24  ;;  %7665 = vlog2.f32 %v2895_v52 }
 0x4e7   : > { %v2890_v26 = vadd.f32 1.0, %v2889_v25  ;;  %v2361_v37 = vmul.f32 1.442695, %v2243_v59  ;;  %v10341_v50 = vpop.eup %7655  ;;  %vm10343_vm1 = vcmp.lt.f32.partialorder %v2883_v21, 0.0004427343  ;;  %v3179_v46 = vsub.f32 %v12011_v0, %v12010_v45  ;;  %v2108_v59 = vpop.f32.mrf.mxu1 }
 0x4e8   : > { %v10339_v63 = vadd.f32 %v2849_v19, %v12007_v28  ;;  %v2244_v55 = vsub.f32 0.0, %v2180_v30  ;;  %v3180_v58 = vsub.f32 %v12012_v10, %v9951_v56  ;;  %v12013_v31 = vmax.f32 %v10004_v3, 0.0  ;;  %v10418_v21 = vpop.xlane.xlu1 %3838 }
 0x4e9   : > { %v2882_v25 = vmul.f32 %v10237_v9, %v2881_v57  ;;  %v2904_v24 = vadd.f32 1.0, %v10341_v50  ;;  %v7658_v28 = vpop.eup %7657  ;;  %v2867_v52 = vsel %vm10299_vm15, %v10297_v54, %v2861_v33  ;;  %7667 = vpow2.f32 %v2361_v37  ;;  %v7766_v33 = vld [vmem:[%s7894_s23 + $0x1a8] sm:$0xff]  ;;  %v7767_v37 = vld [vmem:[%s7894_s23 + $0x1b0] sm:$0xff]  ;;  %12021 = vst [vmem:[#allocation9_spill] sm:$0xff] %v10418_v21 }
 0x4ea   : > { %v10353_v19 = vadd.f32 %v2858_v43, %v12013_v31  ;;  %v2363_v30 = vmul.f32 1.442695, %v2244_v55  ;;  %v3258_v56 = vadd.f32 %v3180_v58, %v3179_v46  ;;  %v2876_v3 = vsel %vm10309_vm0, %v10307_v29, %v2870_v38  ;;  %v7770_v43 = vld [vmem:[%s7894_s23 + $0x1c8] sm:$0xff] }
 0x4eb   : > { %v10365_v9 = vmul.f32 %v10266_v44, %v2890_v26  ;;  %v2898_v57 = vmul.f32 -0.5, %v10318_v8  ;;  %7669 = vlog2.f32 %v2904_v24  ;;  %vm10368_vm2 = vcmp.lt.f32.partialorder %v2892_v2, 0.0004427343  ;;  %v10379_v44 = vpop.xlane.xlu0 %3841  ;;  %v7768_v24 = vld [vmem:[%s7894_s23 + $0x1b8] sm:$0xff] }
 0x4ec   : > { %v2907_v54 = vmul.f32 -0.5, %v10341_v50  ;;  %7671 = vpow2.f32 %v2363_v30  ;;  %3259 = vadd.xlane.f32.xlu0 %v3258_v56  ;;  %v10374_v58 = vadd.f32 %v2106_v16, %v8872_v27  ;;  %v10377_v20 = vadd.f32 %v2108_v59, %v8875_v48  ;;  %12016 = vst [vmem:[#allocation23_spill] sm:$0xff] %v10379_v44 }
 0x4ed   : > { %v12017_v29 = vmax.f32 %v10016_v6, 0.0  ;;  %v2879_v26 = vmul.f32 0.6931472, %v7658_v28  ;;  %v10387_v2 = vmul.f32 %v7766_v33, %v10235_v18  ;;  %v7660_v38 = vpop.eup %7659  ;;  %v2901_v16 = vand.u32 2147483647, %v10318_v8 }
 0x4ee   : > { %v10393_v55 = vmul.f32 %v7767_v37, %v10290_v41  ;;  %v2181_v6 = vand.u32 2147483647, %v10374_v58  ;;  %v12018_v0 = vmax.f32 %v10066_v42, 0.0  ;;  %v2899_v31 = vadd.f32 1.0, %v2898_v57  ;;  %v12019_v37 = vld [vmem:[#allocation15_spill] sm:$0xff] }
 0x4ef   : > { %v10383_v7 = vadd.f32 %v2867_v52, %v12017_v29  ;;  %v10403_v59 = vmul.f32 %v7768_v24, %v10314_v62  ;;  %v2182_v28 = vand.u32 2147483647, %v10377_v20  ;;  %v2110_v52 = vpop.f32.mrf.mxu1  ;;  %v10406_v30 = vpop.eup %7661  ;;  %v2908_v56 = vadd.f32 1.0, %v2907_v54  ;;  %v12020_v24 = vld [vmem:[#allocation12_spill] sm:$0xff] }
 0x4f0   : > { %v10399_v46 = vadd.f32 %v2876_v3, %v12018_v0  ;;  %v2910_v29 = vand.u32 2147483647, %v10341_v50  ;;  %v2245_v33 = vsub.f32 0.0, %v2181_v6  ;;  %v3182_v45 = vsub.f32 %v12019_v37, %v9981_v17  ;;  %v10425_v37 = vpop.xlane.xlu0 %3847 }
 0x4f1   : > { %v10411_v42 = vpop.eup %7663  ;;  %v2885_v3 = vsel %vm10343_vm1, %v2882_v25, %v2879_v26  ;;  %v2888_v57 = vmul.f32 0.6931472, %v7660_v38  ;;  %v2913_v0 = vadd.f32 1.0, %v10406_v30  ;;  %v3181_v10 = vsub.f32 %v12020_v24, %v9962_v12  ;;  %12022 = vst [vmem:[#allocation11_spill] sm:$0xff] %v10425_v37  ;;  %v2112_v38 = vpop.f32.mrf.mxu1 }
 0x4f2   : > { %v2916_v54 = vmul.f32 -0.5, %v10406_v30  ;;  %v2922_v6 = vadd.f32 1.0, %v10411_v42  ;;  %v2365_v44 = vmul.f32 1.442695, %v2245_v33  ;;  %v10423_v17 = vadd.f32 %v2110_v52, %v8872_v27 }
 0x4f3   : > { %v10428_v13 = vmul.f32 %v10318_v8, %v2899_v31  ;;  %vm10430_vm3 = vcmp.lt.f32.partialorder %v2901_v16, 0.0004427343  ;;  %7673 = vlog2.f32 %v2913_v0  ;;  %v2925_v12 = vmul.f32 -0.5, %v10411_v42  ;;  %v7666_v31 = vpop.eup %7665 }
 0x4f4   : > { %v2246_v26 = vsub.f32 0.0, %v2182_v28  ;;  %v12025_v33 = vmax.f32 %v10114_v5, 0.0  ;;  %v10440_v52 = vmul.f32 %v10341_v50, %v2908_v56  ;;  %vm10442_vm4 = vcmp.lt.f32.partialorder %v2910_v29, 0.0004427343  ;;  %v10473_v5 = vpop.xlane.xlu0 %3853 }
 0x4f5   : > { %7675 = vlog2.f32 %v2922_v6  ;;  %v3261_v16 = vadd.f32 %v3182_v45, %v3181_v10  ;;  %v2894_v28 = vsel %vm10368_vm2, %v10365_v9, %v2888_v57  ;;  %v2917_v0 = vadd.f32 1.0, %v2916_v54  ;;  %v2116_v57 = vpop.f32.mrf.mxu1  ;;  %v10465_v6 = vpop.xlane.xlu1 %3844  ;;  %12032 = vst [vmem:[#allocation42_spill] sm:$0xff] %v10473_v5 }
 0x4f6   : > { %v10437_v24 = vadd.f32 %v2885_v3, %v12025_v33  ;;  %7677 = vpow2.f32 %v2365_v44  ;;  %v2367_v3 = vmul.f32 1.442695, %v2246_v26  ;;  %v7769_v33 = vld [vmem:[%s7894_s23 + $0x1c0] sm:$0xff]  ;;  %v2183_v29 = vand.u32 2147483647, %v10423_v17  ;;  %v10456_v10 = vpop.eup %7667  ;;  %12030 = vst [vmem:[#allocation41_spill] sm:$0xff] %v10465_v6 }
 0x4f7   : > { %v10452_v50 = vmul.f32 %v7769_v33, %v10374_v58  ;;  %3262 = vadd.xlane.f32.xlu1 %v3261_v16  ;;  %v2926_v45 = vadd.f32 1.0, %v2925_v12  ;;  %v10460_v9 = vmul.f32 %v7770_v43, %v10377_v20  ;;  %v10463_v44 = vadd.f32 %v2112_v38, %v8875_v48 }
 0x4f8   : > { %7679 = vpow2.f32 %v2367_v3  ;;  %v7670_v54 = vpop.eup %7669  ;;  %v12031_v26 = vmax.f32 %v10118_v32, 0.0  ;;  %v2897_v33 = vmul.f32 0.6931472, %v7666_v31  ;;  %v2919_v56 = vand.u32 2147483647, %v10406_v30 }
 0x4f9   : > { %12028 = vst [vmem:[#allocation15_spill] sm:$0xff] %v10452_v50  ;;  %12029 = vst [vmem:[#allocation12_spill] sm:$0xff] %v10460_v9  ;;  %v2931_v12 = vadd.f32 1.0, %v10456_v10  ;;  %v7672_v3 = vpop.eup %7671  ;;  %v2906_v43 = vmul.f32 0.6931472, %v7670_v54  ;;  %v2934_v38 = vmul.f32 -0.5, %v10456_v10  ;;  %v10478_v6 = vmul.f32 %v10406_v30, %v2917_v0  ;;  %v2118_v54 = vpop.f32.mrf.mxu1 }
 0x4fa   : > { %v10469_v16 = vadd.f32 %v2894_v28, %v12031_v26  ;;  %v2247_v37 = vsub.f32 0.0, %v2183_v29  ;;  %v2184_v21 = vand.u32 2147483647, %v10463_v44  ;;  %v2928_v32 = vand.u32 2147483647, %v10411_v42  ;;  %v12033_v30 = vld [vmem:[#allocation33_spill] sm:$0xff]  ;;  %v10498_v25 = vpop.xlane.xlu1 %3850 }
 0x4fb   : > { %7681 = vlog2.f32 %v2931_v12  ;;  %v2940_v31 = vadd.f32 1.0, %v7672_v3  ;;  %v10482_v28 = vmul.f32 %v10411_v42, %v2926_v45  ;;  %v2943_v26 = vmul.f32 -0.5, %v7672_v3  ;;  %12036 = vst [vmem:[#allocation33_spill] sm:$0xff] %v10498_v25  ;;  %v2120_v5 = vpop.f32.mrf.mxu1 }
 0x4fc   : > { %v2369_v50 = vmul.f32 1.442695, %v2247_v37  ;;  %v2903_v29 = vsel %vm10430_vm3, %v10428_v13, %v2897_v33  ;;  %v2248_v9 = vsub.f32 0.0, %v2184_v21  ;;  %v3183_v0 = vsub.f32 %v12033_v30, %v10047_v14  ;;  %v12039_v14 = vld [vmem:[#allocation16_spill] sm:$0xff] }
 0x4fd   : > { %7683 = vlog2.f32 %v2940_v31  ;;  %v2912_v42 = vsel %vm10442_vm4, %v10440_v52, %v2906_v43  ;;  %vm10493_vm5 = vcmp.lt.f32.partialorder %v2919_v56, 0.0004427343  ;;  %v2935_v37 = vadd.f32 1.0, %v2934_v38  ;;  %v10512_v56 = vpop.xlane.xlu0 %3859  ;;  %v7771_v38 = vld [vmem:[%s7894_s23 + $0x1d0] sm:$0xff] }
 0x4fe   : > { %v2937_v12 = vand.u32 2147483647, %v10456_v10  ;;  %7685 = vpow2.f32 %v2369_v50  ;;  %vm10500_vm6 = vcmp.lt.f32.partialorder %v2928_v32, 0.0004427343  ;;  %v2371_v13 = vmul.f32 1.442695, %v2248_v9 }
 0x4ff   : > { %v3184_v33 = vsub.f32 %v12039_v14, %v10056_v36  ;;  %v10507_v52 = vadd.f32 %v2116_v57, %v8872_v27  ;;  %v10510_v8 = vadd.f32 %v2118_v54, %v8875_v48  ;;  %12040 = vst [vmem:[#allocation16_spill] sm:$0xff] %v10512_v56  ;;  %v2944_v43 = vadd.f32 1.0, %v2943_v26  ;;  %v12042_v31 = vld [vmem:[#allocation20_spill] sm:$0xff]  ;;  %v12043_v14 = vld [vmem:[#allocation19_spill] sm:$0xff] }
 0x500   : > { %v2946_v50 = vand.u32 2147483647, %v7672_v3  ;;  %v10516_v32 = vmul.f32 %v7771_v38, %v10423_v17  ;;  %v3186_v9 = vsub.f32 %v12042_v31, %v10124_v49  ;;  %v7674_v30 = vpop.eup %7673  ;;  %7687 = vpow2.f32 %v2371_v13 }
 0x501   : > { %v3264_v36 = vadd.f32 %v3184_v33, %v3183_v0  ;;  %v2185_v57 = vand.u32 2147483647, %v10507_v52  ;;  %v3185_v54 = vsub.f32 %v12043_v14, %v10070_v39  ;;  %v12044_v26 = vmax.f32 %v10136_v53, 0.0 }
 0x502   : > { %12041 = vst [vmem:[#allocation43_spill] sm:$0xff] %v10516_v32  ;;  %v7676_v25 = vpop.eup %7675  ;;  %v12045_v38 = vmax.f32 %v10192_v47, 0.0  ;;  %v2186_v13 = vand.u32 2147483647, %v10510_v8  ;;  %v2915_v33 = vmul.f32 0.6931472, %v7674_v30  ;;  %v10536_v39 = vmul.f32 %v10456_v10, %v2935_v37 }
 0x503   : > { %v10525_v56 = vadd.f32 %v2903_v29, %v12044_v26  ;;  %v10533_v0 = vpop.eup %7677  ;;  %vm10538_vm7 = vcmp.lt.f32.partialorder %v2937_v12, 0.0004427343  ;;  %3265 = vadd.xlane.f32.xlu0 %v3264_v36  ;;  %v2249_v53 = vsub.f32 0.0, %v2185_v57  ;;  %v3267_v47 = vadd.f32 %v3186_v9, %v3185_v54  ;;  %v7772_v12 = vld [vmem:[%s7894_s23 + $0x1d8] sm:$0xff]  ;;  %v10559_v57 = vpop.xlane.xlu0 %3865 }
 0x504   : > { %v10529_v32 = vadd.f32 %v2912_v42, %v12045_v38  ;;  %v2924_v29 = vmul.f32 0.6931472, %v7676_v25  ;;  %v2949_v42 = vadd.f32 1.0, %v10533_v0  ;;  %v2952_v14 = vmul.f32 -0.5, %v10533_v0  ;;  %v10547_v38 = vpop.xlane.xlu1 %3856  ;;  %12051 = vst [vmem:[#allocation19_spill] sm:$0xff] %v10559_v57  ;;  %v7774_v57 = vld [vmem:[%s7894_s23 + $0x1e8] sm:$0xff] }
 0x505   : > { %v10545_v26 = vadd.f32 %v2120_v5, %v8872_v27  ;;  %v7680_v30 = vpop.eup %7679  ;;  %12048 = vst [vmem:[#allocation20_spill] sm:$0xff] %v10547_v38  ;;  %v10549_v10 = vmul.f32 %v7672_v3, %v2944_v43  ;;  %vm10551_vm8 = vcmp.lt.f32.partialorder %v2946_v50, 0.0004427343  ;;  %v10557_v25 = vmul.f32 %v7772_v12, %v10463_v44  ;;  %3268 = vadd.xlane.f32.xlu1 %v3267_v47  ;;  %v7773_v5 = vld [vmem:[%s7894_s23 + $0x1e0] sm:$0xff] }
 0x506   : > { %v2373_v9 = vmul.f32 1.442695, %v2249_v53  ;;  %v2250_v36 = vsub.f32 0.0, %v2186_v13  ;;  %7689 = vlog2.f32 %v2949_v42  ;;  %v10564_v3 = vmul.f32 %v7773_v5, %v10507_v52  ;;  %v2122_v13 = vpop.f32.mrf.mxu1 }
 0x507   : > { %v2921_v50 = vsel %vm10493_vm5, %v10478_v6, %v2915_v33  ;;  %v2958_v54 = vadd.f32 1.0, %v7680_v30  ;;  %v2961_v53 = vmul.f32 -0.5, %v7680_v30  ;;  %v2930_v42 = vsel %vm10500_vm6, %v10482_v28, %v2924_v29 }
 0x508   : > { %7691 = vpow2.f32 %v2373_v9  ;;  %v7682_v47 = vpop.eup %7681  ;;  %v2953_v12 = vadd.f32 1.0, %v2952_v14  ;;  %v2375_v27 = vmul.f32 1.442695, %v2250_v36  ;;  %v2187_v5 = vand.u32 2147483647, %v10545_v26  ;;  %v10582_v29 = vpop.xlane.xlu1 %3862 }
 0x509   : > { %v2933_v49 = vmul.f32 0.6931472, %v7682_v47  ;;  %v2955_v43 = vand.u32 2147483647, %v10533_v0  ;;  %7693 = vlog2.f32 %v2958_v54  ;;  %v10577_v6 = vmul.f32 %v7774_v57, %v10510_v8 }
 0x50a   : > { %v7684_v45 = vpop.eup %7683  ;;  %v2962_v33 = vadd.f32 1.0, %v2961_v53  ;;  %7695 = vpow2.f32 %v2375_v27  ;;  %v2251_v9 = vsub.f32 0.0, %v2187_v5  ;;  %v10580_v21 = vadd.f32 %v2122_v13, %v8875_v48  ;;  %v10592_v53 = vpop.xlane.xlu0 %3871 }
 0x50b   : > { %v7686_v28 = vpop.eup %7685  ;;  %v12052_v14 = vmax.f32 %v10232_v1, 0.0  ;;  %v12053_v54 = vmax.f32 %v10235_v18, 0.0  ;;  %v2942_v57 = vmul.f32 0.6931472, %v7684_v45  ;;  %v2964_v38 = vand.u32 2147483647, %v7680_v30 }
 0x50c   : > { %12054 = vst [vmem:[#allocation44_spill] sm:$0xff] %v10592_v53  ;;  %v2939_v48 = vsel %vm10538_vm7, %v10536_v39, %v2933_v49  ;;  %v10598_v27 = vmul.f32 %v10533_v0, %v2953_v12  ;;  %v2967_v13 = vadd.f32 1.0, %v7686_v28  ;;  %v2377_v5 = vmul.f32 1.442695, %v2251_v9  ;;  %v12057_v39 = vld [vmem:[#allocation27_spill] sm:$0xff]  ;;  %v12070_v49 = vld [vmem:[#allocation32_spill] sm:$0xff] }
 0x50d   : > { %v10586_v36 = vadd.f32 %v2921_v50, %v12052_v14  ;;  %v10590_v47 = vadd.f32 %v2930_v42, %v12053_v54  ;;  %v2970_v50 = vmul.f32 -0.5, %v7686_v28  ;;  %v7775_v14 = vld [vmem:[%s7894_s23 + $0x1f0] sm:$0xff]  ;;  %v2188_v42 = vand.u32 2147483647, %v10580_v21  ;;  %v7688_v45 = vpop.eup %7687 }
 0x50e   : > { %v10603_v18 = vmul.f32 %v7775_v14, %v10545_v26  ;;  %v2948_v31 = vsel %vm10551_vm8, %v10549_v10, %v2942_v57  ;;  %vm10609_vm9 = vcmp.lt.f32.partialorder %v2955_v43, 0.0004427343  ;;  %v10613_v0 = vmul.f32 %v7680_v30, %v2962_v33  ;;  %v12061_v33 = vld [vmem:[#allocation24_spill] sm:$0xff] }
 0x50f   : > { %7697 = vlog2.f32 %v2967_v13  ;;  %v3187_v12 = vsub.f32 %v12057_v39, %v10165_v51  ;;  %v12058_v9 = vmax.f32 %v10290_v41, 0.0  ;;  %v2976_v14 = vadd.f32 1.0, %v7688_v45  ;;  %v10628_v13 = vpop.xlane.xlu1 %3868 }
 0x510   : > { %v2979_v1 = vmul.f32 -0.5, %v7688_v45  ;;  %7699 = vpow2.f32 %v2377_v5  ;;  %vm10621_vm10 = vcmp.lt.f32.partialorder %v2964_v38, 0.0004427343  ;;  %v2973_v10 = vand.u32 2147483647, %v7686_v28  ;;  %v10634_v38 = vpop.xlane.xlu0 %3877 }
 0x511   : > { %v10619_v54 = vadd.f32 %v2939_v48, %v12058_v9  ;;  %v2252_v43 = vsub.f32 0.0, %v2188_v42  ;;  %v3188_v57 = vsub.f32 %v12061_v33, %v10169_v34  ;;  %v12062_v51 = vmax.f32 %v10314_v62, 0.0  ;;  %v12063_v42 = vld [vmem:[#allocation39_spill] sm:$0xff] }
 0x512   : > { %v2971_v48 = vadd.f32 1.0, %v2970_v50  ;;  %7701 = vlog2.f32 %v2976_v14  ;;  %v2982_v5 = vand.u32 2147483647, %v7688_v45  ;;  %v3189_v53 = vsub.f32 %v12063_v42, %v10241_v60 }
 0x513   : > { %v10632_v41 = vadd.f32 %v2948_v31, %v12062_v51  ;;  %v2379_v39 = vmul.f32 1.442695, %v2252_v43  ;;  %v3270_v9 = vadd.f32 %v3188_v57, %v3187_v12  ;;  %v3190_v30 = vsub.f32 %v10028_v61, %v10245_v15  ;;  %v7690_v34 = vpop.eup %7689  ;;  %v10660_v57 = vpop.xlane.xlu1 %3874 }
 0x514   : > { %v2980_v33 = vadd.f32 1.0, %v2979_v1  ;;  %v3191_v62 = vsub.f32 %v10042_v22, %v10253_v4  ;;  %v3192_v50 = vsub.f32 %v10078_v40, %v10294_v23  ;;  %v3194_v31 = vsub.f32 %v10104_v35, %v10353_v19  ;;  %v7776_v23 = vld [vmem:[%s7894_s23 + $0x1f8] sm:$0xff]  ;;  %s6987_s23 = sshll.u32 %s12128_s14, 1 }
 0x515   : > { %v7692_v14 = vpop.eup %7691  ;;  %v2951_v12 = vmul.f32 0.6931472, %v7690_v34  ;;  %7703 = vpow2.f32 %v2379_v39  ;;  %3271 = vadd.xlane.f32.xlu0 %v3270_v9  ;;  %v3273_v60 = vadd.f32 %v3190_v30, %v3189_v53  ;;  %v3193_v61 = vsub.f32 %v10090_v11, %v10339_v63  ;;  %v12066_v53 = vld [vmem:[#allocation28_spill] sm:$0xff]  ;;  %v12067_v11 = vld [vmem:[#allocation31_spill] sm:$0xff]  ;;  %s384_s20 = scalar_lea.vmem %s11723_s10, %s6987_s23 }
 0x516   : > { %v2972_v15 = vmul.f32 %v7686_v28, %v2971_v48  ;;  %vm10648_vm11 = vcmp.lt.f32.partialorder %v2973_v10, 0.0004427343  ;;  %v2985_v22 = vadd.f32 1.0, %v7692_v14  ;;  %v2988_v4 = vmul.f32 -0.5, %v7692_v14  ;;  %v7694_v40 = vpop.eup %7693  ;;  %v3215_v28 = vpop.xlane.xlu0 %3214 }
 0x517   : > { %v3276_v43 = vadd.f32 %v3192_v50, %v3191_v62  ;;  %v10654_v35 = vmul.f32 %v7776_v23, %v10580_v21  ;;  %3274 = vadd.xlane.f32.xlu1 %v3273_v60  ;;  %v3279_v19 = vadd.f32 %v3194_v31, %v3193_v61  ;;  %v3195_v30 = vsub.f32 %v12066_v53, %v10383_v7  ;;  %v7696_v10 = vpop.eup %7695  ;;  %v12071_v31 = vld [vmem:[#allocation36_spill] sm:$0xff] }
 0x518   : > { %v3196_v63 = vsub.f32 %v12067_v11, %v10399_v46  ;;  %v2957_v51 = vsel %vm10609_vm9, %v10598_v27, %v2951_v12  ;;  %v2960_v48 = vmul.f32 0.6931472, %v7694_v40  ;;  %7705 = vlog2.f32 %v2985_v22  ;;  %v12074_v40 = vld [vmem:[#allocation40_spill] sm:$0xff] }
 0x519   : > { %v2989_v39 = vadd.f32 1.0, %v2988_v4  ;;  %v2981_v9 = vmul.f32 %v7688_v45, %v2980_v33  ;;  %vm10665_vm12 = vcmp.lt.f32.partialorder %v2982_v5, 0.0004427343  ;;  %v2991_v7 = vand.u32 2147483647, %v7692_v14  ;;  %3277 = vadd.xlane.f32.xlu0 %v3276_v43  ;;  %v10678_v4 = vpop.xlane.xlu1 %3880  ;;  %v12073_v43 = vld [vmem:[#allocation37_spill] sm:$0xff] }
 0x51a   : > { %v2994_v34 = vadd.f32 1.0, %v7696_v10  ;;  %v2997_v62 = vmul.f32 -0.5, %v7696_v10  ;;  %v2966_v46 = vsel %vm10621_vm10, %v10613_v0, %v2960_v48  ;;  %v3282_v50 = vadd.f32 %v3196_v63, %v3195_v30  ;;  %v3221_v61 = vpop.xlane.xlu0 %3220 }
 0x51b   : > { %v3197_v27 = vsub.f32 %v12070_v49, %v10437_v24  ;;  %v3198_v12 = vsub.f32 %v12071_v31, %v10469_v16  ;;  %v12072_v45 = vmax.f32 %v10374_v58, 0.0  ;;  %v3000_v60 = vand.u32 2147483647, %v7696_v10  ;;  %3280 = vadd.xlane.f32.xlu1 %v3279_v19  ;;  %v12076_v19 = vld [vmem:[#allocation38_spill] sm:$0xff] }
 0x51c   : > { %7707 = vlog2.f32 %v2994_v34  ;;  %v2998_v33 = vadd.f32 1.0, %v2997_v62  ;;  %v7698_v22 = vpop.eup %7697  ;;  %v10680_v37 = vmul.f32 %v7692_v14, %v2989_v39  ;;  %v3199_v24 = vsub.f32 %v12073_v43, %v10525_v56 }
 0x51d   : > { %v3077_v5 = vadd.f32 %v2957_v51, %v12072_v45  ;;  %v3285_v0 = vadd.f32 %v3198_v12, %v3197_v27  ;;  %v3200_v16 = vsub.f32 %v12074_v40, %v10529_v32  ;;  %v7700_v23 = vpop.eup %7699  ;;  %v12075_v58 = vmax.f32 %v10377_v20, 0.0  ;;  %3283 = vadd.xlane.f32.xlu0 %v3282_v50  ;;  %v3218_v1 = vpop.xlane.xlu1 %3217  ;;  %v12080_v50 = vld [vmem:[#allocation12_spill] sm:$0xff]  ;;  %v12081_v27 = vld [vmem:[#allocation6_spill] sm:$0xff]  ;;  %v12087_v40 = vld [vmem:[#allocation5_spill] sm:$0xff] }
 0x51e   : > { %v2969_v30 = vmul.f32 0.6931472, %v7698_v22  ;;  %v3201_v11 = vsub.f32 %v12076_v19, %v10586_v36  ;;  %v3202_v14 = vsub.f32 %v10387_v2, %v10590_v47  ;;  %v10692_v63 = vmul.f32 %v7696_v10, %v2998_v33  ;;  %v3224_v12 = vpop.xlane.xlu0 %3223  ;;  %v12085_v33 = vld [vmem:[#allocation43_spill] sm:$0xff]  ;;  %v12090_v19 = vld [vmem:[#allocation4_spill] sm:$0xff] }
 0x51f   : > { %v3078_v53 = vadd.f32 %v2966_v46, %v12075_v58  ;;  %v3003_v51 = vadd.f32 1.0, %v7700_v23  ;;  %v3006_v48 = vmul.f32 -0.5, %v7700_v23  ;;  %v3288_v56 = vadd.f32 %v3200_v16, %v3199_v24  ;;  %v7702_v39 = vpop.eup %7701  ;;  %3286 = vadd.xlane.f32.xlu1 %v3285_v0 }
 0x520   : > { %v2975_v32 = vsel %vm10648_vm11, %v2972_v15, %v2969_v30  ;;  %vm10696_vm13 = vcmp.lt.f32.partialorder %v2991_v7, 0.0004427343  ;;  %v3291_v34 = vadd.f32 %v3202_v14, %v3201_v11  ;;  %v3203_v36 = vsub.f32 %v10393_v55, %v10619_v54 }
 0x521   : > { %v3204_v2 = vsub.f32 %v10403_v59, %v10632_v41  ;;  %v12079_v47 = vmax.f32 %v10423_v17, 0.0  ;;  %v2978_v62 = vmul.f32 0.6931472, %v7702_v39  ;;  %7709 = vlog2.f32 %v3003_v51  ;;  %3289 = vadd.xlane.f32.xlu0 %v3288_v56  ;;  %v12084_v41 = vld [vmem:[#allocation15_spill] sm:$0xff]  ;;  %v12092_v56 = vld [vmem:[#allocation2_spill] sm:$0xff]  ;;  %v3227_v20 = vpop.xlane.xlu1 %3226 }
 0x522   : > { %v3007_v46 = vadd.f32 1.0, %v3006_v48  ;;  %v3009_v15 = vand.u32 2147483647, %v7700_v23  ;;  %v3206_v49 = vsub.f32 %v12080_v50, %v3078_v53  ;;  %v10708_v31 = vsub.f32 %v12081_v27, %v3215_v28  ;;  %v7704_v55 = vpop.eup %7703  ;;  %v12091_v51 = vld [vmem:[#allocation3_spill] sm:$0xff] }
 0x523   : > { %v3079_v10 = vadd.f32 %v2975_v32, %v12079_v47  ;;  %v3294_v7 = vadd.f32 %v3204_v2, %v3203_v36  ;;  %v2984_v59 = vsel %vm10665_vm12, %v2981_v9, %v2978_v62  ;;  %vm10712_vm14 = vcmp.lt.f32.partialorder %v3000_v60, 0.0004427343  ;;  %3292 = vadd.xlane.f32.xlu1 %v3291_v34  ;;  %v12088_v60 = vld [vmem:[#allocation14_spill] sm:$0xff] }
 0x524   : > { %v10716_v54 = vmul.f32 %v7700_v23, %v3007_v46  ;;  %v3205_v45 = vsub.f32 %v12084_v41, %v3077_v5  ;;  %v12086_v0 = vmax.f32 %v10463_v44, 0.0  ;;  %v3012_v28 = vadd.f32 1.0, %v7704_v55  ;;  %v12089_v23 = vld [vmem:[#allocation18_spill] sm:$0xff] }
 0x525   : > { %v3207_v22 = vsub.f32 %v12085_v33, %v3079_v10  ;;  %v3015_v24 = vmul.f32 -0.5, %v7704_v55  ;;  %v10723_v16 = vsub.f32 %v12087_v40, %v3218_v1  ;;  %v3018_v9 = vand.u32 2147483647, %v7704_v55  ;;  %v7706_v5 = vpop.eup %7705  ;;  %3295 = vadd.xlane.f32.xlu0 %v3294_v7  ;;  %v12099_v40 = vld [vmem:[#allocation10_spill] sm:$0xff] }
 0x526   : > { %v3080_v43 = vadd.f32 %v2984_v59, %v12086_v0  ;;  %v3297_v42 = vadd.f32 %v3206_v49, %v3205_v45  ;;  %v10726_v58 = vsub.f32 %v12088_v60, %v3221_v61  ;;  %v10729_v53 = vsub.f32 %v12089_v23, %v3224_v12 }
 0x527   : > { %7711 = vlog2.f32 %v3012_v28  ;;  %v3016_v30 = vadd.f32 1.0, %v3015_v24  ;;  %v4016_v11 = vrot.slane %v10708_v31, %v12090_v19  ;;  %v2987_v14 = vmul.f32 0.6931472, %v7706_v5 }
 0x528   : > { %v3208_v44 = vsub.f32 %v10557_v25, %v3080_v43  ;;  %v4020_v48 = vrot.slane %v10708_v31, %v12091_v51  ;;  %v10737_v39 = vsub.s32 2, %v12092_v56  ;;  %v10740_v61 = vsub.s32 3, %v12092_v56  ;;  %3298 = vadd.xlane.f32.xlu1 %v3297_v42 }
 0x529   : > { %vm10742_vm15 = vcmp.lt.f32.partialorder %v3009_v15, 0.0004427343  ;;  %v10746_v34 = vmul.f32 %v7704_v55, %v3016_v30  ;;  %v10749_v36 = vsub.s32 4, %v12092_v56  ;;  %v10752_v2 = vsub.s32 5, %v12092_v56  ;;  %v7708_v47 = vpop.eup %7707 }
 0x52a   : > { %v3300_v25 = vadd.f32 %v3208_v44, %v3207_v22  ;;  %v2993_v10 = vsel %vm10696_vm13, %v10680_v37, %v2987_v14  ;;  %v4024_v62 = vrot.slane %v10708_v31, %v10737_v39  ;;  %v4028_v46 = vrot.slane %v10708_v31, %v10740_v61 }
 0x52b   : > { %v10762_v1 = vsub.s32 6, %v12092_v56  ;;  %v12095_v15 = vmax.f32 %v10507_v52, 0.0  ;;  %v2996_v50 = vmul.f32 0.6931472, %v7708_v47  ;;  %v4032_v49 = vrot.slane %v10708_v31, %v10749_v36 }
 0x52c   : > { %3301 = vadd.xlane.f32.xlu0 %v3300_v25  ;;  %v4036_v37 = vrot.slane %v10708_v31, %v10752_v2  ;;  %v10773_v12 = vsub.s32 7, %v12092_v56  ;;  %v5037_v55 = vcombine.low %v4016_v11, %v4020_v48  ;;  %v5038_v59 = vcombine.low %v4024_v62, %v4028_v46 }
 0x52d   : > { %v3081_v7 = vadd.f32 %v2993_v10, %v12095_v15  ;;  %v4040_v27 = vrot.slane %v10708_v31, %v10762_v1  ;;  %v3002_v52 = vsel %vm10712_vm14, %v10692_v63, %v2996_v50  ;;  %v12096_v33 = vmax.f32 %v10510_v8, 0.0 }
 0x52e   : > { %v5039_v45 = vcombine.low %v4032_v49, %v4036_v37  ;;  %vm10781_vm0 = vcmp.lt.f32.partialorder %v3018_v9, 0.0004427343  ;;  %v4044_v43 = vrot.slane %v10708_v31, %v10773_v12  ;;  %v7788_v28 = vmov 1966171168   ;;  %v7710_v17 = vpop.eup %7709  ;;  %v3230_v37 = vpop.xlane.xlu0 %3229 }
 0x52f   : > { %v3209_v41 = vsub.f32 %v10564_v3, %v3081_v7  ;;  %v3082_v22 = vadd.f32 %v3002_v52, %v12096_v33  ;;  %v5042_v24 = vunpack.c.l.s4 %v7788_v28  ;;  %v10788_v42 = vsub.f32 %v12099_v40, %v3227_v20 }
 0x530   : > { %v4048_v3 = vrot.slane %v10723_v16, %v12090_v19  ;;  %v4052_v8 = vrot.slane %v10723_v16, %v12091_v51  ;;  %v4056_v63 = vrot.slane %v10723_v16, %v10737_v39  ;;  %v4060_v9 = vrot.slane %v10723_v16, %v10740_v61 }
 0x531   : > { %v3005_v60 = vmul.f32 0.6931472, %v7710_v17  ;;  %v3210_v31 = vsub.f32 %v10577_v6, %v3082_v22  ;;  %v5040_v23 = vcombine.low %v4040_v27, %v4044_v43  ;;  %v5043_v5 = vunpack.c.0.s8 %v5042_v24  ;;  %v12101_v43 = vld [vmem:[#allocation22_spill] sm:$0xff] }
 0x532   : > { %v4064_v30 = vrot.slane %v10723_v16, %v10749_v36  ;;  %v4068_v44 = vrot.slane %v10723_v16, %v10752_v2  ;;  %v4072_v11 = vrot.slane %v10723_v16, %v10762_v1  ;;  %v4076_v14 = vrot.slane %v10723_v16, %v10773_v12 }
 0x533   : > { %v3011_v48 = vsel %vm10742_vm15, %v10716_v54, %v3005_v60  ;;  %v3303_v25 = vadd.f32 %v3210_v31, %v3209_v41  ;;  %v10811_v6 = vsub.s32 %v5043_v5, %v12092_v56  ;;  %v5086_v47 = vcombine.low %v4048_v3, %v4052_v8  ;;  %v3233_v60 = vpop.xlane.xlu1 %3232 }
 0x534   : > { %v12100_v10 = vmax.f32 %v10545_v26, 0.0  ;;  %v5087_v46 = vcombine.low %v4056_v63, %v4060_v9  ;;  %v5088_v15 = vcombine.low %v4064_v30, %v4068_v44  ;;  %v5089_v7 = vcombine.low %v4072_v11, %v4076_v14  ;;  %v7712_v50 = vpop.eup %7711 }
 0x535   : > { %3304 = vadd.xlane.f32.xlu1 %v3303_v25  ;;  %v5047_v49 = vrot.slane %v5037_v55, %v10811_v6  ;;  %v5054_v16 = vrot.slane %v5038_v59, %v10811_v6  ;;  %v5061_v32 = vrot.slane %v5039_v45, %v10811_v6  ;;  %v5068_v54 = vrot.slane %v5040_v23, %v10811_v6 }
 0x536   : > { %v3083_v62 = vadd.f32 %v3011_v48, %v12100_v10  ;;  %v3014_v20 = vmul.f32 0.6931472, %v7712_v50  ;;  %v5096_v26 = vrot.slane %v5086_v47, %v10811_v6  ;;  %v5103_v52 = vrot.slane %v5087_v46, %v10811_v6  ;;  %v12103_v47 = vld [vmem:[#allocation13_spill] sm:$0xff] }
 0x537   : > { %v5069_v41 = vcombine.low %v5047_v49, %v5054_v16  ;;  %v5070_v33 = vcombine.low %v5061_v32, %v5068_v54  ;;  %v5110_v22 = vrot.slane %v5088_v15, %v10811_v6  ;;  %v5117_v55 = vrot.slane %v5089_v7, %v10811_v6  ;;  %v3236_v32 = vpop.xlane.xlu0 %3235 }
 0x538   : > { %v3211_v27 = vsub.f32 %v10603_v18, %v3083_v62  ;;  %v3020_v59 = vsel %vm10781_vm0, %v10746_v34, %v3014_v20  ;;  %v5118_v45 = vcombine.low %v5096_v26, %v5103_v52  ;;  %v10828_v28 = vsub.f32 %v12101_v43, %v3230_v37 }
 0x539   : > { %v4080_v18 = vrot.slane %v10726_v58, %v12090_v19  ;;  %v12102_v24 = vmax.f32 %v10580_v21, 0.0  ;;  %v5077_v17 = vrot.slane %v5069_v41, %v10811_v6  ;;  %v5084_v3 = vrot.slane %v5070_v33, %v10811_v6 }
 0x53a   : > { %v5119_v8 = vcombine.low %v5110_v22, %v5117_v55  ;;  %v5126_v63 = vrot.slane %v5118_v45, %v10811_v6  ;;  %v4084_v34 = vrot.slane %v10726_v58, %v12091_v51  ;;  %v4088_v0 = vrot.slane %v10726_v58, %v10737_v39  ;;  %v12104_v45 = vld [vmem:[#allocation26_spill] sm:$0xff] }
 0x53b   : > { %v3084_v40 = vadd.f32 %v3020_v59, %v12102_v24  ;;  %v4092_v9 = vrot.slane %v10726_v58, %v10740_v61  ;;  %v5085_v31 = vcombine.low %v5077_v17, %v5084_v3  ;;  %v4096_v5 = vrot.slane %v10726_v58, %v10749_v36 }
 0x53c   : > { %v5133_v23 = vrot.slane %v5119_v8, %v10811_v6  ;;  %v4100_v30 = vrot.slane %v10726_v58, %v10752_v2  ;;  %v4104_v44 = vrot.slane %v10726_v58, %v10762_v1  ;;  %v4108_v11 = vrot.slane %v10726_v58, %v10773_v12 }
 0x53d   : > { %v3212_v21 = vsub.f32 %v10654_v35, %v3084_v40  ;;  %v5135_v14 = vcombine.low %v4080_v18, %v4084_v34  ;;  %v5136_v35 = vcombine.low %v4088_v0, %v4092_v9  ;;  %v10856_v10 = vsub.f32 %v12103_v47, %v3233_v60  ;;  %v12105_v18 = vld [vmem:[#allocation7_spill] sm:$0xff] }
 0x53e   : > { %v10853_v25 = vcombine.low %v5126_v63, %v5133_v23  ;;  %v5137_v62 = vcombine.low %v4096_v5, %v4100_v30  ;;  %v5138_v46 = vcombine.low %v4104_v44, %v4108_v11  ;;  %v4112_v7 = vrot.slane %v10729_v53, %v12090_v19  ;;  %v3239_v23 = vpop.xlane.xlu1 %3238 }
 0x53f   : > { %v3306_v48 = vadd.f32 %v3212_v21, %v3211_v27  ;;  %v5145_v15 = vrot.slane %v5135_v14, %v10811_v6  ;;  %v5152_v50 = vrot.slane %v5136_v35, %v10811_v6  ;;  %v4116_v58 = vrot.slane %v10729_v53, %v12091_v51 }
 0x540   : > { %v4120_v49 = vrot.slane %v10729_v53, %v10737_v39  ;;  %v4124_v16 = vrot.slane %v10729_v53, %v10740_v61  ;;  %v5159_v54 = vrot.slane %v5137_v62, %v10811_v6  ;;  %v5166_v37 = vrot.slane %v5138_v46, %v10811_v6 }
 0x541   : > { %3307 = vadd.xlane.f32.xlu0 %v3306_v48  ;;  %v4128_v20 = vrot.slane %v10729_v53, %v10749_v36  ;;  %v4132_v27 = vrot.slane %v10729_v53, %v10752_v2  ;;  %v5167_v26 = vcombine.low %v5145_v15, %v5152_v50  ;;  %v4136_v52 = vrot.slane %v10729_v53, %v10762_v1  ;;  %v12106_v15 = vld [vmem:[#allocation17_spill] sm:$0xff] }
 0x542   : > { %v4140_v41 = vrot.slane %v10729_v53, %v10773_v12  ;;  %v5184_v33 = vcombine.low %v4112_v7, %v4116_v58  ;;  %v5168_v22 = vcombine.low %v5159_v54, %v5166_v37  ;;  %v5185_v55 = vcombine.low %v4120_v49, %v4124_v16 }
 0x543   : > { %v5186_v59 = vcombine.low %v4128_v20, %v4132_v27  ;;  %v10879_v43 = vsub.f32 %v12104_v45, %v3236_v32  ;;  %v5175_v24 = vrot.slane %v5167_v26, %v10811_v6  ;;  %v4144_v3 = vrot.slane %v10788_v42, %v12090_v19  ;;  %v3242_v20 = vpop.xlane.xlu0 %3241 }
 0x544   : > { %v5187_v40 = vcombine.low %v4136_v52, %v4140_v41  ;;  %v5194_v17 = vrot.slane %v5184_v33, %v10811_v6  ;;  %v5182_v8 = vrot.slane %v5168_v22, %v10811_v6  ;;  %v5201_v53 = vrot.slane %v5185_v55, %v10811_v6 }
 0x545   : > { %3883 = vadd.xlane.f32.xlu0 %v12105_v18  ;;  %v5208_v63 = vrot.slane %v5186_v59, %v10811_v6  ;;  %v4148_v34 = vrot.slane %v10788_v42, %v12091_v51  ;;  %v4152_v9 = vrot.slane %v10788_v42, %v10737_v39  ;;  %v4156_v60 = vrot.slane %v10788_v42, %v10740_v61 }
 0x546   : > { %v5215_v0 = vrot.slane %v5187_v40, %v10811_v6  ;;  %v4160_v21 = vrot.slane %v10788_v42, %v10749_v36  ;;  %6606 = vperm.xlu1 %7301, %v5085_v31   ;;  %v5183_v5 = vcombine.low %v5175_v24, %v5182_v8  ;;  %v5216_v30 = vcombine.low %v5194_v17, %v5201_v53  ;;  %v12107_v40 = vld [vmem:[#allocation30_spill] sm:$0xff] }
 0x547   : > { %v4164_v44 = vrot.slane %v10788_v42, %v10752_v2  ;;  %v4168_v11 = vrot.slane %v10788_v42, %v10762_v1  ;;  %v4172_v48 = vrot.slane %v10788_v42, %v10773_v12  ;;  %v5233_v35 = vcombine.low %v4144_v3, %v4148_v34 }
 0x548   : > { %v5217_v14 = vcombine.low %v5208_v63, %v5215_v0  ;;  %v5234_v47 = vcombine.low %v4152_v9, %v4156_v60  ;;  %v5224_v62 = vrot.slane %v5216_v30, %v10811_v6  ;;  %v10906_v7 = vsub.f32 %v12106_v15, %v3239_v23  ;;  %v3245_v30 = vpop.xlane.xlu1 %3244 }
 0x549   : > { %v5235_v46 = vcombine.low %v4160_v21, %v4164_v44  ;;  %v4176_v31 = vrot.slane %v10828_v28, %v12090_v19  ;;  %v5236_v58 = vcombine.low %v4168_v11, %v4172_v48  ;;  %v5243_v49 = vrot.slane %v5233_v35, %v10811_v6 }
 0x54a   : > { %v5231_v50 = vrot.slane %v5217_v14, %v10811_v6  ;;  %v5250_v16 = vrot.slane %v5234_v47, %v10811_v6  ;;  %6612 = vperm.xlu1 %7301, %v5183_v5   ;;  %v4180_v32 = vrot.slane %v10828_v28, %v12091_v51  ;;  %v4184_v54 = vrot.slane %v10828_v28, %v10737_v39 }
 0x54b   : > { %v5257_v42 = vrot.slane %v5235_v46, %v10811_v6  ;;  %v4188_v37 = vrot.slane %v10828_v28, %v10740_v61  ;;  %v5264_v26 = vrot.slane %v5236_v58, %v10811_v6  ;;  %v4192_v41 = vrot.slane %v10828_v28, %v10749_v36 }
 0x54c   : > { %v5232_v27 = vcombine.low %v5224_v62, %v5231_v50  ;;  %v5265_v52 = vcombine.low %v5243_v49, %v5250_v16  ;;  %v4196_v33 = vrot.slane %v10828_v28, %v10752_v2  ;;  %v4200_v22 = vrot.slane %v10828_v28, %v10762_v1  ;;  %v12108_v50 = vld [vmem:[#allocation21_spill] sm:$0xff] }
 0x54d   : > { %v4204_v55 = vrot.slane %v10828_v28, %v10773_v12  ;;  %v5282_v59 = vcombine.low %v4176_v31, %v4180_v32  ;;  %v5266_v45 = vcombine.low %v5257_v42, %v5264_v26  ;;  %v5283_v24 = vcombine.low %v4184_v54, %v4188_v37  ;;  %v3248_v26 = vpop.xlane.xlu0 %3247 }
 0x54e   : > { %v5273_v18 = vrot.slane %v5265_v52, %v10811_v6  ;;  %v10931_v17 = vsub.f32 %v12107_v40, %v3242_v20  ;;  %6615 = vperm.xlu1 %7301, %v5232_v27   ;;  %v5284_v3 = vcombine.low %v4192_v41, %v4196_v33  ;;  %v4208_v63 = vrot.slane %v10856_v10, %v12090_v19 }
 0x54f   : > { %v5285_v8 = vcombine.low %v4200_v22, %v4204_v55  ;;  %v5292_v53 = vrot.slane %v5282_v59, %v10811_v6  ;;  %v5280_v34 = vrot.slane %v5266_v45, %v10811_v6  ;;  %v5299_v28 = vrot.slane %v5283_v24, %v10811_v6 }
 0x550   : > { %v4212_v0 = vrot.slane %v10856_v10, %v12091_v51  ;;  %v4216_v9 = vrot.slane %v10856_v10, %v10737_v39  ;;  %v5306_v60 = vrot.slane %v5284_v3, %v10811_v6  ;;  %v4220_v23 = vrot.slane %v10856_v10, %v10740_v61 }
 0x551   : > { %v5313_v21 = vrot.slane %v5285_v8, %v10811_v6  ;;  %v4224_v5 = vrot.slane %v10856_v10, %v10749_v36  ;;  %v5281_v44 = vcombine.low %v5273_v18, %v5280_v34  ;;  %v5314_v11 = vcombine.low %v5292_v53, %v5299_v28  ;;  %v12109_v8 = vld [vmem:[#allocation34_spill] sm:$0xff] }
 0x552   : > { %v4228_v14 = vrot.slane %v10856_v10, %v10752_v2  ;;  %v4232_v48 = vrot.slane %v10856_v10, %v10762_v1  ;;  %v4236_v47 = vrot.slane %v10856_v10, %v10773_v12  ;;  %v5331_v62 = vcombine.low %v4208_v63, %v4212_v0 }
 0x553   : > { %v5315_v35 = vcombine.low %v5306_v60, %v5313_v21  ;;  %v5332_v46 = vcombine.low %v4216_v9, %v4220_v23  ;;  %6618 = vperm.xlu1 %7301, %v5281_v44   ;;  %v5322_v15 = vrot.slane %v5314_v11, %v10811_v6  ;;  %v10956_v58 = vsub.f32 %v12108_v50, %v3245_v30  ;;  %v3251_v44 = vpop.xlane.xlu1 %3250 }
 0x554   : > { %v5333_v31 = vcombine.low %v4224_v5, %v4228_v14  ;;  %v4240_v49 = vrot.slane %v10879_v43, %v12090_v19  ;;  %v5334_v42 = vcombine.low %v4232_v48, %v4236_v47  ;;  %v5341_v32 = vrot.slane %v5331_v62, %v10811_v6 }
 0x555   : > { %v5329_v16 = vrot.slane %v5315_v35, %v10811_v6  ;;  %v5348_v54 = vrot.slane %v5332_v46, %v10811_v6  ;;  %v4244_v37 = vrot.slane %v10879_v43, %v12091_v51  ;;  %v4248_v20 = vrot.slane %v10879_v43, %v10737_v39 }
 0x556   : > { %v5355_v10 = vrot.slane %v5333_v31, %v10811_v6  ;;  %v4252_v27 = vrot.slane %v10879_v43, %v10740_v61  ;;  %v5362_v41 = vrot.slane %v5334_v42, %v10811_v6  ;;  %v4256_v22 = vrot.slane %v10879_v43, %v10749_v36 }
 0x557   : > { %v5330_v52 = vcombine.low %v5322_v15, %v5329_v16  ;;  %v5363_v33 = vcombine.low %v5341_v32, %v5348_v54  ;;  %v4260_v55 = vrot.slane %v10879_v43, %v10752_v2  ;;  %v4264_v59 = vrot.slane %v10879_v43, %v10762_v1 }
 0x558   : > { %v4268_v45 = vrot.slane %v10879_v43, %v10773_v12  ;;  %v5380_v18 = vcombine.low %v4240_v49, %v4244_v37  ;;  %v5364_v24 = vcombine.low %v5355_v10, %v5362_v41  ;;  %v5381_v3 = vcombine.low %v4248_v20, %v4252_v27  ;;  %v12110_v49 = vld [vmem:[#allocation25_spill] sm:$0xff] }
 0x559   : > { %6621 = vperm.xlu1 %7301, %v5330_v52   ;;  %v5371_v40 = vrot.slane %v5363_v33, %v10811_v6  ;;  %v10981_v53 = vsub.f32 %v12109_v8, %v3248_v26  ;;  %v5382_v63 = vcombine.low %v4256_v22, %v4260_v55  ;;  %v4272_v0 = vrot.slane %v10906_v7, %v12090_v19 }
 0x55a   : > { %v5383_v34 = vcombine.low %v4264_v59, %v4268_v45  ;;  %v5390_v28 = vrot.slane %v5380_v18, %v10811_v6  ;;  %v5378_v43 = vrot.slane %v5364_v24, %v10811_v6  ;;  %v5397_v9 = vrot.slane %v5381_v3, %v10811_v6 }
 0x55b   : > { %6609 = vperm.xlu0 %7302, %v10853_v25   ;;  %v4276_v60 = vrot.slane %v10906_v7, %v12091_v51  ;;  %v4280_v21 = vrot.slane %v10906_v7, %v10737_v39  ;;  %v5404_v23 = vrot.slane %v5382_v63, %v10811_v6  ;;  %v4284_v5 = vrot.slane %v10906_v7, %v10740_v61 }
 0x55c   : > { %v5411_v25 = vrot.slane %v5383_v34, %v10811_v6  ;;  %v4288_v30 = vrot.slane %v10906_v7, %v10749_v36  ;;  %v5379_v11 = vcombine.low %v5371_v40, %v5378_v43  ;;  %v5412_v14 = vcombine.low %v5390_v28, %v5397_v9 }
 0x55d   : > { %v4292_v48 = vrot.slane %v10906_v7, %v10752_v2  ;;  %v4296_v35 = vrot.slane %v10906_v7, %v10762_v1  ;;  %v4300_v62 = vrot.slane %v10906_v7, %v10773_v12  ;;  %v5429_v46 = vcombine.low %v4272_v0, %v4276_v60 }
 0x55e   : > { %v5413_v47 = vcombine.low %v5404_v23, %v5411_v25  ;;  %v5430_v15 = vcombine.low %v4280_v21, %v4284_v5  ;;  %6624 = vperm.xlu1 %7301, %v5379_v11   ;;  %v5420_v31 = vrot.slane %v5412_v14, %v10811_v6  ;;  %v11007_v16 = vsub.f32 %v12110_v49, %v3251_v44 }
 0x55f   : > { %v5431_v50 = vcombine.low %v4288_v30, %v4292_v48  ;;  %v4304_v42 = vrot.slane %v10931_v17, %v12090_v19  ;;  %v5432_v54 = vcombine.low %v4296_v35, %v4300_v62  ;;  %v5439_v10 = vrot.slane %v5429_v46, %v10811_v6 }
 0x560   : > { %v5427_v32 = vrot.slane %v5413_v47, %v10811_v6  ;;  %v5446_v37 = vrot.slane %v5430_v15, %v10811_v6  ;;  %v4308_v20 = vrot.slane %v10931_v17, %v12091_v51  ;;  %v4312_v27 = vrot.slane %v10931_v17, %v10737_v39  ;;  %v3254_v11 = vpop.xlane.xlu0 %3253  ;;  %v12111_v47 = vld [vmem:[#allocation35_spill] sm:$0xff] }
 0x561   : > { %v5453_v7 = vrot.slane %v5431_v50, %v10811_v6  ;;  %v4316_v26 = vrot.slane %v10931_v17, %v10740_v61  ;;  %v5460_v41 = vrot.slane %v5432_v54, %v10811_v6  ;;  %v4320_v22 = vrot.slane %v10931_v17, %v10749_v36 }
 0x562   : > { %v5428_v52 = vcombine.low %v5420_v31, %v5427_v32  ;;  %v5461_v33 = vcombine.low %v5439_v10, %v5446_v37  ;;  %v4324_v55 = vrot.slane %v10931_v17, %v10752_v2  ;;  %v4328_v59 = vrot.slane %v10931_v17, %v10762_v1 }
 0x563   : > { %v4332_v45 = vrot.slane %v10931_v17, %v10773_v12  ;;  %v5478_v18 = vcombine.low %v4304_v42, %v4308_v20  ;;  %v5462_v24 = vcombine.low %v5453_v7, %v5460_v41  ;;  %v5479_v3 = vcombine.low %v4312_v27, %v4316_v26 }
 0x564   : > { %6627 = vperm.xlu1 %7301, %v5428_v52   ;;  %v5469_v40 = vrot.slane %v5461_v33, %v10811_v6  ;;  %v4336_v8 = vrot.slane %v10956_v58, %v12090_v19  ;;  %v5480_v63 = vcombine.low %v4320_v22, %v4324_v55  ;;  %v4340_v0 = vrot.slane %v10956_v58, %v12091_v51 }
 0x565   : > { %v5481_v34 = vcombine.low %v4328_v59, %v4332_v45  ;;  %v5488_v28 = vrot.slane %v5478_v18, %v10811_v6  ;;  %v5476_v43 = vrot.slane %v5462_v24, %v10811_v6  ;;  %v5495_v17 = vrot.slane %v5479_v3, %v10811_v6 }
 0x566   : > { %v4344_v9 = vrot.slane %v10956_v58, %v10737_v39  ;;  %v4348_v60 = vrot.slane %v10956_v58, %v10740_v61  ;;  %v5502_v21 = vrot.slane %v5480_v63, %v10811_v6  ;;  %v4352_v25 = vrot.slane %v10956_v58, %v10749_v36 }
 0x567   : > { %v5509_v23 = vrot.slane %v5481_v34, %v10811_v6  ;;  %v4356_v5 = vrot.slane %v10956_v58, %v10752_v2  ;;  %v5477_v30 = vcombine.low %v5469_v40, %v5476_v43  ;;  %v5510_v44 = vcombine.low %v5488_v28, %v5495_v17 }
 0x568   : > { %v4360_v14 = vrot.slane %v10956_v58, %v10762_v1  ;;  %v4364_v48 = vrot.slane %v10956_v58, %v10773_v12  ;;  %v11053_v62 = vsub.f32 %v12111_v47, %v3254_v11  ;;  %v5527_v46 = vcombine.low %v4336_v8, %v4340_v0 }
 0x569   : > { %v5511_v35 = vcombine.low %v5502_v21, %v5509_v23  ;;  %v5528_v15 = vcombine.low %v4344_v9, %v4348_v60  ;;  %6630 = vperm.xlu1 %7301, %v5477_v30   ;;  %v5518_v31 = vrot.slane %v5510_v44, %v10811_v6  ;;  %v5529_v50 = vcombine.low %v4352_v25, %v4356_v5 }
 0x56a   : > { %v5530_v49 = vcombine.low %v4360_v14, %v4364_v48  ;;  %v4368_v42 = vrot.slane %v10981_v53, %v12090_v19  ;;  %v5537_v54 = vrot.slane %v5527_v46, %v10811_v6  ;;  %v4372_v10 = vrot.slane %v10981_v53, %v12091_v51  ;;  %v12112_v46 = vld [vmem:[#allocation29_spill] sm:$0xff] }
 0x56b   : > { %v5525_v32 = vrot.slane %v5511_v35, %v10811_v6  ;;  %v5544_v58 = vrot.slane %v5528_v15, %v10811_v6  ;;  %v5551_v37 = vrot.slane %v5529_v50, %v10811_v6  ;;  %v4376_v20 = vrot.slane %v10981_v53, %v10737_v39 }
 0x56c   : > { %v5558_v7 = vrot.slane %v5530_v49, %v10811_v6  ;;  %v4380_v27 = vrot.slane %v10981_v53, %v10740_v61  ;;  %v4384_v41 = vrot.slane %v10981_v53, %v10749_v36  ;;  %v4388_v33 = vrot.slane %v10981_v53, %v10752_v2 }
 0x56d   : > { %v5526_v26 = vcombine.low %v5518_v31, %v5525_v32  ;;  %v5559_v52 = vcombine.low %v5537_v54, %v5544_v58  ;;  %v4392_v55 = vrot.slane %v10981_v53, %v10762_v1  ;;  %v4396_v59 = vrot.slane %v10981_v53, %v10773_v12 }
 0x56e   : > { %v5560_v22 = vcombine.low %v5551_v37, %v5558_v7  ;;  %v5576_v45 = vcombine.low %v4368_v42, %v4372_v10  ;;  %v5577_v24 = vcombine.low %v4376_v20, %v4380_v27  ;;  %v5578_v40 = vcombine.low %v4384_v41, %v4388_v33  ;;  %v3257_v11 = vpop.xlane.xlu1 %3256 }
 0x56f   : > { %6633 = vperm.xlu1 %7301, %v5526_v26   ;;  %v5567_v18 = vrot.slane %v5559_v52, %v10811_v6  ;;  %v4400_v3 = vrot.slane %v11007_v16, %v12090_v19  ;;  %v5579_v63 = vcombine.low %v4392_v55, %v4396_v59  ;;  %v4404_v28 = vrot.slane %v11007_v16, %v12091_v51  ;;  %v12113_v59 = vld [vmem:[#allocation8_spill] sm:$0xff] }
 0x570   : > { %v5574_v8 = vrot.slane %v5560_v22, %v10811_v6  ;;  %v5586_v34 = vrot.slane %v5576_v45, %v10811_v6  ;;  %v5593_v0 = vrot.slane %v5577_v24, %v10811_v6  ;;  %v5600_v53 = vrot.slane %v5578_v40, %v10811_v6 }
 0x571   : > { %v4408_v43 = vrot.slane %v11007_v16, %v10737_v39  ;;  %v4412_v17 = vrot.slane %v11007_v16, %v10740_v61  ;;  %v5607_v60 = vrot.slane %v5579_v63, %v10811_v6  ;;  %v4416_v21 = vrot.slane %v11007_v16, %v10749_v36 }
 0x572   : > { %v5575_v9 = vcombine.low %v5567_v18, %v5574_v8  ;;  %v4420_v23 = vrot.slane %v11007_v16, %v10752_v2  ;;  %v5608_v25 = vcombine.low %v5586_v34, %v5593_v0  ;;  %v4424_v5 = vrot.slane %v11007_v16, %v10762_v1 }
 0x573   : > { %v4428_v30 = vrot.slane %v11007_v16, %v10773_v12  ;;  %v5625_v44 = vcombine.low %v4400_v3, %v4404_v28  ;;  %v5609_v14 = vcombine.low %v5600_v53, %v5607_v60  ;;  %v5626_v48 = vcombine.low %v4408_v43, %v4412_v17  ;;  %v12114_v60 = vld [vmem:[#allocation9_spill] sm:$0xff] }
 0x574   : > { %6636 = vperm.xlu0 %7302, %v5575_v9   ;;  %v5627_v35 = vcombine.low %v4416_v21, %v4420_v23  ;;  %v4432_v47 = vrot.slane %v11053_v62, %v12090_v19  ;;  %v3963_v15 = vsub.f32 %v12112_v46, %v3257_v11  ;;  %v5616_v31 = vrot.slane %v5608_v25, %v10811_v6  ;;  %v12115_v23 = vld [vmem:[#allocation41_spill] sm:$0xff] }
 0x575   : > { %v5628_v50 = vcombine.low %v4424_v5, %v4428_v30  ;;  %v5635_v49 = vrot.slane %v5625_v44, %v10811_v6  ;;  %v5623_v42 = vrot.slane %v5609_v14, %v10811_v6  ;;  %v5642_v16 = vrot.slane %v5626_v48, %v10811_v6  ;;  %v3260_v53 = vpop.xlane.xlu0 %3259  ;;  %v12116_v5 = vld [vmem:[#allocation33_spill] sm:$0xff] }
 0x576   : > { %v5649_v32 = vrot.slane %v5627_v35, %v10811_v6  ;;  %v4436_v54 = vrot.slane %v11053_v62, %v12091_v51  ;;  %v4440_v10 = vrot.slane %v11053_v62, %v10737_v39  ;;  %v4444_v37 = vrot.slane %v11053_v62, %v10740_v61 }
 0x577   : > { %v5656_v58 = vrot.slane %v5628_v50, %v10811_v6  ;;  %v4448_v7 = vrot.slane %v11053_v62, %v10749_v36  ;;  %v5624_v20 = vcombine.low %v5616_v31, %v5623_v42  ;;  %v5657_v27 = vcombine.low %v5635_v49, %v5642_v16 }
 0x578   : > { %v4452_v26 = vrot.slane %v11053_v62, %v10752_v2  ;;  %v4456_v52 = vrot.slane %v11053_v62, %v10762_v1  ;;  %v4460_v33 = vrot.slane %v11053_v62, %v10773_v12  ;;  %v5674_v22 = vcombine.low %v4432_v47, %v4436_v54 }
 0x579   : > { %v5658_v41 = vcombine.low %v5649_v32, %v5656_v58  ;;  %v5675_v55 = vcombine.low %v4440_v10, %v4444_v37  ;;  %v7087_v45 = vadd.f32 -1.0, %v12113_v59  ;;  %6639 = vperm.xlu0 %7302, %v5624_v20   ;;  %v5665_v18 = vrot.slane %v5657_v27, %v10811_v6 }
 0x57a   : > { %v5676_v24 = vcombine.low %v4448_v7, %v4452_v26  ;;  %v5677_v3 = vcombine.low %v4456_v52, %v4460_v33  ;;  %v5684_v8 = vrot.slane %v5674_v22, %v10811_v6  ;;  %v7088_v21 = vadd.f32 -1.0, %v12114_v60 }
 0x57b   : > { %v5672_v40 = vrot.slane %v5658_v41, %v10811_v6  ;;  %v5691_v63 = vrot.slane %v5675_v55, %v10811_v6  ;;  %v3932_v43 = vmul.f32 0.5, %v7087_v45  ;;  %v7090_v25 = vadd.f32 -1.0, %v12115_v23 }
 0x57c   : > { %v5698_v34 = vrot.slane %v5676_v24, %v10811_v6  ;;  %v5705_v62 = vrot.slane %v5677_v3, %v10811_v6  ;;  %v7092_v30 = vadd.f32 -1.0, %v12116_v5  ;;  %v4464_v14 = vrot.slane %v3963_v15, %v12090_v19 }
 0x57d   : > { %v5673_v28 = vcombine.low %v5665_v18, %v5672_v40  ;;  %v5706_v0 = vcombine.low %v5684_v8, %v5691_v63  ;;  %v3964_v44 = vsub.f32 %v3932_v43, %v3260_v53  ;;  %v4468_v48 = vrot.slane %v3963_v15, %v12091_v51  ;;  %v12117_v43 = vld [vmem:[#allocation20_spill] sm:$0xff] }
 0x57e   : > { %v5707_v17 = vcombine.low %v5698_v34, %v5705_v62  ;;  %v4472_v35 = vrot.slane %v3963_v15, %v10737_v39  ;;  %v4476_v47 = vrot.slane %v3963_v15, %v10740_v61  ;;  %v4480_v46 = vrot.slane %v3963_v15, %v10749_v36 }
 0x57f   : > { %6642 = vperm.xlu0 %7302, %v5673_v28   ;;  %v5714_v9 = vrot.slane %v5706_v0, %v10811_v6  ;;  %v4484_v31 = vrot.slane %v3963_v15, %v10752_v2  ;;  %v4488_v49 = vrot.slane %v3963_v15, %v10762_v1  ;;  %v4492_v42 = vrot.slane %v3963_v15, %v10773_v12 }
 0x580   : > { %v5721_v11 = vrot.slane %v5707_v17, %v10811_v6  ;;  %v3933_v16 = vmul.f32 0.5, %v7088_v21  ;;  %v11142_v32 = vmul.f32 0.5, %v7090_v25  ;;  %v11144_v54 = vmul.f32 0.5, %v7092_v30  ;;  %v3263_v58 = vpop.xlane.xlu1 %3262 }
 0x581   : > { %v5723_v10 = vcombine.low %v4464_v14, %v4468_v48  ;;  %v5724_v7 = vcombine.low %v4472_v35, %v4476_v47  ;;  %v5725_v20 = vcombine.low %v4480_v46, %v4484_v31  ;;  %v4496_v27 = vrot.slane %v3964_v44, %v12090_v19 }
 0x582   : > { %v5722_v50 = vcombine.low %v5714_v9, %v5721_v11  ;;  %v3965_v37 = vsub.f32 %v3933_v16, %v3263_v58  ;;  %v5726_v26 = vcombine.low %v4488_v49, %v4492_v42  ;;  %v4500_v52 = vrot.slane %v3964_v44, %v12091_v51  ;;  %v12118_v9 = vld [vmem:[#allocation23_spill] sm:$0xff] }
 0x583   : > { %v4504_v41 = vrot.slane %v3964_v44, %v10737_v39  ;;  %v4508_v15 = vrot.slane %v3964_v44, %v10740_v61  ;;  %v4512_v63 = vrot.slane %v3964_v44, %v10749_v36  ;;  %v4516_v34 = vrot.slane %v3964_v44, %v10752_v2  ;;  %v12119_v16 = vld [vmem:[#allocation11_spill] sm:$0xff] }
 0x584   : > { %6645 = vperm.xlu0 %7302, %v5722_v50   ;;  %v4528_v33 = vrot.slane %v3965_v37, %v12090_v19  ;;  %v4532_v22 = vrot.slane %v3965_v37, %v12091_v51  ;;  %v4536_v55 = vrot.slane %v3965_v37, %v10737_v39  ;;  %v4540_v59 = vrot.slane %v3965_v37, %v10740_v61 }
 0x585   : > { %v4544_v45 = vrot.slane %v3965_v37, %v10749_v36  ;;  %v4548_v18 = vrot.slane %v3965_v37, %v10752_v2  ;;  %v4552_v24 = vrot.slane %v3965_v37, %v10762_v1  ;;  %v4556_v40 = vrot.slane %v3965_v37, %v10773_v12 }
 0x586   : > { %v5821_v3 = vcombine.low %v4528_v33, %v4532_v22  ;;  %v5822_v8 = vcombine.low %v4536_v55, %v4540_v59  ;;  %v4520_v0 = vrot.slane %v3964_v44, %v10762_v1  ;;  %v4524_v53 = vrot.slane %v3964_v44, %v10773_v12 }
 0x587   : > { %v5823_v28 = vcombine.low %v4544_v45, %v4548_v18  ;;  %v5824_v62 = vcombine.low %v4552_v24, %v4556_v40  ;;  %v11163_v17 = vadd.f32 -1.0, %v12117_v43  ;;  %v7089_v60 = vadd.f32 -1.0, %v12118_v9 }
 0x588   : > { %v5831_v21 = vrot.slane %v5821_v3, %v10811_v6  ;;  %v5838_v23 = vrot.slane %v5822_v8, %v10811_v6  ;;  %v5733_v30 = vrot.slane %v5723_v10, %v10811_v6  ;;  %v5740_v11 = vrot.slane %v5724_v7, %v10811_v6  ;;  %v12120_v7 = vld [vmem:[#allocation42_spill] sm:$0xff] }
 0x589   : > { %v5845_v25 = vrot.slane %v5823_v28, %v10811_v6  ;;  %v5852_v5 = vrot.slane %v5824_v62, %v10811_v6  ;;  %v5747_v44 = vrot.slane %v5725_v20, %v10811_v6  ;;  %v5754_v48 = vrot.slane %v5726_v26, %v10811_v6 }
 0x58a   : > { %v5853_v14 = vcombine.low %v5831_v21, %v5838_v23  ;;  %v5772_v35 = vcombine.low %v4496_v27, %v4500_v52  ;;  %v5773_v46 = vcombine.low %v4504_v41, %v4508_v15  ;;  %v5774_v31 = vcombine.low %v4512_v63, %v4516_v34 }
 0x58b   : > { %v5854_v47 = vcombine.low %v5845_v25, %v5852_v5  ;;  %v5775_v50 = vcombine.low %v4520_v0, %v4524_v53  ;;  %v3934_v49 = vmul.f32 0.5, %v7089_v60  ;;  %v11175_v42 = vadd.f32 -1.0, %v10582_v29 }
 0x58c   : > { %v11178_v58 = vadd.f32 -1.0, %v12119_v16  ;;  %v5861_v10 = vrot.slane %v5853_v14, %v10811_v6  ;;  %v11182_v37 = vadd.f32 -1.0, %v10628_v13  ;;  %v11185_v20 = vadd.f32 -1.0, %v12120_v7  ;;  %v3266_v26 = vpop.xlane.xlu0 %3265 }
 0x58d   : > { %v11188_v27 = vadd.f32 -1.0, %v10660_v57  ;;  %v5868_v52 = vrot.slane %v5854_v47, %v10811_v6  ;;  %v3966_v41 = vsub.f32 %v3934_v49, %v3266_v26  ;;  %v11191_v29 = vcombine.low %v5733_v30, %v5740_v11 }
 0x58e   : > { %v11193_v15 = vcombine.low %v5747_v44, %v5754_v48  ;;  %v5782_v33 = vrot.slane %v5772_v35, %v10811_v6  ;;  %v3269_v22 = vpop.xlane.xlu1 %3268  ;;  %v5789_v13 = vrot.slane %v5773_v46, %v10811_v6  ;;  %v5796_v59 = vrot.slane %v5774_v31, %v10811_v6 }
 0x58f   : > { %v5869_v55 = vcombine.low %v5861_v10, %v5868_v52  ;;  %v5803_v45 = vrot.slane %v5775_v50, %v10811_v6  ;;  %v3967_v57 = vsub.f32 %v11142_v32, %v3269_v22  ;;  %v4560_v18 = vrot.slane %v3966_v41, %v12090_v19 }
 0x590   : > { %v4564_v24 = vrot.slane %v3966_v41, %v12091_v51  ;;  %v4568_v40 = vrot.slane %v3966_v41, %v10737_v39  ;;  %v4572_v3 = vrot.slane %v3966_v41, %v10740_v61  ;;  %v4576_v8 = vrot.slane %v3966_v41, %v10749_v36 }
 0x591   : > { %6654 = vperm.xlu1 %7301, %v5869_v55   ;;  %v4580_v63 = vrot.slane %v3966_v41, %v10752_v2  ;;  %v4584_v34 = vrot.slane %v3966_v41, %v10762_v1  ;;  %v4588_v28 = vrot.slane %v3966_v41, %v10773_v12  ;;  %v4592_v32 = vrot.slane %v3967_v57, %v12090_v19  ;;  %v12121_v41 = vld [vmem:[#allocation16_spill] sm:$0xff]  ;;  %v12122_v55 = vld [vmem:[#allocation19_spill] sm:$0xff] }
 0x592   : > { %v5870_v62 = vcombine.low %v4560_v18, %v4564_v24  ;;  %v4596_v0 = vrot.slane %v3967_v57, %v12091_v51  ;;  %v5871_v53 = vcombine.low %v4568_v40, %v4572_v3  ;;  %v4600_v9 = vrot.slane %v3967_v57, %v10737_v39  ;;  %v12123_v40 = vld [vmem:[#allocation44_spill] sm:$0xff] }
 0x593   : > { %v5872_v43 = vcombine.low %v4576_v8, %v4580_v63  ;;  %v4604_v60 = vrot.slane %v3967_v57, %v10740_v61  ;;  %v5873_v21 = vcombine.low %v4584_v34, %v4588_v28  ;;  %v4608_v25 = vrot.slane %v3967_v57, %v10749_v36 }
 0x594   : > { %v5880_v23 = vrot.slane %v5870_v62, %v10811_v6  ;;  %v4612_v5 = vrot.slane %v3967_v57, %v10752_v2  ;;  %v5887_v30 = vrot.slane %v5871_v53, %v10811_v6  ;;  %v4616_v14 = vrot.slane %v3967_v57, %v10762_v1 }
 0x595   : > { %v5894_v11 = vrot.slane %v5872_v43, %v10811_v6  ;;  %v4620_v44 = vrot.slane %v3967_v57, %v10773_v12  ;;  %v5901_v48 = vrot.slane %v5873_v21, %v10811_v6  ;;  %v5919_v35 = vcombine.low %v4592_v32, %v4596_v0 }
 0x596   : > { %v5920_v47 = vcombine.low %v4600_v9, %v4604_v60  ;;  %v5921_v46 = vcombine.low %v4608_v25, %v4612_v5  ;;  %v5902_v31 = vcombine.low %v5880_v23, %v5887_v30  ;;  %v5804_v49 = vcombine.low %v5782_v33, %v5789_v13 }
 0x597   : > { %v5922_v50 = vcombine.low %v4616_v14, %v4620_v44  ;;  %v5805_v16 = vcombine.low %v5796_v59, %v5803_v45  ;;  %v5903_v10 = vcombine.low %v5894_v11, %v5901_v48  ;;  %v5929_v7 = vrot.slane %v5919_v35, %v10811_v6 }
 0x598   : > { %v5936_v26 = vrot.slane %v5920_v47, %v10811_v6  ;;  %v5943_v52 = vrot.slane %v5921_v46, %v10811_v6  ;;  %v7095_v22 = vadd.f32 -1.0, %v12121_v41  ;;  %v7097_v57 = vadd.f32 -1.0, %v12122_v55 }
 0x599   : > { %v5910_v18 = vrot.slane %v5902_v31, %v10811_v6  ;;  %v5950_v24 = vrot.slane %v5922_v50, %v10811_v6  ;;  %v7099_v3 = vadd.f32 -1.0, %v12123_v40  ;;  %v7101_v33 = vadd.f32 -1.0, %v10634_v38 }
 0x59a   : > { %v5917_v13 = vrot.slane %v5903_v10, %v10811_v6  ;;  %v5951_v59 = vcombine.low %v5929_v7, %v5936_v26  ;;  %v7102_v45 = vadd.f32 -1.0, %v10678_v4  ;;  %v5763_v63 = vrot.slane %v11191_v29, %v10811_v6 }
 0x59b   : > { %v5952_v8 = vcombine.low %v5943_v52, %v5950_v24  ;;  %v5770_v34 = vrot.slane %v11193_v15, %v10811_v6  ;;  %v5812_v32 = vrot.slane %v5804_v49, %v10811_v6  ;;  %v5819_v0 = vrot.slane %v5805_v16, %v10811_v6 }
 0x59c   : > { %v5918_v28 = vcombine.low %v5910_v18, %v5917_v13  ;;  %v5959_v62 = vrot.slane %v5951_v59, %v10811_v6  ;;  %v3939_v38 = vmul.f32 0.5, %v11163_v17  ;;  %v3941_v53 = vmul.f32 0.5, %v11175_v42 }
 0x59d   : > { %v3936_v4 = vmul.f32 0.5, %v11178_v58  ;;  %v5966_v43 = vrot.slane %v5952_v8, %v10811_v6  ;;  %v11243_v29 = vmul.f32 0.5, %v11182_v37  ;;  %v3938_v15 = vmul.f32 0.5, %v11185_v20 }
 0x59e   : > { %v11247_v9 = vmul.f32 0.5, %v11188_v27  ;;  %v3940_v60 = vmul.f32 0.5, %v7095_v22  ;;  %v3272_v21 = vpop.xlane.xlu0 %3271  ;;  %6657 = vperm.xlu0 %7302, %v5918_v28   ;;  %v11249_v23 = vmul.f32 0.5, %v7097_v57  ;;  %v11251_v17 = vmul.f32 0.5, %v7099_v3 }
 0x59f   : > { %v3968_v42 = vsub.f32 %v3936_v4, %v3272_v21  ;;  %v5967_v25 = vcombine.low %v5959_v62, %v5966_v43  ;;  %v11253_v58 = vmul.f32 0.5, %v7101_v33  ;;  %v11255_v5 = vmul.f32 0.5, %v7102_v45 }
 0x5a0   : > { %v3275_v37 = vpop.xlane.xlu1 %3274  ;;  %v11257_v30 = vcombine.low %v5763_v63, %v5770_v34  ;;  %v11259_v20 = vcombine.low %v5812_v32, %v5819_v0  ;;  %vm6712_vm1 = vcmask 130112   ;;  %vm6719_vm2 = vcmask 195712  }
 0x5a1   : > { %v3969_v27 = vsub.f32 %v11144_v54, %v3275_v37  ;;  %6660 = vperm.xlu1 %7301, %v5967_v25   ;;  %v4624_v11 = vrot.slane %v3968_v42, %v12090_v19  ;;  %v4628_v14 = vrot.slane %v3968_v42, %v12091_v51  ;;  %v4632_v44 = vrot.slane %v3968_v42, %v10737_v39 }
 0x5a2   : > { %v3278_v48 = vpop.xlane.xlu0 %3277  ;;  %v4636_v35 = vrot.slane %v3968_v42, %v10740_v61  ;;  %v4640_v47 = vrot.slane %v3968_v42, %v10749_v36  ;;  %v4644_v46 = vrot.slane %v3968_v42, %v10752_v2  ;;  %v4648_v31 = vrot.slane %v3968_v42, %v10762_v1 }
 0x5a3   : > { %v3970_v50 = vsub.f32 %v3938_v15, %v3278_v48  ;;  %v4652_v49 = vrot.slane %v3968_v42, %v10773_v12  ;;  %v5968_v54 = vcombine.low %v4624_v11, %v4628_v14  ;;  %v4656_v16 = vrot.slane %v3969_v27, %v12090_v19 }
 0x5a4   : > { %v3281_v10 = vpop.xlane.xlu1 %3280  ;;  %v5969_v7 = vcombine.low %v4632_v44, %v4636_v35  ;;  %v5970_v26 = vcombine.low %v4640_v47, %v4644_v46  ;;  %v4660_v52 = vrot.slane %v3969_v27, %v12091_v51  ;;  %v4664_v41 = vrot.slane %v3969_v27, %v10737_v39 }
 0x5a5   : > { %v11273_v22 = vsub.f32 %v3939_v38, %v3281_v10  ;;  %v5971_v55 = vcombine.low %v4648_v31, %v4652_v49  ;;  %v5978_v57 = vrot.slane %v5968_v54, %v10811_v6  ;;  %v4668_v18 = vrot.slane %v3969_v27, %v10740_v61 }
 0x5a6   : > { %v5985_v24 = vrot.slane %v5969_v7, %v10811_v6  ;;  %v5992_v40 = vrot.slane %v5970_v26, %v10811_v6  ;;  %v3284_v3 = vpop.xlane.xlu0 %3283  ;;  %v4672_v33 = vrot.slane %v3969_v27, %v10749_v36  ;;  %v4676_v13 = vrot.slane %v3969_v27, %v10752_v2 }
 0x5a7   : > { %v5999_v59 = vrot.slane %v5971_v55, %v10811_v6  ;;  %v11282_v45 = vsub.f32 %v3940_v60, %v3284_v3  ;;  %v4680_v8 = vrot.slane %v3969_v27, %v10762_v1  ;;  %v4684_v63 = vrot.slane %v3969_v27, %v10773_v12 }
 0x5a8   : > { %v6000_v34 = vcombine.low %v5978_v57, %v5985_v24  ;;  %v6017_v28 = vcombine.low %v4656_v16, %v4660_v52  ;;  %v6018_v62 = vcombine.low %v4664_v41, %v4668_v18  ;;  %v6019_v32 = vcombine.low %v4672_v33, %v4676_v13  ;;  %v3287_v0 = vpop.xlane.xlu1 %3286 }
 0x5a9   : > { %v6001_v38 = vcombine.low %v5992_v40, %v5999_v59  ;;  %v6020_v4 = vcombine.low %v4680_v8, %v4684_v63  ;;  %v11286_v43 = vsub.f32 %v3941_v53, %v3287_v0  ;;  %v4688_v15 = vrot.slane %v3970_v50, %v12090_v19 }
 0x5aa   : > { %v6008_v21 = vrot.slane %v6000_v34, %v10811_v6  ;;  %v6027_v60 = vrot.slane %v6017_v28, %v10811_v6  ;;  %v6034_v42 = vrot.slane %v6018_v62, %v10811_v6  ;;  %v6041_v25 = vrot.slane %v6019_v32, %v10811_v6  ;;  %v3290_v47 = vpop.xlane.xlu0 %3289 }
 0x5ab   : > { %v6015_v37 = vrot.slane %v6001_v38, %v10811_v6  ;;  %v6048_v27 = vrot.slane %v6020_v4, %v10811_v6  ;;  %v4692_v11 = vrot.slane %v3970_v50, %v12091_v51  ;;  %v4696_v14 = vrot.slane %v3970_v50, %v10737_v39 }
 0x5ac   : > { %v6049_v53 = vcombine.low %v6027_v60, %v6034_v42  ;;  %v4700_v44 = vrot.slane %v3970_v50, %v10740_v61  ;;  %v4704_v48 = vrot.slane %v3970_v50, %v10749_v36  ;;  %v4708_v35 = vrot.slane %v3970_v50, %v10752_v2  ;;  %v3293_v59 = vpop.xlane.xlu1 %3292 }
 0x5ad   : > { %v6016_v46 = vcombine.low %v6008_v21, %v6015_v37  ;;  %v6050_v31 = vcombine.low %v6041_v25, %v6048_v27  ;;  %v4712_v49 = vrot.slane %v3970_v50, %v10762_v1  ;;  %v4716_v54 = vrot.slane %v3970_v50, %v10773_v12 }
 0x5ae   : > { %v6057_v16 = vrot.slane %v6049_v53, %v10811_v6  ;;  %v6066_v10 = vcombine.low %v4688_v15, %v4692_v11  ;;  %v6067_v7 = vcombine.low %v4696_v14, %v4700_v44  ;;  %v6068_v26 = vcombine.low %v4704_v48, %v4708_v35  ;;  %v3296_v53 = vpop.xlane.xlu0 %3295 }
 0x5af   : > { %6663 = vperm.xlu0 %7302, %v6016_v46   ;;  %v6064_v52 = vrot.slane %v6050_v31, %v10811_v6  ;;  %v6069_v41 = vcombine.low %v4712_v49, %v4716_v54  ;;  %v11305_v55 = vsub.f32 %v11249_v23, %v3290_v47  ;;  %v4720_v57 = vrot.slane %v11273_v22, %v12090_v19 }
 0x5b0   : > { %v6076_v18 = vrot.slane %v6066_v10, %v10811_v6  ;;  %v6083_v24 = vrot.slane %v6067_v7, %v10811_v6  ;;  %v6090_v50 = vrot.slane %v6068_v26, %v10811_v6  ;;  %v4724_v40 = vrot.slane %v11273_v22, %v12091_v51 }
 0x5b1   : > { %v6065_v3 = vcombine.low %v6057_v16, %v6064_v52  ;;  %v6097_v33 = vrot.slane %v6069_v41, %v10811_v6  ;;  %v4728_v13 = vrot.slane %v11273_v22, %v10737_v39  ;;  %v4732_v23 = vrot.slane %v11273_v22, %v10740_v61 }
 0x5b2   : > { %v6098_v8 = vcombine.low %v6076_v18, %v6083_v24  ;;  %v4736_v63 = vrot.slane %v11273_v22, %v10749_v36  ;;  %v4740_v34 = vrot.slane %v11273_v22, %v10752_v2  ;;  %v4744_v28 = vrot.slane %v11273_v22, %v10762_v1 }
 0x5b3   : > { %6666 = vperm.xlu1 %7301, %v6065_v3   ;;  %v6099_v62 = vcombine.low %v6090_v50, %v6097_v33  ;;  %v4748_v32 = vrot.slane %v11273_v22, %v10773_v12  ;;  %v6115_v0 = vcombine.low %v4720_v57, %v4724_v40  ;;  %v6116_v38 = vcombine.low %v4728_v13, %v4732_v23  ;;  %v3299_v23 = vpop.xlane.xlu1 %3298 }
 0x5b4   : > { %v6106_v4 = vrot.slane %v6098_v8, %v10811_v6  ;;  %v6117_v15 = vcombine.low %v4736_v63, %v4740_v34  ;;  %v11329_v21 = vsub.f32 %v11243_v29, %v3293_v59  ;;  %v4752_v60 = vrot.slane %v11282_v45, %v12090_v19 }
 0x5b5   : > { %v6113_v42 = vrot.slane %v6099_v62, %v10811_v6  ;;  %v6118_v25 = vcombine.low %v4744_v28, %v4748_v32  ;;  %v6125_v37 = vrot.slane %v6115_v0, %v10811_v6  ;;  %v6132_v27 = vrot.slane %v6116_v38, %v10811_v6 }
 0x5b6   : > { %v6139_v22 = vrot.slane %v6117_v15, %v10811_v6  ;;  %v4756_v11 = vrot.slane %v11282_v45, %v12091_v51  ;;  %v4760_v14 = vrot.slane %v11282_v45, %v10737_v39  ;;  %v4764_v29 = vrot.slane %v11282_v45, %v10740_v61 }
 0x5b7   : > { %v6114_v44 = vcombine.low %v6106_v4, %v6113_v42  ;;  %v6146_v48 = vrot.slane %v6118_v25, %v10811_v6  ;;  %v6147_v35 = vcombine.low %v6125_v37, %v6132_v27  ;;  %v4768_v47 = vrot.slane %v11282_v45, %v10749_v36 }
 0x5b8   : > { %v4772_v46 = vrot.slane %v11282_v45, %v10752_v2  ;;  %v4776_v31 = vrot.slane %v11282_v45, %v10762_v1  ;;  %v4780_v49 = vrot.slane %v11282_v45, %v10773_v12  ;;  %v6164_v54 = vcombine.low %v4752_v60, %v4756_v11 }
 0x5b9   : > { %6669 = vperm.xlu0 %7302, %v6114_v44   ;;  %v6148_v16 = vcombine.low %v6139_v22, %v6146_v48  ;;  %v6155_v10 = vrot.slane %v6147_v35, %v10811_v6  ;;  %v6165_v7 = vcombine.low %v4760_v14, %v4764_v29  ;;  %v11354_v26 = vsub.f32 %v11251_v17, %v3296_v53  ;;  %v3302_v14 = vpop.xlane.xlu0 %3301 }
 0x5ba   : > { %v6166_v52 = vcombine.low %v4768_v47, %v4772_v46  ;;  %v6167_v41 = vcombine.low %v4776_v31, %v4780_v49  ;;  %v6174_v57 = vrot.slane %v6164_v54, %v10811_v6  ;;  %v4784_v18 = vrot.slane %v11286_v43, %v12090_v19 }
 0x5bb   : > { %v6162_v24 = vrot.slane %v6148_v16, %v10811_v6  ;;  %v6181_v45 = vrot.slane %v6165_v7, %v10811_v6  ;;  %v4788_v50 = vrot.slane %v11286_v43, %v12091_v51  ;;  %v4792_v40 = vrot.slane %v11286_v43, %v10737_v39 }
 0x5bc   : > { %v6188_v17 = vrot.slane %v6166_v52, %v10811_v6  ;;  %v6195_v3 = vrot.slane %v6167_v41, %v10811_v6  ;;  %v4796_v33 = vrot.slane %v11286_v43, %v10740_v61  ;;  %v4800_v13 = vrot.slane %v11286_v43, %v10749_v36 }
 0x5bd   : > { %v6163_v59 = vcombine.low %v6155_v10, %v6162_v24  ;;  %v6196_v8 = vcombine.low %v6174_v57, %v6181_v45  ;;  %v4804_v63 = vrot.slane %v11286_v43, %v10752_v2  ;;  %v4808_v34 = vrot.slane %v11286_v43, %v10762_v1 }
 0x5be   : > { %v6197_v28 = vcombine.low %v6188_v17, %v6195_v3  ;;  %v4812_v62 = vrot.slane %v11286_v43, %v10773_v12  ;;  %v6213_v32 = vcombine.low %v4784_v18, %v4788_v50  ;;  %v6214_v0 = vcombine.low %v4792_v40, %v4796_v33  ;;  %v3305_v3 = vpop.xlane.xlu1 %3304 }
 0x5bf   : > { %6672 = vperm.xlu1 %7301, %v6163_v59   ;;  %v6204_v38 = vrot.slane %v6196_v8, %v10811_v6  ;;  %v6215_v4 = vcombine.low %v4800_v13, %v4804_v63  ;;  %v11379_v15 = vsub.f32 %v11247_v9, %v3299_v23  ;;  %v4816_v60 = vrot.slane %v11305_v55, %v12090_v19 }
 0x5c0   : > { %v6211_v42 = vrot.slane %v6197_v28, %v10811_v6  ;;  %v6216_v25 = vcombine.low %v4808_v34, %v4812_v62  ;;  %v6223_v37 = vrot.slane %v6213_v32, %v10811_v6  ;;  %v6230_v27 = vrot.slane %v6214_v0, %v10811_v6 }
 0x5c1   : > { %v6237_v43 = vrot.slane %v6215_v4, %v10811_v6  ;;  %v4820_v22 = vrot.slane %v11305_v55, %v12091_v51  ;;  %v4824_v11 = vrot.slane %v11305_v55, %v10737_v39  ;;  %v4828_v9 = vrot.slane %v11305_v55, %v10740_v61 }
 0x5c2   : > { %v6212_v29 = vcombine.low %v6204_v38, %v6211_v42  ;;  %v6244_v53 = vrot.slane %v6216_v25, %v10811_v6  ;;  %v6245_v44 = vcombine.low %v6223_v37, %v6230_v27  ;;  %v4832_v48 = vrot.slane %v11305_v55, %v10749_v36 }
 0x5c3   : > { %v4836_v35 = vrot.slane %v11305_v55, %v10752_v2  ;;  %v4840_v47 = vrot.slane %v11305_v55, %v10762_v1  ;;  %v4844_v46 = vrot.slane %v11305_v55, %v10773_v12  ;;  %v6262_v31 = vcombine.low %v4816_v60, %v4820_v22 }
 0x5c4   : > { %6675 = vperm.xlu0 %7302, %v6212_v29   ;;  %v6246_v49 = vcombine.low %v6237_v43, %v6244_v53  ;;  %v6253_v54 = vrot.slane %v6245_v44, %v10811_v6  ;;  %v6263_v16 = vcombine.low %v4824_v11, %v4828_v9  ;;  %v11404_v10 = vsub.f32 %v11253_v58, %v3302_v14 }
 0x5c5   : > { %v6264_v7 = vcombine.low %v4832_v48, %v4836_v35  ;;  %v6265_v52 = vcombine.low %v4840_v47, %v4844_v46  ;;  %v6272_v41 = vrot.slane %v6262_v31, %v10811_v6  ;;  %v4848_v57 = vrot.slane %v11329_v21, %v12090_v19 }
 0x5c6   : > { %v6260_v18 = vrot.slane %v6246_v49, %v10811_v6  ;;  %v6279_v55 = vrot.slane %v6263_v16, %v10811_v6  ;;  %v4852_v24 = vrot.slane %v11329_v21, %v12091_v51  ;;  %v4856_v45 = vrot.slane %v11329_v21, %v10737_v39 }
 0x5c7   : > { %v6286_v58 = vrot.slane %v6264_v7, %v10811_v6  ;;  %v6293_v50 = vrot.slane %v6265_v52, %v10811_v6  ;;  %v4860_v40 = vrot.slane %v11329_v21, %v10740_v61  ;;  %v4864_v17 = vrot.slane %v11329_v21, %v10749_v36 }
 0x5c8   : > { %v6261_v33 = vcombine.low %v6253_v54, %v6260_v18  ;;  %v6294_v13 = vcombine.low %v6272_v41, %v6279_v55  ;;  %v4868_v23 = vrot.slane %v11329_v21, %v10752_v2  ;;  %v4872_v59 = vrot.slane %v11329_v21, %v10762_v1 }
 0x5c9   : > { %v6295_v8 = vcombine.low %v6286_v58, %v6293_v50  ;;  %v4876_v63 = vrot.slane %v11329_v21, %v10773_v12  ;;  %v6311_v34 = vcombine.low %v4848_v57, %v4852_v24  ;;  %v6312_v28 = vcombine.low %v4856_v45, %v4860_v40 }
 0x5ca   : > { %6678 = vperm.xlu1 %7301, %v6261_v33   ;;  %v6302_v62 = vrot.slane %v6294_v13, %v10811_v6  ;;  %v6313_v32 = vcombine.low %v4864_v17, %v4868_v23  ;;  %v11429_v0 = vsub.f32 %v11255_v5, %v3305_v3  ;;  %v4880_v38 = vrot.slane %v11354_v26, %v12090_v19  ;;  %v3308_v43 = vpop.xlane.xlu0 %3307 }
 0x5cb   : > { %v6309_v4 = vrot.slane %v6295_v8, %v10811_v6  ;;  %v6314_v60 = vcombine.low %v4872_v59, %v4876_v63  ;;  %v6321_v42 = vrot.slane %v6311_v34, %v10811_v6  ;;  %v6328_v25 = vrot.slane %v6312_v28, %v10811_v6 }
 0x5cc   : > { %v6335_v21 = vrot.slane %v6313_v32, %v10811_v6  ;;  %v4884_v37 = vrot.slane %v11354_v26, %v12091_v51  ;;  %v4888_v27 = vrot.slane %v11354_v26, %v10737_v39  ;;  %v4892_v5 = vrot.slane %v11354_v26, %v10740_v61 }
 0x5cd   : > { %v6310_v22 = vcombine.low %v6302_v62, %v6309_v4  ;;  %v6342_v11 = vrot.slane %v6314_v60, %v10811_v6  ;;  %v6343_v9 = vcombine.low %v6321_v42, %v6328_v25  ;;  %v4896_v14 = vrot.slane %v11354_v26, %v10749_v36 }
 0x5ce   : > { %v4900_v29 = vrot.slane %v11354_v26, %v10752_v2  ;;  %v4904_v53 = vrot.slane %v11354_v26, %v10762_v1  ;;  %v4908_v44 = vrot.slane %v11354_v26, %v10773_v12  ;;  %v6360_v48 = vcombine.low %v4880_v38, %v4884_v37  ;;  %v3884_v58 = vpop.xlane.xlu0 %3883 }
 0x5cf   : > { %6681 = vperm.xlu0 %7302, %v6310_v22   ;;  %v6344_v35 = vcombine.low %v6335_v21, %v6342_v11  ;;  %v6351_v47 = vrot.slane %v6343_v9, %v10811_v6  ;;  %v6361_v46 = vcombine.low %v4888_v27, %v4892_v5  ;;  %v4912_v31 = vrot.slane %v11379_v15, %v12090_v19 }
 0x5d0   : > { %v6362_v49 = vcombine.low %v4896_v14, %v4900_v29  ;;  %v6363_v54 = vcombine.low %v4904_v53, %v4908_v44  ;;  %v6370_v16 = vrot.slane %v6360_v48, %v10811_v6  ;;  %v4916_v7 = vrot.slane %v11379_v15, %v12091_v51 }
 0x5d1   : > { %v6358_v52 = vrot.slane %v6344_v35, %v10811_v6  ;;  %v6377_v26 = vrot.slane %v6361_v46, %v10811_v6  ;;  %v4920_v41 = vrot.slane %v11379_v15, %v10737_v39  ;;  %v4924_v57 = vrot.slane %v11379_v15, %v10740_v61 }
 0x5d2   : > { %v6384_v18 = vrot.slane %v6362_v49, %v10811_v6  ;;  %v6391_v55 = vrot.slane %v6363_v54, %v10811_v6  ;;  %v4928_v24 = vrot.slane %v11379_v15, %v10749_v36  ;;  %v4932_v45 = vrot.slane %v11379_v15, %v10752_v2 }
 0x5d3   : > { %v6359_v50 = vcombine.low %v6351_v47, %v6358_v52  ;;  %6648 = vperm.xlu0 %7302, %v11257_v30   ;;  %v6392_v40 = vcombine.low %v6370_v16, %v6377_v26  ;;  %v4936_v17 = vrot.slane %v11379_v15, %v10762_v1  ;;  %v4940_v3 = vrot.slane %v11379_v15, %v10773_v12 }
 0x5d4   : > { %v6393_v33 = vcombine.low %v6384_v18, %v6391_v55  ;;  %v6409_v13 = vcombine.low %v4912_v31, %v4916_v7  ;;  %v6410_v23 = vcombine.low %v4920_v41, %v4924_v57  ;;  %v6411_v59 = vcombine.low %v4928_v24, %v4932_v45 }
 0x5d5   : > { %6684 = vperm.xlu1 %7301, %v6359_v50   ;;  %v6400_v8 = vrot.slane %v6392_v40, %v10811_v6  ;;  %v6412_v63 = vcombine.low %v4936_v17, %v4940_v3  ;;  %v7103_v34 = vadd.f32 -1.0, %v3884_v58  ;;  %v4944_v28 = vrot.slane %v11404_v10, %v12090_v19 }
 0x5d6   : > { %v6407_v30 = vrot.slane %v6393_v33, %v10811_v6  ;;  %v6419_v62 = vrot.slane %v6409_v13, %v10811_v6  ;;  %v6426_v32 = vrot.slane %v6410_v23, %v10811_v6  ;;  %v6433_v15 = vrot.slane %v6411_v59, %v10811_v6 }
 0x5d7   : > { %6651 = vperm.xlu0 %7302, %v11259_v20   ;;  %v6440_v38 = vrot.slane %v6412_v63, %v10811_v6  ;;  %v3948_v4 = vmul.f32 0.5, %v7103_v34  ;;  %v4948_v60 = vrot.slane %v11404_v10, %v12091_v51  ;;  %v4952_v42 = vrot.slane %v11404_v10, %v10737_v39 }
 0x5d8   : > { %v6408_v25 = vcombine.low %v6400_v8, %v6407_v30  ;;  %v6441_v21 = vcombine.low %v6419_v62, %v6426_v32  ;;  %v4956_v37 = vrot.slane %v11404_v10, %v10740_v61  ;;  %v4960_v27 = vrot.slane %v11404_v10, %v10749_v36 }
 0x5d9   : > { %v6442_v5 = vcombine.low %v6433_v15, %v6440_v38  ;;  %v3980_v22 = vsub.f32 %v3948_v4, %v3308_v43  ;;  %v4964_v20 = vrot.slane %v11404_v10, %v10752_v2  ;;  %v4968_v11 = vrot.slane %v11404_v10, %v10762_v1 }
 0x5da   : > { %6687 = vperm.xlu1 %7301, %v6408_v25   ;;  %v6449_v9 = vrot.slane %v6441_v21, %v10811_v6  ;;  %v4972_v14 = vrot.slane %v11404_v10, %v10773_v12  ;;  %v6458_v29 = vcombine.low %v4944_v28, %v4948_v60  ;;  %v6459_v53 = vcombine.low %v4952_v42, %v4956_v37 }
 0x5db   : > { %v6456_v44 = vrot.slane %v6442_v5, %v10811_v6  ;;  %v6460_v48 = vcombine.low %v4960_v27, %v4964_v20  ;;  %v4976_v43 = vrot.slane %v11429_v0, %v12090_v19  ;;  %v4980_v35 = vrot.slane %v11429_v0, %v12091_v51 }
 0x5dc   : > { %v6461_v47 = vcombine.low %v4968_v11, %v4972_v14  ;;  %v6468_v46 = vrot.slane %v6458_v29, %v10811_v6  ;;  %v6475_v31 = vrot.slane %v6459_v53, %v10811_v6  ;;  %v4984_v49 = vrot.slane %v11429_v0, %v10737_v39 }
 0x5dd   : > { %v6457_v10 = vcombine.low %v6449_v9, %v6456_v44  ;;  %v6482_v54 = vrot.slane %v6460_v48, %v10811_v6  ;;  %v4988_v16 = vrot.slane %v11429_v0, %v10740_v61  ;;  %v4992_v7 = vrot.slane %v11429_v0, %v10749_v36  ;;  %v11558_v48 = vpop.permute.xlu0 %6609 }
 0x5de   : > { %v6489_v52 = vrot.slane %v6461_v47, %v10811_v6  ;;  %v6490_v26 = vcombine.low %v6468_v46, %v6475_v31  ;;  %v4996_v41 = vrot.slane %v11429_v0, %v10752_v2  ;;  %v5000_v57 = vrot.slane %v11429_v0, %v10762_v1 }
 0x5df   : > { %6690 = vperm.xlu1 %7301, %v6457_v10   ;;  %v5004_v18 = vrot.slane %v11429_v0, %v10773_v12  ;;  %v6507_v55 = vcombine.low %v4976_v43, %v4980_v35  ;;  %v6508_v24 = vcombine.low %v4984_v49, %v4988_v16  ;;  %v5008_v23 = vrot.slane %v3980_v22, %v12090_v19 }
 0x5e0   : > { %v6491_v45 = vcombine.low %v6482_v54, %v6489_v52  ;;  %v6498_v58 = vrot.slane %v6490_v26, %v10811_v6  ;;  %v6509_v50 = vcombine.low %v4992_v7, %v4996_v41  ;;  %v5012_v8 = vrot.slane %v3980_v22, %v12091_v51 }
 0x5e1   : > { %v6510_v40 = vcombine.low %v5000_v57, %v5004_v18  ;;  %v6517_v17 = vrot.slane %v6507_v55, %v10811_v6  ;;  %v6524_v3 = vrot.slane %v6508_v24, %v10811_v6  ;;  %v5016_v34 = vrot.slane %v3980_v22, %v10737_v39 }
 0x5e2   : > { %v6505_v33 = vrot.slane %v6491_v45, %v10811_v6  ;;  %v6531_v13 = vrot.slane %v6509_v50, %v10811_v6  ;;  %v5020_v28 = vrot.slane %v3980_v22, %v10740_v61  ;;  %v5024_v30 = vrot.slane %v3980_v22, %v10749_v36 }
 0x5e3   : > { %v6538_v59 = vrot.slane %v6510_v40, %v10811_v6  ;;  %v6539_v0 = vcombine.low %v6517_v17, %v6524_v3  ;;  %v5028_v15 = vrot.slane %v3980_v22, %v10752_v2  ;;  %v5032_v38 = vrot.slane %v3980_v22, %v10762_v1 }
 0x5e4   : > { %v6506_v63 = vcombine.low %v6498_v58, %v6505_v33  ;;  %v5036_v19 = vrot.slane %v3980_v22, %v10773_v12  ;;  %v6556_v4 = vcombine.low %v5008_v23, %v5012_v8  ;;  %v6557_v60 = vcombine.low %v5016_v34, %v5020_v28  ;;  %v11542_v22 = vpop.permute.xlu1 %6606 }
 0x5e5   : > { %v6540_v62 = vcombine.low %v6531_v13, %v6538_v59  ;;  %v6547_v32 = vrot.slane %v6539_v0, %v10811_v6  ;;  %v6558_v42 = vcombine.low %v5024_v30, %v5028_v15  ;;  %v12124_v41 = vlaneseq }
 0x5e6   : > { %6693 = vperm.xlu1 %7301, %v6506_v63   ;;  %v6559_v39 = vcombine.low %v5032_v38, %v5036_v19  ;;  %v6566_v61 = vrot.slane %v6556_v4, %v10811_v6  ;;  %v6573_v36 = vrot.slane %v6557_v60, %v10811_v6  ;;  %vm6726_vm3 = vcmask 261312  }
 0x5e7   : > { %v6554_v51 = vrot.slane %v6540_v62, %v10811_v6  ;;  %v6580_v21 = vrot.slane %v6558_v42, %v10811_v6  ;;  %v11585_v57 = vand.u32 127, %v12124_v41  ;;  %vm6733_vm4 = vcmask 326912  }
 0x5e8   : > { %v6587_v2 = vrot.slane %v6559_v39, %v10811_v6  ;;  %v6588_v37 = vcombine.low %v6566_v61, %v6573_v36  ;;  %v11544_v20 = vpop.permute.xlu1 %6612  ;;  %vm6740_vm5 = vcmask 392512   ;;  %vm6747_vm6 = vcmask 458112  }
 0x5e9   : > { %v6555_v25 = vcombine.low %v6547_v32, %v6554_v51  ;;  %v6707_v55 = vadd.s32 4294967288, %v11585_v57  ;;  %v6714_v24 = vadd.s32 4294967280, %v11585_v57  ;;  %v6721_v58 = vadd.s32 4294967272, %v11585_v57 }
 0x5ea   : > { %v6589_v1 = vcombine.low %v6580_v21, %v6587_v2  ;;  %v6596_v12 = vrot.slane %v6588_v37, %v10811_v6  ;;  %v6728_v50 = vadd.s32 4294967264, %v11585_v57  ;;  %v6705_v17 = vsub.s32 %v11585_v57, %v12092_v56 }
 0x5eb   : > { %6696 = vperm.xlu1 %7301, %v6555_v25   ;;  %v6710_v3 = vsub.s32 %v6707_v55, %v12092_v56  ;;  %v6735_v33 = vadd.s32 4294967256, %v11585_v57  ;;  %v6717_v13 = vsub.s32 %v6714_v24, %v12092_v56  ;;  %v6742_v23 = vadd.s32 4294967248, %v11585_v57 }
 0x5ec   : > { %v6603_v27 = vrot.slane %v6589_v1, %v10811_v6  ;;  %v11546_v11 = vpop.permute.xlu1 %6615  ;;  %v6749_v59 = vadd.s32 4294967240, %v11585_v57  ;;  %v6756_v0 = vadd.s32 4294967232, %v11585_v57  ;;  %v6763_v8 = vadd.s32 4294967224, %v11585_v57 }
 0x5ed   : > { %v6724_v34 = vsub.s32 %v6721_v58, %v12092_v56  ;;  %v6731_v28 = vsub.s32 %v6728_v50, %v12092_v56  ;;  %v6770_v30 = vadd.s32 4294967216, %v11585_v57  ;;  %v6738_v62 = vsub.s32 %v6735_v33, %v12092_v56 }
 0x5ee   : > { %v6604_v5 = vcombine.low %v6596_v12, %v6603_v27  ;;  %v6777_v32 = vadd.s32 4294967208, %v11585_v57  ;;  %v6784_v15 = vadd.s32 4294967200, %v11585_v57  ;;  %v6711_v38 = vrot.slane %v11558_v48, %v6710_v3 }
 0x5ef   : > { %v11560_v43 = vpop.permute.xlu0 %6636  ;;  %v6745_v19 = vsub.s32 %v6742_v23, %v12092_v56  ;;  %v6752_v4 = vsub.s32 %v6749_v59, %v12092_v56  ;;  %vm6754_vm7 = vcmask 523712   ;;  %v6718_v51 = vrot.slane %v11544_v20, %v6717_v13 }
 0x5f0   : > { %6699 = vperm.xlu1 %7301, %v6604_v5   ;;  %v11548_v9 = vpop.permute.xlu1 %6618  ;;  %v6759_v42 = vsub.s32 %v6756_v0, %v12092_v56  ;;  %v11622_v39 = vsub.s32 %v6763_v8, %v12092_v56  ;;  %v6791_v61 = vadd.s32 4294967192, %v11585_v57  ;;  %v6706_v25 = vrot.slane %v11542_v22, %v6705_v17 }
 0x5f1   : > { %v6725_v21 = vrot.slane %v11546_v11, %v6724_v34  ;;  %vm6761_vm8 = vcmask 589312   ;;  %v11630_v2 = vsub.s32 %v6770_v30, %v12092_v56  ;;  %v6732_v1 = vrot.slane %v11548_v9, %v6731_v28 }
 0x5f2   : > { %vm6768_vm9 = vcmask 654912   ;;  %v11635_v12 = vsub.s32 %v6777_v32, %v12092_v56  ;;  %v11638_v27 = vsub.s32 %v6784_v15, %v12092_v56  ;;  %v6713_v22 = vsel %vm6712_vm1, %v6711_v38, %v6706_v25 }
 0x5f3   : > { %vm6775_vm10 = vcmask 720512   ;;  %v6720_v9 = vsel %vm6719_vm2, %v6718_v51, %v6713_v22  ;;  %vm6782_vm11 = vcmask 786112   ;;  %v6794_v55 = vsub.s32 %v6791_v61, %v12092_v56 }
 0x5f4   : > { %v11550_v14 = vpop.permute.xlu1 %6621  ;;  %v11566_v46 = vpop.permute.xlu0 %6639  ;;  %vm6789_vm12 = vcmask 851712   ;;  %vm6796_vm13 = vcmask 917312   ;;  %v6805_v23 = vadd.s32 4294967176, %v11585_v57  ;;  %vm6803_vm14 = vcmask 982912  }
 0x5f5   : > { %v6739_v20 = vrot.slane %v11550_v14, %v6738_v62  ;;  %vm6810_vm15 = vcmask 1048512   ;;  %vm6909_vm0 = vcmp.lt.s32.totalorder %v12124_v41, 256 }
 0x5f6   : > { %v6808_v15 = vsub.s32 %v6805_v23, %v12092_v56 }
 0x5f8   : > { %v11552_v29 = vpop.permute.xlu1 %6624 }
 0x5fa   : > { %v11570_v49 = vpop.permute.xlu0 %6642 }
 0x5fc   : > { %v11554_v53 = vpop.permute.xlu1 %6627 }
 0x5fd   : > { %v6753_v58 = vrot.slane %v11554_v53, %v6752_v4 }
 0x5ff   : > { %v11576_v16 = vpop.permute.xlu0 %6645 }
 0x600   : > { %v11556_v44 = vpop.permute.xlu1 %6630 }
 0x601   : > { %v6760_v59 = vrot.slane %v11556_v44, %v6759_v42 }
 0x604   : > { %v11562_v35 = vpop.permute.xlu1 %6633 }
 0x60c   : > { %v11564_v47 = vpop.permute.xlu1 %6654 }
 0x60d   : > { %v6815_v11 = vrot.slane %v11564_v47, %v6705_v17 }
 0x619   : > { %v11580_v52 = vpop.permute.xlu0 %6657 }
 0x61a   : > { %v6819_v37 = vrot.slane %v11580_v52, %v6710_v3  ;;  %v6746_v52 = vrot.slane %v11552_v29, %v6745_v19  ;;  %v6798_v3 = vadd.s32 4294967184, %v11585_v57  ;;  %v6774_v57 = vrot.slane %v11560_v43, %v11630_v2 }
 0x61c   : > { %v11568_v31 = vpop.permute.xlu1 %6660  ;;  %v6820_v14 = vsel %vm6712_vm1, %v6819_v37, %v6815_v11 }
 0x61d   : > { %v6824_v5 = vrot.slane %v11568_v31, %v6717_v13  ;;  %v6727_v31 = vsel %vm6726_vm3, %v6725_v21, %v6720_v9 }
 0x61f   : > { %v6825_v29 = vsel %vm6719_vm2, %v6824_v5, %v6820_v14 }
 0x62a   : > { %v11587_v18 = vpop.permute.xlu0 %6663 }
 0x62b   : > { %v6829_v48 = vrot.slane %v11587_v18, %v6724_v34  ;;  %v6734_v18 = vsel %vm6733_vm4, %v6732_v1, %v6727_v31  ;;  %v6767_v34 = vrot.slane %v11562_v35, %v11622_v39 }
 0x62c   : > { %v6741_v33 = vsel %vm6740_vm5, %v6739_v20, %v6734_v18 }
 0x62d   : > { %v6830_v53 = vsel %vm6726_vm3, %v6829_v48, %v6825_v29 }
 0x62e   : > { %v11572_v10 = vpop.permute.xlu1 %6666 }
 0x62f   : > { %v6834_v24 = vrot.slane %v11572_v10, %v6731_v28 }
 0x631   : > { %v6835_v0 = vsel %vm6733_vm4, %v6834_v24, %v6830_v53 }
 0x634   : > { %v11591_v45 = vpop.permute.xlu0 %6669 }
 0x635   : > { %v6839_v47 = vrot.slane %v11591_v45, %v6738_v62  ;;  %v6748_v45 = vsel %vm6747_vm6, %v6746_v52, %v6741_v33  ;;  %v6781_v62 = vrot.slane %v11566_v46, %v11635_v12 }
 0x637   : > { %v6840_v28 = vsel %vm6740_vm5, %v6839_v47, %v6835_v0 }
 0x63a   : > { %v11574_v54 = vpop.permute.xlu1 %6672 }
 0x63b   : > { %v6844_v17 = vrot.slane %v11574_v54, %v6745_v19  ;;  %v6755_v54 = vsel %vm6754_vm7, %v6753_v58, %v6748_v45  ;;  %v6788_v19 = vrot.slane %v11570_v49, %v11638_v27 }
 0x63c   : > { %v6762_v43 = vsel %vm6761_vm8, %v6760_v59, %v6755_v54 }
 0x63d   : > { %v6845_v44 = vsel %vm6747_vm6, %v6844_v17, %v6840_v28  ;;  %v6769_v46 = vsel %vm6768_vm9, %v6767_v34, %v6762_v43 }
 0x63f   : > { %v11606_v63 = vpop.permute.xlu0 %6675 }
 0x640   : > { %v6849_v13 = vrot.slane %v11606_v63, %v6752_v4 }
 0x642   : > { %v6850_v35 = vsel %vm6754_vm7, %v6849_v13, %v6845_v44 }
 0x645   : > { %v11578_v7 = vpop.permute.xlu1 %6678 }
 0x646   : > { %v6854_v8 = vrot.slane %v11578_v7, %v6759_v42  ;;  %v6801_v7 = vsub.s32 %v6798_v3, %v12092_v56 }
 0x64a   : > { %v11625_v36 = vpop.permute.xlu0 %6681 }
 0x64b   : > { %v6859_v63 = vrot.slane %v11625_v36, %v11622_v39  ;;  %v6776_v39 = vsel %vm6775_vm10, %v6774_v57, %v6769_v46 }
 0x64c   : > { %v6783_v25 = vsel %vm6782_vm11, %v6781_v62, %v6776_v39 }
 0x64e   : > { %v6649_v10 = vpop.permute.xlu0 %6648 }
 0x64f   : > { %v6802_v61 = vrot.slane %v6649_v10, %v6801_v7 }
 0x650   : > { %v11582_v26 = vpop.permute.xlu1 %6684 }
 0x651   : > { %v6864_v30 = vrot.slane %v11582_v26, %v11630_v2  ;;  %v6855_v26 = vsel %vm6761_vm8, %v6854_v8, %v6850_v35  ;;  %v6790_v2 = vsel %vm6789_vm12, %v6788_v19, %v6783_v25 }
 0x652   : > { %v6652_v4 = vpop.permute.xlu0 %6651  ;;  %v6860_v56 = vsel %vm6768_vm9, %v6859_v63, %v6855_v26 }
 0x653   : > { %v6865_v49 = vsel %vm6775_vm10, %v6864_v30, %v6860_v56  ;;  %v6809_v21 = vrot.slane %v6652_v4, %v6808_v15 }
 0x655   : > { %v11595_v40 = vpop.permute.xlu1 %6687 }
 0x656   : > { %v6869_v32 = vrot.slane %v11595_v40, %v11635_v12  ;;  %v6795_v40 = vrot.slane %v11576_v16, %v6794_v55 }
 0x658   : > { %v6797_v1 = vsel %vm6796_vm13, %v6795_v40, %v6790_v2 }
 0x659   : > { %v6804_v5 = vsel %vm6803_vm14, %v6802_v61, %v6797_v1 }
 0x65a   : > { %v11617_v60 = vpop.permute.xlu1 %6690  ;;  %v6811_v20 = vsel %vm6810_vm15, %v6809_v21, %v6804_v5 }
 0x65b   : > { %v6874_v51 = vrot.slane %v11617_v60, %v11638_v27  ;;  %v6870_v60 = vsel %vm6782_vm11, %v6869_v32, %v6865_v49 }
 0x65d   : > { %v6875_v16 = vsel %vm6789_vm12, %v6874_v51, %v6870_v60 }
 0x661   : > { %v6694_v50 = vpop.permute.xlu1 %6693 }
 0x662   : > { %v6879_v42 = vrot.slane %v6694_v50, %v6794_v55 }
 0x664   : > { %v6880_v12 = vsel %vm6796_vm13, %v6879_v42, %v6875_v16 }
 0x666   : > { %v6697_v38 = vpop.permute.xlu1 %6696 }
 0x667   : > { %v6884_v36 = vrot.slane %v6697_v38, %v6801_v7 }
 0x669   : > { %v6885_v22 = vsel %vm6803_vm14, %v6884_v36, %v6880_v12 }
 0x66b   : > { %v6700_v37 = vpop.permute.xlu1 %6699 }
 0x66c   : > { %v6889_v27 = vrot.slane %v6700_v37, %v6808_v15 }
 0x66e   : > { %v6890_v11 = vsel %vm6810_vm15, %v6889_v27, %v6885_v22 }
 0x66f   : > { %v6891_v48 = vcombine.low %v6811_v20, %v6890_v11 }
 0x671   : > { %v6898_v9 = vrot.slane %v6891_v48, %v10811_v6 }
 0x673   : > { %v6905_v52 = vrot.slane %v6898_v9, %v10811_v6 }
 0x675   : > { %6911 = vst.msk [vmem:[%s384_s20] sm:$0x3] %vm6909_vm0, %v6905_v52 }
 0x676 PF: > { %s20_s13 = sadd.s32 1, %s7783_s13  }
 0x677   : > { %p17_p5 = scmp.ge.s32.totalorder %s20_s13, 4  }
 0x679   :  { %19 = sbr.rel (!%p17_p5) target bundleno = 1 (0x1), region = 93 }

</bundles_post_ra>
